<compile_context>
chip_gen: v6e
topology: v6e:2x2x1
jax: 0.10.0
libtpu: 0.0.40
codegen_flags: <defaults>
</compile_context>

<pallas_src>
import functools
import math

import numpy as np
import jax
import jax.numpy as jnp
from jax import lax
from jax.experimental import pallas as pl
from jax.experimental.pallas import tpu as pltpu

LN_EPS = 1e-5
NEG_INF = -1e9  # off-window mask: exp underflows to exactly 0 in f32

_PARAM_ORDER = ("g1", "b1", "wq_pad", "bq_pad", "wk", "bk", "wv", "bv",
                "wo", "bo", "g2", "b2", "w1", "bb1", "w2", "bb2")


# --------------------------------------------------------------------------
# in-kernel helpers
# --------------------------------------------------------------------------
def _erf(x):
    # Abramowitz & Stegun 7.1.26, |err| <= 1.5e-7 (f32-exact for our purposes).
    # Avoids lax.erf inside the kernel (not guaranteed in the Mosaic lowering).
    p = 0.3275911
    a1, a2, a3, a4, a5 = (0.254829592, -0.284496736, 1.421413741,
                          -1.453152027, 1.061405429)
    ax = jnp.abs(x)
    t = 1.0 / (1.0 + p * ax)
    poly = ((((a5 * t + a4) * t + a3) * t + a2) * t + a1) * t
    y = 1.0 - poly * jnp.exp(-(ax * ax))
    return jnp.where(x >= 0.0, y, -y)


def _layer_norm(x, gamma, beta):
    mu = jnp.mean(x, axis=-1, keepdims=True)
    var = jnp.mean((x - mu) ** 2, axis=-1, keepdims=True)
    return (x - mu) * lax.rsqrt(var + LN_EPS) * gamma + beta


# --------------------------------------------------------------------------
# fused BasicLayer kernel: one grid step == `bpg` images through ALL blocks
# --------------------------------------------------------------------------
def _basic_layer_kernel(x_ref, bias_ref,
                        g1_ref, b1_ref,
                        wqp_ref, bqp_ref, wk_ref, bk_ref, wv_ref, bv_ref,
                        wo_ref, bo_ref,
                        g2_ref, b2_ref,
                        w1_ref, bb1_ref, w2_ref, bb2_ref,
                        o_ref, *, depth, bpg, L, nh, scale):
    C = x_ref.shape[-1]
    dh = C // nh
    M = bpg * L

    if bpg == 1:
        x = x_ref[0]                                   # (L, C) f32, raster order
    else:
        x = x_ref[...].reshape(M, C)                   # major-dim merge only (safe)

    # per-head 0/1 column masks (compile-time static, built from a 2-D iota)
    col = lax.broadcasted_iota(jnp.int32, (1, C), 1)
    head_masks = [((col >= h * dh) & (col < (h + 1) * dh)).astype(jnp.float32)
                  for h in range(nh)]

    # depth is tiny (2): static unroll; the residual stream never leaves VMEM. [1]
    for d in range(depth):
        # ------------- LayerNorm 1 (f32) -------------
        xn = _layer_norm(x, g1_ref[d], b1_ref[d])
        xb = xn.astype(jnp.bfloat16)

        # ------------- shared K / V projections: full-width matmuls [2] -----
        k = jnp.dot(xb, wk_ref[d], preferred_element_type=jnp.float32) + bk_ref[d]
        v = jnp.dot(xb, wv_ref[d], preferred_element_type=jnp.float32) + bv_ref[d]
        kb = k.astype(jnp.bfloat16)

        # ------------- windowed attention (dense + block-diagonal bias) -----
        attn_out = jnp.zeros((M, C), jnp.float32)
        for h in range(nh):
            # Q for head h: weight columns outside head h are zero-padded
            # host-side, so the contraction with full-width K only sums head-h
            # channels.  The padding is free on the MXU (<=128 lanes either way)
            # and removes every in-kernel lane slice / head reshape. [2]
            q_h = (jnp.dot(xb, wqp_ref[d, h], preferred_element_type=jnp.float32)
                   + bqp_ref[d, h]) * scale
            qb_h = q_h.astype(jnp.bfloat16)
            vb_h = (v * head_masks[h]).astype(jnp.bfloat16)   # head-h cols of V

            pieces = []
            for i in range(bpg):                       # per image (row slices only)
                rs = slice(i * L, (i + 1) * L)
                s = jnp.einsum('ld,md->lm', qb_h[rs], kb[rs],
                               preferred_element_type=jnp.float32) + bias_ref[d, h]
                s = s - jnp.max(s, axis=-1, keepdims=True)
                e = jnp.exp(s)
                p = e / jnp.sum(e, axis=-1, keepdims=True)     # exact normalization
                pieces.append(jnp.dot(p.astype(jnp.bfloat16), vb_h[rs],
                                      preferred_element_type=jnp.float32))
            o_h = pieces[0] if bpg == 1 else jnp.concatenate(pieces, axis=0)
            attn_out = attn_out + o_h      # heads occupy disjoint columns [3]

        # ------------- output projection (single full-width matmul) [3] -----
        y = jnp.dot(attn_out.astype(jnp.bfloat16), wo_ref[d],
                    preferred_element_type=jnp.float32) + bo_ref[d]
        h1 = x + y                                      # attention residual

        # ------------- LayerNorm 2 + MLP (Hd = 4C = 128 lanes) --------------
        xn2 = _layer_norm(h1, g2_ref[d], b2_ref[d])
        t = jnp.dot(xn2.astype(jnp.bfloat16), w1_ref[d],
                    preferred_element_type=jnp.float32) + bb1_ref[d]
        t = 0.5 * t * (1.0 + _erf(t * (1.0 / math.sqrt(2.0))))  # exact GELU
        y2 = jnp.dot(t.astype(jnp.bfloat16), w2_ref[d],
                     preferred_element_type=jnp.float32) + bb2_ref[d]
        x = h1 + y2                                     # MLP residual

    # TODO(synk): a lane-dense (L*C/128, 128) relayout before this store is the
    # remaining micro-opt; skipped because the minor-dim-changing reshape is a
    # Mosaic lowering hazard and the store is only 8 KB/step after fusion. [8]
    if bpg == 1:
        o_ref[0] = x.astype(o_ref.dtype)
    else:
        o_ref[...] = x.reshape(bpg, L, C).astype(o_ref.dtype)


def basic_layer_call(x, params, attn_bias, *, scale, imgs_per_step=1):
    """x: (B, L, C) f32 raster-order tokens.  One fused kernel for the layer."""
    B, L, C = x.shape
    depth, nh = attn_bias.shape[0], attn_bias.shape[1]
    Hd = params["w1"].shape[-1]
    bpg = imgs_per_step
    assert B % bpg == 0 and C % nh == 0

    def rep(a):   # replicated, grid-invariant operand (full-array block)
        return pl.BlockSpec(a.shape, lambda b, _n=a.ndim: (0,) * _n)

    kernel = functools.partial(_basic_layer_kernel, depth=depth, bpg=bpg,
                               L=L, nh=nh, scale=scale)

    # advisory cost for XLA scheduling around this tiny custom call [10]
    flops = depth * B * (
        2 * L * C * C * (nh + 2)            # Q (per-head, padded) + K + V
        + nh * (2 * L * L * C) * 2          # dense scores + PV
        + 2 * L * C * C                     # output projection
        + 2 * L * C * Hd * 2)               # MLP fc1 + fc2
    transcendentals = depth * B * (nh * L * L + L * Hd)
    bytes_accessed = (2 * B * L * C * 4
                      + int(attn_bias.size) * attn_bias.dtype.itemsize
                      + sum(int(p.size) * p.dtype.itemsize for p in params.values()))
    cost = pl.CostEstimate(flops=int(flops), transcendentals=int(transcendentals),
                           bytes_accessed=int(bytes_accessed))

    # NOTE: at real Swin resolutions the dense (depth, nh, L, L) bias must be
    # replaced by a per-window-group grid (it would not fit v7x's 64 MiB VMEM);
    # at L=64 it is only 128 KB so the grid-invariant full block is fine.
    return pl.pallas_call(
        kernel,
        out_shape=jax.ShapeDtypeStruct((B, L, C), x.dtype),
        grid=(B // bpg,),
        in_specs=[pl.BlockSpec((bpg, L, C), lambda b: (b, 0, 0)),
                  rep(attn_bias)] + [rep(params[k]) for k in _PARAM_ORDER],
        out_specs=pl.BlockSpec((bpg, L, C), lambda b: (b, 0, 0)),
        compiler_params=pltpu.CompilerParams(
            dimension_semantics=("parallel",)),   # batch axis: megacore on v7x [4]
        cost_estimate=cost,
    )(x, attn_bias, *[params[k] for k in _PARAM_ORDER])


def basic_layer_forward(x, params, attn_bias, *, scale, imgs_per_step=1,
                        jump_layer=None):
    # BasicLayer default downsample=None -> forward is just the block stack.
    # TODO(synk): optional `downsample` module is not part of the reference.
    if jump_layer is not None:
        d = jump_layer + 1
        params = {k: v[:d] for k, v in params.items()}
        attn_bias = attn_bias[:d]
    return basic_layer_call(x, params, attn_bias, scale=scale,
                            imgs_per_step=imgs_per_step)


# --------------------------------------------------------------------------
# host-side preparation
# --------------------------------------------------------------------------
def init_block_params(key, C, nh, wsz, mlp_ratio):
    """Random parameters in the *torch* layout (nn.Linear weight = (out, in))."""
    Hd = int(C * mlp_ratio)
    ks = jax.random.split(key, 9)
    n = lambda k, shape, s=0.02: s * jax.random.normal(k, shape, jnp.float32)
    return {
        "ln1_g": jnp.ones((C,), jnp.float32), "ln1_b": jnp.zeros((C,), jnp.float32),
        "qkv_w": n(ks[0], (3 * C, C)), "qkv_b": n(ks[1], (3 * C,)),
        "proj_w": n(ks[2], (C, C)), "proj_b": n(ks[3], (C,)),
        "ln2_g": jnp.ones((C,), jnp.float32), "ln2_b": jnp.zeros((C,), jnp.float32),
        "fc1_w": n(ks[4], (Hd, C)), "fc1_b": n(ks[5], (Hd,)),
        "fc2_w": n(ks[6], (C, Hd)), "fc2_b": n(ks[7], (C,)),
        "rel_table": n(ks[8], ((2 * wsz - 1) ** 2, nh)),
    }


def prepare_block_params(rb, C, nh):
    """Convert torch-layout params to the kernel layout (bf16 matmul weights)."""
    dh = C // nh
    w_inout = np.asarray(rb["qkv_w"], np.float32).T        # (C, 3C) in x out
    b_qkv = np.asarray(rb["qkv_b"], np.float32)
    wq, wk, wv = w_inout[:, :C], w_inout[:, C:2 * C], w_inout[:, 2 * C:]
    bq, bk, bv = b_qkv[:C], b_qkv[C:2 * C], b_qkv[2 * C:]

    # zero-pad the per-head Q weights/bias to full C output width [2]
    cols = np.arange(C)
    wq_pad = np.zeros((nh, C, C), np.float32)
    bq_pad = np.zeros((nh, 1, C), np.float32)
    for h in range(nh):
        sel = (cols // dh) == h
        wq_pad[h][:, sel] = wq[:, sel]
        bq_pad[h][0, sel] = bq[sel]

    bf = lambda a: jnp.asarray(a, jnp.bfloat16)
    f32 = lambda a: jnp.asarray(a, jnp.float32)
    return {
        "g1": f32(rb["ln1_g"]).reshape(1, C), "b1": f32(rb["ln1_b"]).reshape(1, C),
        "wq_pad": bf(wq_pad), "bq_pad": f32(bq_pad),
        "wk": bf(wk), "bk": f32(bk).reshape(1, C),
        "wv": bf(wv), "bv": f32(bv).reshape(1, C),
        "wo": bf(np.asarray(rb["proj_w"], np.float32).T),   # (C, C) in x out
        "bo": f32(rb["proj_b"]).reshape(1, C),
        "g2": f32(rb["ln2_g"]).reshape(1, C), "b2": f32(rb["ln2_b"]).reshape(1, C),
        "w1": bf(np.asarray(rb["fc1_w"], np.float32).T),    # (C, Hd)
        "bb1": f32(rb["fc1_b"]).reshape(1, -1),
        "w2": bf(np.asarray(rb["fc2_w"], np.float32).T),    # (Hd, C)
        "bb2": f32(rb["fc2_b"]).reshape(1, C),
    }


def stack_block_params(per_block):
    return {k: jnp.stack([pb[k] for pb in per_block], axis=0)
            for k in per_block[0].keys()}


def relative_position_bias(table, wsz, nh):
    coords = np.stack(np.meshgrid(np.arange(wsz), np.arange(wsz), indexing="ij"))
    cf = coords.reshape(2, -1)
    rel = (cf[:, :, None] - cf[:, None, :]).transpose(1, 2, 0).astype(np.int64)
    rel[:, :, 0] += wsz - 1
    rel[:, :, 1] += wsz - 1
    rel[:, :, 0] *= 2 * wsz - 1
    idx = rel.sum(-1)                                        # (N, N)
    bias = table[jnp.asarray(idx.reshape(-1))].reshape(wsz * wsz, wsz * wsz, nh)
    return jnp.transpose(bias, (2, 0, 1))                    # (nh, N, N)


def shifted_attn_mask(H, W, wsz, shift):
    img = np.zeros((H, W), np.float32)
    slices = (slice(0, -wsz), slice(-wsz, -shift), slice(-shift, None))
    cnt = 0
    for hs in slices:
        for ws_ in slices:
            img[hs, ws_] = cnt
            cnt += 1
    mw = img.reshape(H // wsz, wsz, W // wsz, wsz).transpose(0, 2, 1, 3)
    mw = mw.reshape(-1, wsz * wsz)
    am = mw[:, None, :] - mw[:, :, None]
    return np.where(am != 0, -100.0, 0.0).astype(np.float32)  # (nW, N, N)


def raster_to_window_perm(H, W, wsz, shift):
    i = np.arange(H * W)
    h, w = i // W, i % W
    hs, ws_ = (h - shift) % H, (w - shift) % W               # after roll(-shift)
    win = (hs // wsz) * (W // wsz) + (ws_ // wsz)
    pos = (hs % wsz) * wsz + (ws_ % wsz)
    return win * (wsz * wsz) + pos


def build_attn_bias(rel_bias, shift_mask, H, W, wsz, shift):
    """(nh, L, L) bias in raster token order: rel-pos bias (+ shift mask) on
    window-diagonal pairs, -1e9 elsewhere.  Batch-independent."""
    nh, N, _ = rel_bias.shape
    nW = (H // wsz) * (W // wsz)
    L = H * W
    per_win = np.broadcast_to(np.asarray(rel_bias)[None], (nW, nh, N, N)).copy()
    if shift_mask is not None:
        per_win += shift_mask[:, None]
    dense = np.full((nh, L, L), NEG_INF, np.float32)         # windowed order
    for w in range(nW):
        sl = slice(w * N, (w + 1) * N)
        dense[:, sl, sl] = per_win[w]
    sigma = raster_to_window_perm(H, W, wsz, shift)
    return jnp.asarray(dense[:, sigma][:, :, sigma])          # raster order


# --------------------------------------------------------------------------
# pure-JAX reference (mirrors the torch module exactly) for a sanity check
# --------------------------------------------------------------------------
def reference_forward(x, raw_blocks, H, W, wsz, nh, scale):
    B, L, C = x.shape
    dh = C // nh

    def ln(v, g, b):
        mu = v.mean(-1, keepdims=True)
        var = ((v - mu) ** 2).mean(-1, keepdims=True)
        return (v - mu) / jnp.sqrt(var + LN_EPS) * g + b

    for i, rb in enumerate(raw_blocks):
        shift = 0 if i % 2 == 0 else wsz // 2
        shortcut = x
        xn = ln(x, rb["ln1_g"], rb["ln1_b"]).reshape(B, H, W, C)
        if shift > 0:
            xn = jnp.roll(xn, (-shift, -shift), axis=(1, 2))
        xw = xn.reshape(B, H // wsz, wsz, W // wsz, wsz, C)
        xw = xw.transpose(0, 1, 3, 2, 4, 5).reshape(-1, wsz * wsz, C)
        Bn, N, _ = xw.shape
        qkv = (xw @ rb["qkv_w"].T + rb["qkv_b"]).reshape(Bn, N, 3, nh, dh)
        qkv = qkv.transpose(2, 0, 3, 1, 4)
        q, k, v = qkv[0] * scale, qkv[1], qkv[2]             # (Bn, nh, N, dh)
        attn = q @ jnp.swapaxes(k, -1, -2)
        attn = attn + relative_position_bias(rb["rel_table"], wsz, nh)[None]
        if shift > 0:
            mask = shifted_attn_mask(H, W, wsz, shift)
            nW = mask.shape[0]
            attn = (attn.reshape(Bn // nW, nW, nh, N, N)
                    + mask[None, :, None]).reshape(Bn, nh, N, N)
        attn = jax.nn.softmax(attn, axis=-1)
        out = (attn @ v).transpose(0, 2, 1, 3).reshape(Bn, N, C)
        out = out @ rb["proj_w"].T + rb["proj_b"]
        img = out.reshape(B, H // wsz, W // wsz, wsz, wsz, C)
        img = img.transpose(0, 1, 3, 2, 4, 5).reshape(B, H, W, C)
        if shift > 0:
            img = jnp.roll(img, (shift, shift), axis=(1, 2))
        x = shortcut + img.reshape(B, L, C)
        xn2 = ln(x, rb["ln2_g"], rb["ln2_b"])
        t = xn2 @ rb["fc1_w"].T + rb["fc1_b"]
        t = 0.5 * t * (1.0 + lax.erf(t / jnp.sqrt(2.0)))
        x = x + t @ rb["fc2_w"].T + rb["fc2_b"]
    return x


# --------------------------------------------------------------------------
if __name__ == "__main__":
    key = jax.random.PRNGKey(0)

    # BasicLayer(dim=32, out_dim=32, input_resolution=(16,16), depth=2,
    #            num_heads=2, window_size=4, mlp_ratio=4.0, downsample=None)
    # -> blocks run at resolution (8, 8) with dim = out_dim = 32.
    B = 2
    dim = out_dim = 32
    input_resolution = (16, 16)
    depth, num_heads, window_size, mlp_ratio = 2, 2, 4, 4.0
    H, W = input_resolution[0] // 2, input_resolution[1] // 2
    L = H * W
    scale = (out_dim // num_heads) ** -0.5

    key, kx = jax.random.split(key)
    x = jax.random.normal(kx, (B, L, dim), jnp.float32)

    raw_blocks, per_block, biases = [], [], []
    for i in range(depth):
        key, kb = jax.random.split(key)
        raw = init_block_params(kb, out_dim, num_heads, window_size, mlp_ratio)
        shift = 0 if i % 2 == 0 else window_size // 2
        rel = relative_position_bias(raw["rel_table"], window_size, num_heads)
        mask = shifted_attn_mask(H, W, window_size, shift) if shift > 0 else None
        biases.append(build_attn_bias(rel, mask, H, W, window_size, shift))
        per_block.append(prepare_block_params(raw, out_dim, num_heads))
        raw_blocks.append(raw)

    params = stack_block_params(per_block)
    attn_bias = jnp.stack(biases, axis=0)           # (depth, nh, L, L)

    # imgs_per_step=1 keeps grid=(2,) "parallel" (v7x megacore); on single-TC
    # v5e/v6e, imgs_per_step=B halves grid overhead and doubles matmul M. [4]
    fwd = jax.jit(functools.partial(basic_layer_forward, scale=scale,
                                    imgs_per_step=1))
    out = fwd(x, params, attn_bias)
    jax.block_until_ready(out)

    assert out.shape == (B, L, out_dim)
    assert bool(jnp.all(jnp.isfinite(out)))

    ref = reference_forward(x, raw_blocks, H, W, window_size, num_heads, scale)
    max_err = float(jnp.max(jnp.abs(out - ref)))
    assert max_err < 2e-2, f"mismatch vs reference: {max_err}"

    print("KERNEL_OK")
</pallas_src>

<mosaic_0001>
module attributes {stable_mosaic.version = 11 : i64} {
  func.func @_basic_layer_kernel(%arg0: i32, %arg1: memref<1x64x32xf32, #tpu.memory_space<vmem>>, %arg2: memref<2x2x64x64xf32, #tpu.memory_space<vmem>>, %arg3: memref<2x1x32xf32, #tpu.memory_space<vmem>>, %arg4: memref<2x1x32xf32, #tpu.memory_space<vmem>>, %arg5: memref<2x2x32x32xbf16, #tpu.memory_space<vmem>>, %arg6: memref<2x2x1x32xf32, #tpu.memory_space<vmem>>, %arg7: memref<2x32x32xbf16, #tpu.memory_space<vmem>>, %arg8: memref<2x1x32xf32, #tpu.memory_space<vmem>>, %arg9: memref<2x32x32xbf16, #tpu.memory_space<vmem>>, %arg10: memref<2x1x32xf32, #tpu.memory_space<vmem>>, %arg11: memref<2x32x32xbf16, #tpu.memory_space<vmem>>, %arg12: memref<2x1x32xf32, #tpu.memory_space<vmem>>, %arg13: memref<2x1x32xf32, #tpu.memory_space<vmem>>, %arg14: memref<2x1x32xf32, #tpu.memory_space<vmem>>, %arg15: memref<2x32x128xbf16, #tpu.memory_space<vmem>>, %arg16: memref<2x1x128xf32, #tpu.memory_space<vmem>>, %arg17: memref<2x128x32xbf16, #tpu.memory_space<vmem>>, %arg18: memref<2x1x32xf32, #tpu.memory_space<vmem>>, %arg19: memref<1x64x32xf32, #tpu.memory_space<vmem>>) attributes {dimension_semantics = [#tpu.dimension_semantics<parallel>], iteration_bounds = array<i64: 2>, scalar_prefetch = 0 : i64, scratch_operands = 0 : i64, tpu.core_type = #tpu.core_type<tc>, window_params = [{transform_indices = @transform_0, window_bounds = array<i64: 1, 64, 32>}, {pipeline_mode = #tpu.pipeline_mode<synchronous>, transform_indices = @transform_1, window_bounds = array<i64: 2, 2, 64, 64>}, {pipeline_mode = #tpu.pipeline_mode<synchronous>, transform_indices = @transform_2, window_bounds = array<i64: 2, 1, 32>}, {pipeline_mode = #tpu.pipeline_mode<synchronous>, transform_indices = @transform_3, window_bounds = array<i64: 2, 1, 32>}, {pipeline_mode = #tpu.pipeline_mode<synchronous>, transform_indices = @transform_4, window_bounds = array<i64: 2, 2, 32, 32>}, {pipeline_mode = #tpu.pipeline_mode<synchronous>, transform_indices = @transform_5, window_bounds = array<i64: 2, 2, 1, 32>}, {pipeline_mode = #tpu.pipeline_mode<synchronous>, transform_indices = @transform_6, window_bounds = array<i64: 2, 32, 32>}, {pipeline_mode = #tpu.pipeline_mode<synchronous>, transform_indices = @transform_7, window_bounds = array<i64: 2, 1, 32>}, {pipeline_mode = #tpu.pipeline_mode<synchronous>, transform_indices = @transform_8, window_bounds = array<i64: 2, 32, 32>}, {pipeline_mode = #tpu.pipeline_mode<synchronous>, transform_indices = @transform_9, window_bounds = array<i64: 2, 1, 32>}, {pipeline_mode = #tpu.pipeline_mode<synchronous>, transform_indices = @transform_10, window_bounds = array<i64: 2, 32, 32>}, {pipeline_mode = #tpu.pipeline_mode<synchronous>, transform_indices = @transform_11, window_bounds = array<i64: 2, 1, 32>}, {pipeline_mode = #tpu.pipeline_mode<synchronous>, transform_indices = @transform_12, window_bounds = array<i64: 2, 1, 32>}, {pipeline_mode = #tpu.pipeline_mode<synchronous>, transform_indices = @transform_13, window_bounds = array<i64: 2, 1, 32>}, {pipeline_mode = #tpu.pipeline_mode<synchronous>, transform_indices = @transform_14, window_bounds = array<i64: 2, 32, 128>}, {pipeline_mode = #tpu.pipeline_mode<synchronous>, transform_indices = @transform_15, window_bounds = array<i64: 2, 1, 128>}, {pipeline_mode = #tpu.pipeline_mode<synchronous>, transform_indices = @transform_16, window_bounds = array<i64: 2, 128, 32>}, {pipeline_mode = #tpu.pipeline_mode<synchronous>, transform_indices = @transform_17, window_bounds = array<i64: 2, 1, 32>}, {transform_indices = @transform_18, window_bounds = array<i64: 1, 64, 32>}]} {
    %c0 = arith.constant 0 : index
    %c0_0 = arith.constant 0 : index
    %c0_1 = arith.constant 0 : index
    %0 = vector.load %arg1[%c0, %c0_0, %c0_1] : memref<1x64x32xf32, #tpu.memory_space<vmem>>, vector<1x64x32xf32>
    %1 = vector.shape_cast %0 : vector<1x64x32xf32> to vector<64x32xf32>
    %2 = tpu.iota {dimensions = array<i32: 1>} : vector<1x32xi32>
    %c0_i32 = arith.constant 0 : i32
    %3 = vector.broadcast %c0_i32 : i32 to vector<1x32xi32>
    %4 = arith.cmpi sge, %2, %3 : vector<1x32xi32>
    %c16_i32 = arith.constant 16 : i32
    %5 = vector.broadcast %c16_i32 : i32 to vector<1x32xi32>
    %6 = arith.cmpi slt, %2, %5 : vector<1x32xi32>
    %7 = arith.andi %4, %6 : vector<1x32xi1>
    %8 = arith.extui %7 : vector<1x32xi1> to vector<1x32xi32>
    %9 = arith.sitofp %8 : vector<1x32xi32> to vector<1x32xf32>
    %c16_i32_2 = arith.constant 16 : i32
    %10 = vector.broadcast %c16_i32_2 : i32 to vector<1x32xi32>
    %11 = arith.cmpi sge, %2, %10 : vector<1x32xi32>
    %c32_i32 = arith.constant 32 : i32
    %12 = vector.broadcast %c32_i32 : i32 to vector<1x32xi32>
    %13 = arith.cmpi slt, %2, %12 : vector<1x32xi32>
    %14 = arith.andi %11, %13 : vector<1x32xi1>
    %15 = arith.extui %14 : vector<1x32xi1> to vector<1x32xi32>
    %16 = arith.sitofp %15 : vector<1x32xi32> to vector<1x32xf32>
    %c0_3 = arith.constant 0 : index
    %c0_4 = arith.constant 0 : index
    %c0_5 = arith.constant 0 : index
    %17 = vector.load %arg3[%c0_3, %c0_4, %c0_5] : memref<2x1x32xf32, #tpu.memory_space<vmem>>, vector<1x1x32xf32>
    %18 = vector.shape_cast %17 : vector<1x1x32xf32> to vector<1x32xf32>
    %c0_6 = arith.constant 0 : index
    %c0_7 = arith.constant 0 : index
    %c0_8 = arith.constant 0 : index
    %19 = vector.load %arg4[%c0_6, %c0_7, %c0_8] : memref<2x1x32xf32, #tpu.memory_space<vmem>>, vector<1x1x32xf32>
    %20 = vector.shape_cast %19 : vector<1x1x32xf32> to vector<1x32xf32>
    %cst = arith.constant dense<0.000000e+00> : vector<64xf32>
    %21 = vector.multi_reduction <add>, %1, %cst [1] : vector<64x32xf32> to vector<64xf32>
    %22 = vector.shape_cast %21 : vector<64xf32> to vector<64x1xf32>
    %cst_9 = arith.constant 3.200000e+01 : f32
    %23 = vector.broadcast %cst_9 : f32 to vector<64x1xf32>
    %24 = arith.divf %22, %23 : vector<64x1xf32>
    %25 = vector.broadcast %24 : vector<64x1xf32> to vector<64x32xf32>
    %26 = arith.subf %1, %25 : vector<64x32xf32>
    %27 = arith.mulf %26, %26 : vector<64x32xf32>
    %cst_10 = arith.constant dense<0.000000e+00> : vector<64xf32>
    %28 = vector.multi_reduction <add>, %27, %cst_10 [1] : vector<64x32xf32> to vector<64xf32>
    %29 = vector.shape_cast %28 : vector<64xf32> to vector<64x1xf32>
    %cst_11 = arith.constant 3.200000e+01 : f32
    %30 = vector.broadcast %cst_11 : f32 to vector<64x1xf32>
    %31 = arith.divf %29, %30 : vector<64x1xf32>
    %32 = vector.broadcast %24 : vector<64x1xf32> to vector<64x32xf32>
    %33 = arith.subf %1, %32 : vector<64x32xf32>
    %cst_12 = arith.constant 9.99999974E-6 : f32
    %34 = vector.broadcast %cst_12 : f32 to vector<64x1xf32>
    %35 = arith.addf %31, %34 : vector<64x1xf32>
    %36 = math.rsqrt %35 : vector<64x1xf32>
    %37 = vector.broadcast %36 : vector<64x1xf32> to vector<64x32xf32>
    %38 = arith.mulf %33, %37 : vector<64x32xf32>
    %39 = vector.broadcast %18 : vector<1x32xf32> to vector<64x32xf32>
    %40 = arith.mulf %38, %39 : vector<64x32xf32>
    %41 = vector.broadcast %20 : vector<1x32xf32> to vector<64x32xf32>
    %42 = arith.addf %40, %41 : vector<64x32xf32>
    %43 = arith.truncf %42 : vector<64x32xf32> to vector<64x32xbf16>
    %c0_13 = arith.constant 0 : index
    %c0_14 = arith.constant 0 : index
    %c0_15 = arith.constant 0 : index
    %44 = vector.load %arg7[%c0_13, %c0_14, %c0_15] : memref<2x32x32xbf16, #tpu.memory_space<vmem>>, vector<1x32x32xbf16>
    %45 = vector.shape_cast %44 : vector<1x32x32xbf16> to vector<32x32xbf16>
    %cst_16 = arith.constant dense<0.000000e+00> : vector<64x32xf32>
    %46 = tpu.matmul %43, %45, %cst_16 {dimension_numbers = #tpu.dot_dimension_numbers<[1], [0], [0], [1], [0, 0, 1, 1], [], []>} : vector<64x32xbf16>, vector<32x32xbf16>, vector<64x32xf32> -> vector<64x32xf32>
    %c0_17 = arith.constant 0 : index
    %c0_18 = arith.constant 0 : index
    %c0_19 = arith.constant 0 : index
    %47 = vector.load %arg8[%c0_17, %c0_18, %c0_19] : memref<2x1x32xf32, #tpu.memory_space<vmem>>, vector<1x1x32xf32>
    %48 = vector.shape_cast %47 : vector<1x1x32xf32> to vector<1x32xf32>
    %49 = vector.broadcast %48 : vector<1x32xf32> to vector<64x32xf32>
    %50 = arith.addf %46, %49 : vector<64x32xf32>
    %c0_20 = arith.constant 0 : index
    %c0_21 = arith.constant 0 : index
    %c0_22 = arith.constant 0 : index
    %51 = vector.load %arg9[%c0_20, %c0_21, %c0_22] : memref<2x32x32xbf16, #tpu.memory_space<vmem>>, vector<1x32x32xbf16>
    %52 = vector.shape_cast %51 : vector<1x32x32xbf16> to vector<32x32xbf16>
    %cst_23 = arith.constant dense<0.000000e+00> : vector<64x32xf32>
    %53 = tpu.matmul %43, %52, %cst_23 {dimension_numbers = #tpu.dot_dimension_numbers<[1], [0], [0], [1], [0, 0, 1, 1], [], []>} : vector<64x32xbf16>, vector<32x32xbf16>, vector<64x32xf32> -> vector<64x32xf32>
    %c0_24 = arith.constant 0 : index
    %c0_25 = arith.constant 0 : index
    %c0_26 = arith.constant 0 : index
    %54 = vector.load %arg10[%c0_24, %c0_25, %c0_26] : memref<2x1x32xf32, #tpu.memory_space<vmem>>, vector<1x1x32xf32>
    %55 = vector.shape_cast %54 : vector<1x1x32xf32> to vector<1x32xf32>
    %56 = vector.broadcast %55 : vector<1x32xf32> to vector<64x32xf32>
    %57 = arith.addf %53, %56 : vector<64x32xf32>
    %58 = arith.truncf %50 : vector<64x32xf32> to vector<64x32xbf16>
    %cst_27 = arith.constant 0.000000e+00 : f32
    %59 = vector.broadcast %cst_27 : f32 to vector<64x32xf32>
    %c0_28 = arith.constant 0 : index
    %c0_29 = arith.constant 0 : index
    %c0_30 = arith.constant 0 : index
    %c0_31 = arith.constant 0 : index
    %60 = vector.load %arg5[%c0_28, %c0_29, %c0_30, %c0_31] : memref<2x2x32x32xbf16, #tpu.memory_space<vmem>>, vector<1x1x32x32xbf16>
    %61 = vector.shape_cast %60 : vector<1x1x32x32xbf16> to vector<32x32xbf16>
    %cst_32 = arith.constant dense<0.000000e+00> : vector<64x32xf32>
    %62 = tpu.matmul %43, %61, %cst_32 {dimension_numbers = #tpu.dot_dimension_numbers<[1], [0], [0], [1], [0, 0, 1, 1], [], []>} : vector<64x32xbf16>, vector<32x32xbf16>, vector<64x32xf32> -> vector<64x32xf32>
    %c0_33 = arith.constant 0 : index
    %c0_34 = arith.constant 0 : index
    %c0_35 = arith.constant 0 : index
    %c0_36 = arith.constant 0 : index
    %63 = vector.load %arg6[%c0_33, %c0_34, %c0_35, %c0_36] : memref<2x2x1x32xf32, #tpu.memory_space<vmem>>, vector<1x1x1x32xf32>
    %64 = vector.shape_cast %63 : vector<1x1x1x32xf32> to vector<1x32xf32>
    %65 = vector.broadcast %64 : vector<1x32xf32> to vector<64x32xf32>
    %66 = arith.addf %62, %65 : vector<64x32xf32>
    %cst_37 = arith.constant 2.500000e-01 : f32
    %67 = vector.broadcast %cst_37 : f32 to vector<64x32xf32>
    %68 = arith.mulf %66, %67 : vector<64x32xf32>
    %69 = arith.truncf %68 : vector<64x32xf32> to vector<64x32xbf16>
    %70 = vector.broadcast %9 : vector<1x32xf32> to vector<64x32xf32>
    %71 = arith.mulf %57, %70 : vector<64x32xf32>
    %72 = arith.truncf %71 : vector<64x32xf32> to vector<64x32xbf16>
    "tpu.trace_start"() <{level = 10 : i32, message = "ld,md->lm"}> : () -> ()
    %cst_38 = arith.constant dense<0.000000e+00> : vector<64x64xf32>
    %73 = tpu.matmul %69, %58, %cst_38 {dimension_numbers = #tpu.dot_dimension_numbers<[1], [1], [0], [0], [0, 0, 1, 0], [], []>} : vector<64x32xbf16>, vector<64x32xbf16>, vector<64x64xf32> -> vector<64x64xf32>
    "tpu.trace_stop"() : () -> ()
    %c0_39 = arith.constant 0 : index
    %c0_40 = arith.constant 0 : index
    %c0_41 = arith.constant 0 : index
    %c0_42 = arith.constant 0 : index
    %74 = vector.load %arg2[%c0_39, %c0_40, %c0_41, %c0_42] : memref<2x2x64x64xf32, #tpu.memory_space<vmem>>, vector<1x1x64x64xf32>
    %75 = vector.shape_cast %74 : vector<1x1x64x64xf32> to vector<64x64xf32>
    %76 = arith.addf %73, %75 : vector<64x64xf32>
    %cst_43 = arith.constant dense<0xFF800000> : vector<64xf32>
    %77 = vector.multi_reduction <maximumf>, %76, %cst_43 [1] : vector<64x64xf32> to vector<64xf32>
    %78 = vector.shape_cast %77 : vector<64xf32> to vector<64x1xf32>
    %79 = vector.broadcast %78 : vector<64x1xf32> to vector<64x64xf32>
    %80 = arith.subf %76, %79 : vector<64x64xf32>
    %81 = math.exp %80 : vector<64x64xf32>
    %cst_44 = arith.constant dense<0.000000e+00> : vector<64xf32>
    %82 = vector.multi_reduction <add>, %81, %cst_44 [1] : vector<64x64xf32> to vector<64xf32>
    %83 = vector.shape_cast %82 : vector<64xf32> to vector<64x1xf32>
    %84 = vector.broadcast %83 : vector<64x1xf32> to vector<64x64xf32>
    %85 = arith.divf %81, %84 : vector<64x64xf32>
    %86 = arith.truncf %85 : vector<64x64xf32> to vector<64x64xbf16>
    %cst_45 = arith.constant dense<0.000000e+00> : vector<64x32xf32>
    %87 = tpu.matmul %86, %72, %cst_45 {dimension_numbers = #tpu.dot_dimension_numbers<[1], [0], [0], [1], [0, 0, 1, 1], [], []>} : vector<64x64xbf16>, vector<64x32xbf16>, vector<64x32xf32> -> vector<64x32xf32>
    %88 = arith.addf %59, %87 : vector<64x32xf32>
    %c0_46 = arith.constant 0 : index
    %c1 = arith.constant 1 : index
    %c0_47 = arith.constant 0 : index
    %c0_48 = arith.constant 0 : index
    %89 = vector.load %arg5[%c0_46, %c1, %c0_47, %c0_48] : memref<2x2x32x32xbf16, #tpu.memory_space<vmem>>, vector<1x1x32x32xbf16>
    %90 = vector.shape_cast %89 : vector<1x1x32x32xbf16> to vector<32x32xbf16>
    %cst_49 = arith.constant dense<0.000000e+00> : vector<64x32xf32>
    %91 = tpu.matmul %43, %90, %cst_49 {dimension_numbers = #tpu.dot_dimension_numbers<[1], [0], [0], [1], [0, 0, 1, 1], [], []>} : vector<64x32xbf16>, vector<32x32xbf16>, vector<64x32xf32> -> vector<64x32xf32>
    %c0_50 = arith.constant 0 : index
    %c1_51 = arith.constant 1 : index
    %c0_52 = arith.constant 0 : index
    %c0_53 = arith.constant 0 : index
    %92 = vector.load %arg6[%c0_50, %c1_51, %c0_52, %c0_53] : memref<2x2x1x32xf32, #tpu.memory_space<vmem>>, vector<1x1x1x32xf32>
    %93 = vector.shape_cast %92 : vector<1x1x1x32xf32> to vector<1x32xf32>
    %94 = vector.broadcast %93 : vector<1x32xf32> to vector<64x32xf32>
    %95 = arith.addf %91, %94 : vector<64x32xf32>
    %cst_54 = arith.constant 2.500000e-01 : f32
    %96 = vector.broadcast %cst_54 : f32 to vector<64x32xf32>
    %97 = arith.mulf %95, %96 : vector<64x32xf32>
    %98 = arith.truncf %97 : vector<64x32xf32> to vector<64x32xbf16>
    %99 = vector.broadcast %16 : vector<1x32xf32> to vector<64x32xf32>
    %100 = arith.mulf %57, %99 : vector<64x32xf32>
    %101 = arith.truncf %100 : vector<64x32xf32> to vector<64x32xbf16>
    "tpu.trace_start"() <{level = 10 : i32, message = "ld,md->lm"}> : () -> ()
    %cst_55 = arith.constant dense<0.000000e+00> : vector<64x64xf32>
    %102 = tpu.matmul %98, %58, %cst_55 {dimension_numbers = #tpu.dot_dimension_numbers<[1], [1], [0], [0], [0, 0, 1, 0], [], []>} : vector<64x32xbf16>, vector<64x32xbf16>, vector<64x64xf32> -> vector<64x64xf32>
    "tpu.trace_stop"() : () -> ()
    %c0_56 = arith.constant 0 : index
    %c1_57 = arith.constant 1 : index
    %c0_58 = arith.constant 0 : index
    %c0_59 = arith.constant 0 : index
    %103 = vector.load %arg2[%c0_56, %c1_57, %c0_58, %c0_59] : memref<2x2x64x64xf32, #tpu.memory_space<vmem>>, vector<1x1x64x64xf32>
    %104 = vector.shape_cast %103 : vector<1x1x64x64xf32> to vector<64x64xf32>
    %105 = arith.addf %102, %104 : vector<64x64xf32>
    %cst_60 = arith.constant dense<0xFF800000> : vector<64xf32>
    %106 = vector.multi_reduction <maximumf>, %105, %cst_60 [1] : vector<64x64xf32> to vector<64xf32>
    %107 = vector.shape_cast %106 : vector<64xf32> to vector<64x1xf32>
    %108 = vector.broadcast %107 : vector<64x1xf32> to vector<64x64xf32>
    %109 = arith.subf %105, %108 : vector<64x64xf32>
    %110 = math.exp %109 : vector<64x64xf32>
    %cst_61 = arith.constant dense<0.000000e+00> : vector<64xf32>
    %111 = vector.multi_reduction <add>, %110, %cst_61 [1] : vector<64x64xf32> to vector<64xf32>
    %112 = vector.shape_cast %111 : vector<64xf32> to vector<64x1xf32>
    %113 = vector.broadcast %112 : vector<64x1xf32> to vector<64x64xf32>
    %114 = arith.divf %110, %113 : vector<64x64xf32>
    %115 = arith.truncf %114 : vector<64x64xf32> to vector<64x64xbf16>
    %cst_62 = arith.constant dense<0.000000e+00> : vector<64x32xf32>
    %116 = tpu.matmul %115, %101, %cst_62 {dimension_numbers = #tpu.dot_dimension_numbers<[1], [0], [0], [1], [0, 0, 1, 1], [], []>} : vector<64x64xbf16>, vector<64x32xbf16>, vector<64x32xf32> -> vector<64x32xf32>
    %117 = arith.addf %88, %116 : vector<64x32xf32>
    %118 = arith.truncf %117 : vector<64x32xf32> to vector<64x32xbf16>
    %c0_63 = arith.constant 0 : index
    %c0_64 = arith.constant 0 : index
    %c0_65 = arith.constant 0 : index
    %119 = vector.load %arg11[%c0_63, %c0_64, %c0_65] : memref<2x32x32xbf16, #tpu.memory_space<vmem>>, vector<1x32x32xbf16>
    %120 = vector.shape_cast %119 : vector<1x32x32xbf16> to vector<32x32xbf16>
    %cst_66 = arith.constant dense<0.000000e+00> : vector<64x32xf32>
    %121 = tpu.matmul %118, %120, %cst_66 {dimension_numbers = #tpu.dot_dimension_numbers<[1], [0], [0], [1], [0, 0, 1, 1], [], []>} : vector<64x32xbf16>, vector<32x32xbf16>, vector<64x32xf32> -> vector<64x32xf32>
    %c0_67 = arith.constant 0 : index
    %c0_68 = arith.constant 0 : index
    %c0_69 = arith.constant 0 : index
    %122 = vector.load %arg12[%c0_67, %c0_68, %c0_69] : memref<2x1x32xf32, #tpu.memory_space<vmem>>, vector<1x1x32xf32>
    %123 = vector.shape_cast %122 : vector<1x1x32xf32> to vector<1x32xf32>
    %124 = vector.broadcast %123 : vector<1x32xf32> to vector<64x32xf32>
    %125 = arith.addf %121, %124 : vector<64x32xf32>
    %126 = arith.addf %1, %125 : vector<64x32xf32>
    %c0_70 = arith.constant 0 : index
    %c0_71 = arith.constant 0 : index
    %c0_72 = arith.constant 0 : index
    %127 = vector.load %arg13[%c0_70, %c0_71, %c0_72] : memref<2x1x32xf32, #tpu.memory_space<vmem>>, vector<1x1x32xf32>
    %128 = vector.shape_cast %127 : vector<1x1x32xf32> to vector<1x32xf32>
    %c0_73 = arith.constant 0 : index
    %c0_74 = arith.constant 0 : index
    %c0_75 = arith.constant 0 : index
    %129 = vector.load %arg14[%c0_73, %c0_74, %c0_75] : memref<2x1x32xf32, #tpu.memory_space<vmem>>, vector<1x1x32xf32>
    %130 = vector.shape_cast %129 : vector<1x1x32xf32> to vector<1x32xf32>
    %cst_76 = arith.constant dense<0.000000e+00> : vector<64xf32>
    %131 = vector.multi_reduction <add>, %126, %cst_76 [1] : vector<64x32xf32> to vector<64xf32>
    %132 = vector.shape_cast %131 : vector<64xf32> to vector<64x1xf32>
    %cst_77 = arith.constant 3.200000e+01 : f32
    %133 = vector.broadcast %cst_77 : f32 to vector<64x1xf32>
    %134 = arith.divf %132, %133 : vector<64x1xf32>
    %135 = vector.broadcast %134 : vector<64x1xf32> to vector<64x32xf32>
    %136 = arith.subf %126, %135 : vector<64x32xf32>
    %137 = arith.mulf %136, %136 : vector<64x32xf32>
    %cst_78 = arith.constant dense<0.000000e+00> : vector<64xf32>
    %138 = vector.multi_reduction <add>, %137, %cst_78 [1] : vector<64x32xf32> to vector<64xf32>
    %139 = vector.shape_cast %138 : vector<64xf32> to vector<64x1xf32>
    %cst_79 = arith.constant 3.200000e+01 : f32
    %140 = vector.broadcast %cst_79 : f32 to vector<64x1xf32>
    %141 = arith.divf %139, %140 : vector<64x1xf32>
    %142 = vector.broadcast %134 : vector<64x1xf32> to vector<64x32xf32>
    %143 = arith.subf %126, %142 : vector<64x32xf32>
    %cst_80 = arith.constant 9.99999974E-6 : f32
    %144 = vector.broadcast %cst_80 : f32 to vector<64x1xf32>
    %145 = arith.addf %141, %144 : vector<64x1xf32>
    %146 = math.rsqrt %145 : vector<64x1xf32>
    %147 = vector.broadcast %146 : vector<64x1xf32> to vector<64x32xf32>
    %148 = arith.mulf %143, %147 : vector<64x32xf32>
    %149 = vector.broadcast %128 : vector<1x32xf32> to vector<64x32xf32>
    %150 = arith.mulf %148, %149 : vector<64x32xf32>
    %151 = vector.broadcast %130 : vector<1x32xf32> to vector<64x32xf32>
    %152 = arith.addf %150, %151 : vector<64x32xf32>
    %153 = arith.truncf %152 : vector<64x32xf32> to vector<64x32xbf16>
    %c0_81 = arith.constant 0 : index
    %c0_82 = arith.constant 0 : index
    %c0_83 = arith.constant 0 : index
    %154 = vector.load %arg15[%c0_81, %c0_82, %c0_83] : memref<2x32x128xbf16, #tpu.memory_space<vmem>>, vector<1x32x128xbf16>
    %155 = vector.shape_cast %154 : vector<1x32x128xbf16> to vector<32x128xbf16>
    %cst_84 = arith.constant dense<0.000000e+00> : vector<64x128xf32>
    %156 = tpu.matmul %153, %155, %cst_84 {dimension_numbers = #tpu.dot_dimension_numbers<[1], [0], [0], [1], [0, 0, 1, 1], [], []>} : vector<64x32xbf16>, vector<32x128xbf16>, vector<64x128xf32> -> vector<64x128xf32>
    %c0_85 = arith.constant 0 : index
    %c0_86 = arith.constant 0 : index
    %c0_87 = arith.constant 0 : index
    %157 = vector.load %arg16[%c0_85, %c0_86, %c0_87] : memref<2x1x128xf32, #tpu.memory_space<vmem>>, vector<1x1x128xf32>
    %158 = vector.shape_cast %157 : vector<1x1x128xf32> to vector<1x128xf32>
    %159 = vector.broadcast %158 : vector<1x128xf32> to vector<64x128xf32>
    %160 = arith.addf %156, %159 : vector<64x128xf32>
    %cst_88 = arith.constant 5.000000e-01 : f32
    %161 = vector.broadcast %cst_88 : f32 to vector<64x128xf32>
    %162 = arith.mulf %161, %160 : vector<64x128xf32>
    %cst_89 = arith.constant 0.707106769 : f32
    %163 = vector.broadcast %cst_89 : f32 to vector<64x128xf32>
    %164 = arith.mulf %160, %163 : vector<64x128xf32>
    %165 = math.absf %164 : vector<64x128xf32>
    %cst_90 = arith.constant 0.327591091 : f32
    %166 = vector.broadcast %cst_90 : f32 to vector<64x128xf32>
    %167 = arith.mulf %166, %165 : vector<64x128xf32>
    %cst_91 = arith.constant 1.000000e+00 : f32
    %168 = vector.broadcast %cst_91 : f32 to vector<64x128xf32>
    %169 = arith.addf %168, %167 : vector<64x128xf32>
    %cst_92 = arith.constant 1.000000e+00 : f32
    %170 = vector.broadcast %cst_92 : f32 to vector<64x128xf32>
    %171 = arith.divf %170, %169 : vector<64x128xf32>
    %cst_93 = arith.constant 1.06140542 : f32
    %172 = vector.broadcast %cst_93 : f32 to vector<64x128xf32>
    %173 = arith.mulf %172, %171 : vector<64x128xf32>
    %cst_94 = arith.constant -1.45315206 : f32
    %174 = vector.broadcast %cst_94 : f32 to vector<64x128xf32>
    %175 = arith.addf %173, %174 : vector<64x128xf32>
    %176 = arith.mulf %175, %171 : vector<64x128xf32>
    %cst_95 = arith.constant 1.42141378 : f32
    %177 = vector.broadcast %cst_95 : f32 to vector<64x128xf32>
    %178 = arith.addf %176, %177 : vector<64x128xf32>
    %179 = arith.mulf %178, %171 : vector<64x128xf32>
    %cst_96 = arith.constant -0.284496725 : f32
    %180 = vector.broadcast %cst_96 : f32 to vector<64x128xf32>
    %181 = arith.addf %179, %180 : vector<64x128xf32>
    %182 = arith.mulf %181, %171 : vector<64x128xf32>
    %cst_97 = arith.constant 0.254829586 : f32
    %183 = vector.broadcast %cst_97 : f32 to vector<64x128xf32>
    %184 = arith.addf %182, %183 : vector<64x128xf32>
    %185 = arith.mulf %184, %171 : vector<64x128xf32>
    %186 = arith.mulf %165, %165 : vector<64x128xf32>
    %cst_98 = arith.constant 0.000000e+00 : f32
    %187 = vector.broadcast %cst_98 : f32 to vector<64x128xf32>
    %188 = arith.subf %187, %186 : vector<64x128xf32>
    %189 = math.exp %188 : vector<64x128xf32>
    %190 = arith.mulf %185, %189 : vector<64x128xf32>
    %cst_99 = arith.constant 1.000000e+00 : f32
    %191 = vector.broadcast %cst_99 : f32 to vector<64x128xf32>
    %192 = arith.subf %191, %190 : vector<64x128xf32>
    %cst_100 = arith.constant 0.000000e+00 : f32
    %193 = vector.broadcast %cst_100 : f32 to vector<64x128xf32>
    %194 = arith.cmpf oge, %164, %193 : vector<64x128xf32>
    %cst_101 = arith.constant 0.000000e+00 : f32
    %195 = vector.broadcast %cst_101 : f32 to vector<64x128xf32>
    %196 = arith.subf %195, %192 : vector<64x128xf32>
    %197 = arith.select %194, %192, %196 : vector<64x128xi1>, vector<64x128xf32>
    %cst_102 = arith.constant 1.000000e+00 : f32
    %198 = vector.broadcast %cst_102 : f32 to vector<64x128xf32>
    %199 = arith.addf %198, %197 : vector<64x128xf32>
    %200 = arith.mulf %162, %199 : vector<64x128xf32>
    %201 = arith.truncf %200 : vector<64x128xf32> to vector<64x128xbf16>
    %c0_103 = arith.constant 0 : index
    %c0_104 = arith.constant 0 : index
    %c0_105 = arith.constant 0 : index
    %202 = vector.load %arg17[%c0_103, %c0_104, %c0_105] : memref<2x128x32xbf16, #tpu.memory_space<vmem>>, vector<1x128x32xbf16>
    %203 = vector.shape_cast %202 : vector<1x128x32xbf16> to vector<128x32xbf16>
    %cst_106 = arith.constant dense<0.000000e+00> : vector<64x32xf32>
    %204 = tpu.matmul %201, %203, %cst_106 {dimension_numbers = #tpu.dot_dimension_numbers<[1], [0], [0], [1], [0, 0, 1, 1], [], []>} : vector<64x128xbf16>, vector<128x32xbf16>, vector<64x32xf32> -> vector<64x32xf32>
    %c0_107 = arith.constant 0 : index
    %c0_108 = arith.constant 0 : index
    %c0_109 = arith.constant 0 : index
    %205 = vector.load %arg18[%c0_107, %c0_108, %c0_109] : memref<2x1x32xf32, #tpu.memory_space<vmem>>, vector<1x1x32xf32>
    %206 = vector.shape_cast %205 : vector<1x1x32xf32> to vector<1x32xf32>
    %207 = vector.broadcast %206 : vector<1x32xf32> to vector<64x32xf32>
    %208 = arith.addf %204, %207 : vector<64x32xf32>
    %209 = arith.addf %126, %208 : vector<64x32xf32>
    %c1_110 = arith.constant 1 : index
    %c0_111 = arith.constant 0 : index
    %c0_112 = arith.constant 0 : index
    %210 = vector.load %arg3[%c1_110, %c0_111, %c0_112] : memref<2x1x32xf32, #tpu.memory_space<vmem>>, vector<1x1x32xf32>
    %211 = vector.shape_cast %210 : vector<1x1x32xf32> to vector<1x32xf32>
    %c1_113 = arith.constant 1 : index
    %c0_114 = arith.constant 0 : index
    %c0_115 = arith.constant 0 : index
    %212 = vector.load %arg4[%c1_113, %c0_114, %c0_115] : memref<2x1x32xf32, #tpu.memory_space<vmem>>, vector<1x1x32xf32>
    %213 = vector.shape_cast %212 : vector<1x1x32xf32> to vector<1x32xf32>
    %cst_116 = arith.constant dense<0.000000e+00> : vector<64xf32>
    %214 = vector.multi_reduction <add>, %209, %cst_116 [1] : vector<64x32xf32> to vector<64xf32>
    %215 = vector.shape_cast %214 : vector<64xf32> to vector<64x1xf32>
    %cst_117 = arith.constant 3.200000e+01 : f32
    %216 = vector.broadcast %cst_117 : f32 to vector<64x1xf32>
    %217 = arith.divf %215, %216 : vector<64x1xf32>
    %218 = vector.broadcast %217 : vector<64x1xf32> to vector<64x32xf32>
    %219 = arith.subf %209, %218 : vector<64x32xf32>
    %220 = arith.mulf %219, %219 : vector<64x32xf32>
    %cst_118 = arith.constant dense<0.000000e+00> : vector<64xf32>
    %221 = vector.multi_reduction <add>, %220, %cst_118 [1] : vector<64x32xf32> to vector<64xf32>
    %222 = vector.shape_cast %221 : vector<64xf32> to vector<64x1xf32>
    %cst_119 = arith.constant 3.200000e+01 : f32
    %223 = vector.broadcast %cst_119 : f32 to vector<64x1xf32>
    %224 = arith.divf %222, %223 : vector<64x1xf32>
    %225 = vector.broadcast %217 : vector<64x1xf32> to vector<64x32xf32>
    %226 = arith.subf %209, %225 : vector<64x32xf32>
    %cst_120 = arith.constant 9.99999974E-6 : f32
    %227 = vector.broadcast %cst_120 : f32 to vector<64x1xf32>
    %228 = arith.addf %224, %227 : vector<64x1xf32>
    %229 = math.rsqrt %228 : vector<64x1xf32>
    %230 = vector.broadcast %229 : vector<64x1xf32> to vector<64x32xf32>
    %231 = arith.mulf %226, %230 : vector<64x32xf32>
    %232 = vector.broadcast %211 : vector<1x32xf32> to vector<64x32xf32>
    %233 = arith.mulf %231, %232 : vector<64x32xf32>
    %234 = vector.broadcast %213 : vector<1x32xf32> to vector<64x32xf32>
    %235 = arith.addf %233, %234 : vector<64x32xf32>
    %236 = arith.truncf %235 : vector<64x32xf32> to vector<64x32xbf16>
    %c1_121 = arith.constant 1 : index
    %c0_122 = arith.constant 0 : index
    %c0_123 = arith.constant 0 : index
    %237 = vector.load %arg7[%c1_121, %c0_122, %c0_123] : memref<2x32x32xbf16, #tpu.memory_space<vmem>>, vector<1x32x32xbf16>
    %238 = vector.shape_cast %237 : vector<1x32x32xbf16> to vector<32x32xbf16>
    %cst_124 = arith.constant dense<0.000000e+00> : vector<64x32xf32>
    %239 = tpu.matmul %236, %238, %cst_124 {dimension_numbers = #tpu.dot_dimension_numbers<[1], [0], [0], [1], [0, 0, 1, 1], [], []>} : vector<64x32xbf16>, vector<32x32xbf16>, vector<64x32xf32> -> vector<64x32xf32>
    %c1_125 = arith.constant 1 : index
    %c0_126 = arith.constant 0 : index
    %c0_127 = arith.constant 0 : index
    %240 = vector.load %arg8[%c1_125, %c0_126, %c0_127] : memref<2x1x32xf32, #tpu.memory_space<vmem>>, vector<1x1x32xf32>
    %241 = vector.shape_cast %240 : vector<1x1x32xf32> to vector<1x32xf32>
    %242 = vector.broadcast %241 : vector<1x32xf32> to vector<64x32xf32>
    %243 = arith.addf %239, %242 : vector<64x32xf32>
    %c1_128 = arith.constant 1 : index
    %c0_129 = arith.constant 0 : index
    %c0_130 = arith.constant 0 : index
    %244 = vector.load %arg9[%c1_128, %c0_129, %c0_130] : memref<2x32x32xbf16, #tpu.memory_space<vmem>>, vector<1x32x32xbf16>
    %245 = vector.shape_cast %244 : vector<1x32x32xbf16> to vector<32x32xbf16>
    %cst_131 = arith.constant dense<0.000000e+00> : vector<64x32xf32>
    %246 = tpu.matmul %236, %245, %cst_131 {dimension_numbers = #tpu.dot_dimension_numbers<[1], [0], [0], [1], [0, 0, 1, 1], [], []>} : vector<64x32xbf16>, vector<32x32xbf16>, vector<64x32xf32> -> vector<64x32xf32>
    %c1_132 = arith.constant 1 : index
    %c0_133 = arith.constant 0 : index
    %c0_134 = arith.constant 0 : index
    %247 = vector.load %arg10[%c1_132, %c0_133, %c0_134] : memref<2x1x32xf32, #tpu.memory_space<vmem>>, vector<1x1x32xf32>
    %248 = vector.shape_cast %247 : vector<1x1x32xf32> to vector<1x32xf32>
    %249 = vector.broadcast %248 : vector<1x32xf32> to vector<64x32xf32>
    %250 = arith.addf %246, %249 : vector<64x32xf32>
    %251 = arith.truncf %243 : vector<64x32xf32> to vector<64x32xbf16>
    %cst_135 = arith.constant 0.000000e+00 : f32
    %252 = vector.broadcast %cst_135 : f32 to vector<64x32xf32>
    %c1_136 = arith.constant 1 : index
    %c0_137 = arith.constant 0 : index
    %c0_138 = arith.constant 0 : index
    %c0_139 = arith.constant 0 : index
    %253 = vector.load %arg5[%c1_136, %c0_137, %c0_138, %c0_139] : memref<2x2x32x32xbf16, #tpu.memory_space<vmem>>, vector<1x1x32x32xbf16>
    %254 = vector.shape_cast %253 : vector<1x1x32x32xbf16> to vector<32x32xbf16>
    %cst_140 = arith.constant dense<0.000000e+00> : vector<64x32xf32>
    %255 = tpu.matmul %236, %254, %cst_140 {dimension_numbers = #tpu.dot_dimension_numbers<[1], [0], [0], [1], [0, 0, 1, 1], [], []>} : vector<64x32xbf16>, vector<32x32xbf16>, vector<64x32xf32> -> vector<64x32xf32>
    %c1_141 = arith.constant 1 : index
    %c0_142 = arith.constant 0 : index
    %c0_143 = arith.constant 0 : index
    %c0_144 = arith.constant 0 : index
    %256 = vector.load %arg6[%c1_141, %c0_142, %c0_143, %c0_144] : memref<2x2x1x32xf32, #tpu.memory_space<vmem>>, vector<1x1x1x32xf32>
    %257 = vector.shape_cast %256 : vector<1x1x1x32xf32> to vector<1x32xf32>
    %258 = vector.broadcast %257 : vector<1x32xf32> to vector<64x32xf32>
    %259 = arith.addf %255, %258 : vector<64x32xf32>
    %cst_145 = arith.constant 2.500000e-01 : f32
    %260 = vector.broadcast %cst_145 : f32 to vector<64x32xf32>
    %261 = arith.mulf %259, %260 : vector<64x32xf32>
    %262 = arith.truncf %261 : vector<64x32xf32> to vector<64x32xbf16>
    %263 = vector.broadcast %9 : vector<1x32xf32> to vector<64x32xf32>
    %264 = arith.mulf %250, %263 : vector<64x32xf32>
    %265 = arith.truncf %264 : vector<64x32xf32> to vector<64x32xbf16>
    "tpu.trace_start"() <{level = 10 : i32, message = "ld,md->lm"}> : () -> ()
    %cst_146 = arith.constant dense<0.000000e+00> : vector<64x64xf32>
    %266 = tpu.matmul %262, %251, %cst_146 {dimension_numbers = #tpu.dot_dimension_numbers<[1], [1], [0], [0], [0, 0, 1, 0], [], []>} : vector<64x32xbf16>, vector<64x32xbf16>, vector<64x64xf32> -> vector<64x64xf32>
    "tpu.trace_stop"() : () -> ()
    %c1_147 = arith.constant 1 : index
    %c0_148 = arith.constant 0 : index
    %c0_149 = arith.constant 0 : index
    %c0_150 = arith.constant 0 : index
    %267 = vector.load %arg2[%c1_147, %c0_148, %c0_149, %c0_150] : memref<2x2x64x64xf32, #tpu.memory_space<vmem>>, vector<1x1x64x64xf32>
    %268 = vector.shape_cast %267 : vector<1x1x64x64xf32> to vector<64x64xf32>
    %269 = arith.addf %266, %268 : vector<64x64xf32>
    %cst_151 = arith.constant dense<0xFF800000> : vector<64xf32>
    %270 = vector.multi_reduction <maximumf>, %269, %cst_151 [1] : vector<64x64xf32> to vector<64xf32>
    %271 = vector.shape_cast %270 : vector<64xf32> to vector<64x1xf32>
    %272 = vector.broadcast %271 : vector<64x1xf32> to vector<64x64xf32>
    %273 = arith.subf %269, %272 : vector<64x64xf32>
    %274 = math.exp %273 : vector<64x64xf32>
    %cst_152 = arith.constant dense<0.000000e+00> : vector<64xf32>
    %275 = vector.multi_reduction <add>, %274, %cst_152 [1] : vector<64x64xf32> to vector<64xf32>
    %276 = vector.shape_cast %275 : vector<64xf32> to vector<64x1xf32>
    %277 = vector.broadcast %276 : vector<64x1xf32> to vector<64x64xf32>
    %278 = arith.divf %274, %277 : vector<64x64xf32>
    %279 = arith.truncf %278 : vector<64x64xf32> to vector<64x64xbf16>
    %cst_153 = arith.constant dense<0.000000e+00> : vector<64x32xf32>
    %280 = tpu.matmul %279, %265, %cst_153 {dimension_numbers = #tpu.dot_dimension_numbers<[1], [0], [0], [1], [0, 0, 1, 1], [], []>} : vector<64x64xbf16>, vector<64x32xbf16>, vector<64x32xf32> -> vector<64x32xf32>
    %281 = arith.addf %252, %280 : vector<64x32xf32>
    %c1_154 = arith.constant 1 : index
    %c1_155 = arith.constant 1 : index
    %c0_156 = arith.constant 0 : index
    %c0_157 = arith.constant 0 : index
    %282 = vector.load %arg5[%c1_154, %c1_155, %c0_156, %c0_157] : memref<2x2x32x32xbf16, #tpu.memory_space<vmem>>, vector<1x1x32x32xbf16>
    %283 = vector.shape_cast %282 : vector<1x1x32x32xbf16> to vector<32x32xbf16>
    %cst_158 = arith.constant dense<0.000000e+00> : vector<64x32xf32>
    %284 = tpu.matmul %236, %283, %cst_158 {dimension_numbers = #tpu.dot_dimension_numbers<[1], [0], [0], [1], [0, 0, 1, 1], [], []>} : vector<64x32xbf16>, vector<32x32xbf16>, vector<64x32xf32> -> vector<64x32xf32>
    %c1_159 = arith.constant 1 : index
    %c1_160 = arith.constant 1 : index
    %c0_161 = arith.constant 0 : index
    %c0_162 = arith.constant 0 : index
    %285 = vector.load %arg6[%c1_159, %c1_160, %c0_161, %c0_162] : memref<2x2x1x32xf32, #tpu.memory_space<vmem>>, vector<1x1x1x32xf32>
    %286 = vector.shape_cast %285 : vector<1x1x1x32xf32> to vector<1x32xf32>
    %287 = vector.broadcast %286 : vector<1x32xf32> to vector<64x32xf32>
    %288 = arith.addf %284, %287 : vector<64x32xf32>
    %cst_163 = arith.constant 2.500000e-01 : f32
    %289 = vector.broadcast %cst_163 : f32 to vector<64x32xf32>
    %290 = arith.mulf %288, %289 : vector<64x32xf32>
    %291 = arith.truncf %290 : vector<64x32xf32> to vector<64x32xbf16>
    %292 = vector.broadcast %16 : vector<1x32xf32> to vector<64x32xf32>
    %293 = arith.mulf %250, %292 : vector<64x32xf32>
    %294 = arith.truncf %293 : vector<64x32xf32> to vector<64x32xbf16>
    "tpu.trace_start"() <{level = 10 : i32, message = "ld,md->lm"}> : () -> ()
    %cst_164 = arith.constant dense<0.000000e+00> : vector<64x64xf32>
    %295 = tpu.matmul %291, %251, %cst_164 {dimension_numbers = #tpu.dot_dimension_numbers<[1], [1], [0], [0], [0, 0, 1, 0], [], []>} : vector<64x32xbf16>, vector<64x32xbf16>, vector<64x64xf32> -> vector<64x64xf32>
    "tpu.trace_stop"() : () -> ()
    %c1_165 = arith.constant 1 : index
    %c1_166 = arith.constant 1 : index
    %c0_167 = arith.constant 0 : index
    %c0_168 = arith.constant 0 : index
    %296 = vector.load %arg2[%c1_165, %c1_166, %c0_167, %c0_168] : memref<2x2x64x64xf32, #tpu.memory_space<vmem>>, vector<1x1x64x64xf32>
    %297 = vector.shape_cast %296 : vector<1x1x64x64xf32> to vector<64x64xf32>
    %298 = arith.addf %295, %297 : vector<64x64xf32>
    %cst_169 = arith.constant dense<0xFF800000> : vector<64xf32>
    %299 = vector.multi_reduction <maximumf>, %298, %cst_169 [1] : vector<64x64xf32> to vector<64xf32>
    %300 = vector.shape_cast %299 : vector<64xf32> to vector<64x1xf32>
    %301 = vector.broadcast %300 : vector<64x1xf32> to vector<64x64xf32>
    %302 = arith.subf %298, %301 : vector<64x64xf32>
    %303 = math.exp %302 : vector<64x64xf32>
    %cst_170 = arith.constant dense<0.000000e+00> : vector<64xf32>
    %304 = vector.multi_reduction <add>, %303, %cst_170 [1] : vector<64x64xf32> to vector<64xf32>
    %305 = vector.shape_cast %304 : vector<64xf32> to vector<64x1xf32>
    %306 = vector.broadcast %305 : vector<64x1xf32> to vector<64x64xf32>
    %307 = arith.divf %303, %306 : vector<64x64xf32>
    %308 = arith.truncf %307 : vector<64x64xf32> to vector<64x64xbf16>
    %cst_171 = arith.constant dense<0.000000e+00> : vector<64x32xf32>
    %309 = tpu.matmul %308, %294, %cst_171 {dimension_numbers = #tpu.dot_dimension_numbers<[1], [0], [0], [1], [0, 0, 1, 1], [], []>} : vector<64x64xbf16>, vector<64x32xbf16>, vector<64x32xf32> -> vector<64x32xf32>
    %310 = arith.addf %281, %309 : vector<64x32xf32>
    %311 = arith.truncf %310 : vector<64x32xf32> to vector<64x32xbf16>
    %c1_172 = arith.constant 1 : index
    %c0_173 = arith.constant 0 : index
    %c0_174 = arith.constant 0 : index
    %312 = vector.load %arg11[%c1_172, %c0_173, %c0_174] : memref<2x32x32xbf16, #tpu.memory_space<vmem>>, vector<1x32x32xbf16>
    %313 = vector.shape_cast %312 : vector<1x32x32xbf16> to vector<32x32xbf16>
    %cst_175 = arith.constant dense<0.000000e+00> : vector<64x32xf32>
    %314 = tpu.matmul %311, %313, %cst_175 {dimension_numbers = #tpu.dot_dimension_numbers<[1], [0], [0], [1], [0, 0, 1, 1], [], []>} : vector<64x32xbf16>, vector<32x32xbf16>, vector<64x32xf32> -> vector<64x32xf32>
    %c1_176 = arith.constant 1 : index
    %c0_177 = arith.constant 0 : index
    %c0_178 = arith.constant 0 : index
    %315 = vector.load %arg12[%c1_176, %c0_177, %c0_178] : memref<2x1x32xf32, #tpu.memory_space<vmem>>, vector<1x1x32xf32>
    %316 = vector.shape_cast %315 : vector<1x1x32xf32> to vector<1x32xf32>
    %317 = vector.broadcast %316 : vector<1x32xf32> to vector<64x32xf32>
    %318 = arith.addf %314, %317 : vector<64x32xf32>
    %319 = arith.addf %209, %318 : vector<64x32xf32>
    %c1_179 = arith.constant 1 : index
    %c0_180 = arith.constant 0 : index
    %c0_181 = arith.constant 0 : index
    %320 = vector.load %arg13[%c1_179, %c0_180, %c0_181] : memref<2x1x32xf32, #tpu.memory_space<vmem>>, vector<1x1x32xf32>
    %321 = vector.shape_cast %320 : vector<1x1x32xf32> to vector<1x32xf32>
    %c1_182 = arith.constant 1 : index
    %c0_183 = arith.constant 0 : index
    %c0_184 = arith.constant 0 : index
    %322 = vector.load %arg14[%c1_182, %c0_183, %c0_184] : memref<2x1x32xf32, #tpu.memory_space<vmem>>, vector<1x1x32xf32>
    %323 = vector.shape_cast %322 : vector<1x1x32xf32> to vector<1x32xf32>
    %cst_185 = arith.constant dense<0.000000e+00> : vector<64xf32>
    %324 = vector.multi_reduction <add>, %319, %cst_185 [1] : vector<64x32xf32> to vector<64xf32>
    %325 = vector.shape_cast %324 : vector<64xf32> to vector<64x1xf32>
    %cst_186 = arith.constant 3.200000e+01 : f32
    %326 = vector.broadcast %cst_186 : f32 to vector<64x1xf32>
    %327 = arith.divf %325, %326 : vector<64x1xf32>
    %328 = vector.broadcast %327 : vector<64x1xf32> to vector<64x32xf32>
    %329 = arith.subf %319, %328 : vector<64x32xf32>
    %330 = arith.mulf %329, %329 : vector<64x32xf32>
    %cst_187 = arith.constant dense<0.000000e+00> : vector<64xf32>
    %331 = vector.multi_reduction <add>, %330, %cst_187 [1] : vector<64x32xf32> to vector<64xf32>
    %332 = vector.shape_cast %331 : vector<64xf32> to vector<64x1xf32>
    %cst_188 = arith.constant 3.200000e+01 : f32
    %333 = vector.broadcast %cst_188 : f32 to vector<64x1xf32>
    %334 = arith.divf %332, %333 : vector<64x1xf32>
    %335 = vector.broadcast %327 : vector<64x1xf32> to vector<64x32xf32>
    %336 = arith.subf %319, %335 : vector<64x32xf32>
    %cst_189 = arith.constant 9.99999974E-6 : f32
    %337 = vector.broadcast %cst_189 : f32 to vector<64x1xf32>
    %338 = arith.addf %334, %337 : vector<64x1xf32>
    %339 = math.rsqrt %338 : vector<64x1xf32>
    %340 = vector.broadcast %339 : vector<64x1xf32> to vector<64x32xf32>
    %341 = arith.mulf %336, %340 : vector<64x32xf32>
    %342 = vector.broadcast %321 : vector<1x32xf32> to vector<64x32xf32>
    %343 = arith.mulf %341, %342 : vector<64x32xf32>
    %344 = vector.broadcast %323 : vector<1x32xf32> to vector<64x32xf32>
    %345 = arith.addf %343, %344 : vector<64x32xf32>
    %346 = arith.truncf %345 : vector<64x32xf32> to vector<64x32xbf16>
    %c1_190 = arith.constant 1 : index
    %c0_191 = arith.constant 0 : index
    %c0_192 = arith.constant 0 : index
    %347 = vector.load %arg15[%c1_190, %c0_191, %c0_192] : memref<2x32x128xbf16, #tpu.memory_space<vmem>>, vector<1x32x128xbf16>
    %348 = vector.shape_cast %347 : vector<1x32x128xbf16> to vector<32x128xbf16>
    %cst_193 = arith.constant dense<0.000000e+00> : vector<64x128xf32>
    %349 = tpu.matmul %346, %348, %cst_193 {dimension_numbers = #tpu.dot_dimension_numbers<[1], [0], [0], [1], [0, 0, 1, 1], [], []>} : vector<64x32xbf16>, vector<32x128xbf16>, vector<64x128xf32> -> vector<64x128xf32>
    %c1_194 = arith.constant 1 : index
    %c0_195 = arith.constant 0 : index
    %c0_196 = arith.constant 0 : index
    %350 = vector.load %arg16[%c1_194, %c0_195, %c0_196] : memref<2x1x128xf32, #tpu.memory_space<vmem>>, vector<1x1x128xf32>
    %351 = vector.shape_cast %350 : vector<1x1x128xf32> to vector<1x128xf32>
    %352 = vector.broadcast %351 : vector<1x128xf32> to vector<64x128xf32>
    %353 = arith.addf %349, %352 : vector<64x128xf32>
    %cst_197 = arith.constant 5.000000e-01 : f32
    %354 = vector.broadcast %cst_197 : f32 to vector<64x128xf32>
    %355 = arith.mulf %354, %353 : vector<64x128xf32>
    %cst_198 = arith.constant 0.707106769 : f32
    %356 = vector.broadcast %cst_198 : f32 to vector<64x128xf32>
    %357 = arith.mulf %353, %356 : vector<64x128xf32>
    %358 = math.absf %357 : vector<64x128xf32>
    %cst_199 = arith.constant 0.327591091 : f32
    %359 = vector.broadcast %cst_199 : f32 to vector<64x128xf32>
    %360 = arith.mulf %359, %358 : vector<64x128xf32>
    %cst_200 = arith.constant 1.000000e+00 : f32
    %361 = vector.broadcast %cst_200 : f32 to vector<64x128xf32>
    %362 = arith.addf %361, %360 : vector<64x128xf32>
    %cst_201 = arith.constant 1.000000e+00 : f32
    %363 = vector.broadcast %cst_201 : f32 to vector<64x128xf32>
    %364 = arith.divf %363, %362 : vector<64x128xf32>
    %cst_202 = arith.constant 1.06140542 : f32
    %365 = vector.broadcast %cst_202 : f32 to vector<64x128xf32>
    %366 = arith.mulf %365, %364 : vector<64x128xf32>
    %cst_203 = arith.constant -1.45315206 : f32
    %367 = vector.broadcast %cst_203 : f32 to vector<64x128xf32>
    %368 = arith.addf %366, %367 : vector<64x128xf32>
    %369 = arith.mulf %368, %364 : vector<64x128xf32>
    %cst_204 = arith.constant 1.42141378 : f32
    %370 = vector.broadcast %cst_204 : f32 to vector<64x128xf32>
    %371 = arith.addf %369, %370 : vector<64x128xf32>
    %372 = arith.mulf %371, %364 : vector<64x128xf32>
    %cst_205 = arith.constant -0.284496725 : f32
    %373 = vector.broadcast %cst_205 : f32 to vector<64x128xf32>
    %374 = arith.addf %372, %373 : vector<64x128xf32>
    %375 = arith.mulf %374, %364 : vector<64x128xf32>
    %cst_206 = arith.constant 0.254829586 : f32
    %376 = vector.broadcast %cst_206 : f32 to vector<64x128xf32>
    %377 = arith.addf %375, %376 : vector<64x128xf32>
    %378 = arith.mulf %377, %364 : vector<64x128xf32>
    %379 = arith.mulf %358, %358 : vector<64x128xf32>
    %cst_207 = arith.constant 0.000000e+00 : f32
    %380 = vector.broadcast %cst_207 : f32 to vector<64x128xf32>
    %381 = arith.subf %380, %379 : vector<64x128xf32>
    %382 = math.exp %381 : vector<64x128xf32>
    %383 = arith.mulf %378, %382 : vector<64x128xf32>
    %cst_208 = arith.constant 1.000000e+00 : f32
    %384 = vector.broadcast %cst_208 : f32 to vector<64x128xf32>
    %385 = arith.subf %384, %383 : vector<64x128xf32>
    %cst_209 = arith.constant 0.000000e+00 : f32
    %386 = vector.broadcast %cst_209 : f32 to vector<64x128xf32>
    %387 = arith.cmpf oge, %357, %386 : vector<64x128xf32>
    %cst_210 = arith.constant 0.000000e+00 : f32
    %388 = vector.broadcast %cst_210 : f32 to vector<64x128xf32>
    %389 = arith.subf %388, %385 : vector<64x128xf32>
    %390 = arith.select %387, %385, %389 : vector<64x128xi1>, vector<64x128xf32>
    %cst_211 = arith.constant 1.000000e+00 : f32
    %391 = vector.broadcast %cst_211 : f32 to vector<64x128xf32>
    %392 = arith.addf %391, %390 : vector<64x128xf32>
    %393 = arith.mulf %355, %392 : vector<64x128xf32>
    %394 = arith.truncf %393 : vector<64x128xf32> to vector<64x128xbf16>
    %c1_212 = arith.constant 1 : index
    %c0_213 = arith.constant 0 : index
    %c0_214 = arith.constant 0 : index
    %395 = vector.load %arg17[%c1_212, %c0_213, %c0_214] : memref<2x128x32xbf16, #tpu.memory_space<vmem>>, vector<1x128x32xbf16>
    %396 = vector.shape_cast %395 : vector<1x128x32xbf16> to vector<128x32xbf16>
    %cst_215 = arith.constant dense<0.000000e+00> : vector<64x32xf32>
    %397 = tpu.matmul %394, %396, %cst_215 {dimension_numbers = #tpu.dot_dimension_numbers<[1], [0], [0], [1], [0, 0, 1, 1], [], []>} : vector<64x128xbf16>, vector<128x32xbf16>, vector<64x32xf32> -> vector<64x32xf32>
    %c1_216 = arith.constant 1 : index
    %c0_217 = arith.constant 0 : index
    %c0_218 = arith.constant 0 : index
    %398 = vector.load %arg18[%c1_216, %c0_217, %c0_218] : memref<2x1x32xf32, #tpu.memory_space<vmem>>, vector<1x1x32xf32>
    %399 = vector.shape_cast %398 : vector<1x1x32xf32> to vector<1x32xf32>
    %400 = vector.broadcast %399 : vector<1x32xf32> to vector<64x32xf32>
    %401 = arith.addf %397, %400 : vector<64x32xf32>
    %402 = arith.addf %319, %401 : vector<64x32xf32>
    %c0_219 = arith.constant 0 : index
    %c0_220 = arith.constant 0 : index
    %c0_221 = arith.constant 0 : index
    %403 = vector.load %arg19[%c0_219, %c0_220, %c0_221] : memref<1x64x32xf32, #tpu.memory_space<vmem>>, vector<1x64x32xf32>
    %404 = vector.shape_cast %403 : vector<1x64x32xf32> to vector<64x32xf32>
    %405 = vector.shape_cast %402 : vector<64x32xf32> to vector<1x64x32xf32>
    tpu.vector_store %arg19[%c0_219, %c0_220, %c0_221], %405 {strides = array<i32>} : memref<1x64x32xf32, #tpu.memory_space<vmem>>, vector<1x64x32xf32>,
    return
  }
  func.func @transform_0(%arg0: i32) -> (i32, i32, i32) {
    %c0_i32 = arith.constant 0 : i32
    %c0_i32_0 = arith.constant 0 : i32
    %c0_i32_1 = arith.constant 0 : i32
    return %arg0, %c0_i32, %c0_i32_0 : i32, i32, i32
  }
  func.func @transform_1(%arg0: i32) -> (i32, i32, i32, i32) {
    %c0_i32 = arith.constant 0 : i32
    %c0_i32_0 = arith.constant 0 : i32
    %c0_i32_1 = arith.constant 0 : i32
    %c0_i32_2 = arith.constant 0 : i32
    %c0_i32_3 = arith.constant 0 : i32
    return %c0_i32, %c0_i32_0, %c0_i32_1, %c0_i32_2 : i32, i32, i32, i32
  }
  func.func @transform_2(%arg0: i32) -> (i32, i32, i32) {
    %c0_i32 = arith.constant 0 : i32
    %c0_i32_0 = arith.constant 0 : i32
    %c0_i32_1 = arith.constant 0 : i32
    %c0_i32_2 = arith.constant 0 : i32
    return %c0_i32, %c0_i32_0, %c0_i32_1 : i32, i32, i32
  }
  func.func @transform_3(%arg0: i32) -> (i32, i32, i32) {
    %c0_i32 = arith.constant 0 : i32
    %c0_i32_0 = arith.constant 0 : i32
    %c0_i32_1 = arith.constant 0 : i32
    %c0_i32_2 = arith.constant 0 : i32
    return %c0_i32, %c0_i32_0, %c0_i32_1 : i32, i32, i32
  }
  func.func @transform_4(%arg0: i32) -> (i32, i32, i32, i32) {
    %c0_i32 = arith.constant 0 : i32
    %c0_i32_0 = arith.constant 0 : i32
    %c0_i32_1 = arith.constant 0 : i32
    %c0_i32_2 = arith.constant 0 : i32
    %c0_i32_3 = arith.constant 0 : i32
    return %c0_i32, %c0_i32_0, %c0_i32_1, %c0_i32_2 : i32, i32, i32, i32
  }
  func.func @transform_5(%arg0: i32) -> (i32, i32, i32, i32) {
    %c0_i32 = arith.constant 0 : i32
    %c0_i32_0 = arith.constant 0 : i32
    %c0_i32_1 = arith.constant 0 : i32
    %c0_i32_2 = arith.constant 0 : i32
    %c0_i32_3 = arith.constant 0 : i32
    return %c0_i32, %c0_i32_0, %c0_i32_1, %c0_i32_2 : i32, i32, i32, i32
  }
  func.func @transform_6(%arg0: i32) -> (i32, i32, i32) {
    %c0_i32 = arith.constant 0 : i32
    %c0_i32_0 = arith.constant 0 : i32
    %c0_i32_1 = arith.constant 0 : i32
    %c0_i32_2 = arith.constant 0 : i32
    return %c0_i32, %c0_i32_0, %c0_i32_1 : i32, i32, i32
  }
  func.func @transform_7(%arg0: i32) -> (i32, i32, i32) {
    %c0_i32 = arith.constant 0 : i32
    %c0_i32_0 = arith.constant 0 : i32
    %c0_i32_1 = arith.constant 0 : i32
    %c0_i32_2 = arith.constant 0 : i32
    return %c0_i32, %c0_i32_0, %c0_i32_1 : i32, i32, i32
  }
  func.func @transform_8(%arg0: i32) -> (i32, i32, i32) {
    %c0_i32 = arith.constant 0 : i32
    %c0_i32_0 = arith.constant 0 : i32
    %c0_i32_1 = arith.constant 0 : i32
    %c0_i32_2 = arith.constant 0 : i32
    return %c0_i32, %c0_i32_0, %c0_i32_1 : i32, i32, i32
  }
  func.func @transform_9(%arg0: i32) -> (i32, i32, i32) {
    %c0_i32 = arith.constant 0 : i32
    %c0_i32_0 = arith.constant 0 : i32
    %c0_i32_1 = arith.constant 0 : i32
    %c0_i32_2 = arith.constant 0 : i32
    return %c0_i32, %c0_i32_0, %c0_i32_1 : i32, i32, i32
  }
  func.func @transform_10(%arg0: i32) -> (i32, i32, i32) {
    %c0_i32 = arith.constant 0 : i32
    %c0_i32_0 = arith.constant 0 : i32
    %c0_i32_1 = arith.constant 0 : i32
    %c0_i32_2 = arith.constant 0 : i32
    return %c0_i32, %c0_i32_0, %c0_i32_1 : i32, i32, i32
  }
  func.func @transform_11(%arg0: i32) -> (i32, i32, i32) {
    %c0_i32 = arith.constant 0 : i32
    %c0_i32_0 = arith.constant 0 : i32
    %c0_i32_1 = arith.constant 0 : i32
    %c0_i32_2 = arith.constant 0 : i32
    return %c0_i32, %c0_i32_0, %c0_i32_1 : i32, i32, i32
  }
  func.func @transform_12(%arg0: i32) -> (i32, i32, i32) {
    %c0_i32 = arith.constant 0 : i32
    %c0_i32_0 = arith.constant 0 : i32
    %c0_i32_1 = arith.constant 0 : i32
    %c0_i32_2 = arith.constant 0 : i32
    return %c0_i32, %c0_i32_0, %c0_i32_1 : i32, i32, i32
  }
  func.func @transform_13(%arg0: i32) -> (i32, i32, i32) {
    %c0_i32 = arith.constant 0 : i32
    %c0_i32_0 = arith.constant 0 : i32
    %c0_i32_1 = arith.constant 0 : i32
    %c0_i32_2 = arith.constant 0 : i32
    return %c0_i32, %c0_i32_0, %c0_i32_1 : i32, i32, i32
  }
  func.func @transform_14(%arg0: i32) -> (i32, i32, i32) {
    %c0_i32 = arith.constant 0 : i32
    %c0_i32_0 = arith.constant 0 : i32
    %c0_i32_1 = arith.constant 0 : i32
    %c0_i32_2 = arith.constant 0 : i32
    return %c0_i32, %c0_i32_0, %c0_i32_1 : i32, i32, i32
  }
  func.func @transform_15(%arg0: i32) -> (i32, i32, i32) {
    %c0_i32 = arith.constant 0 : i32
    %c0_i32_0 = arith.constant 0 : i32
    %c0_i32_1 = arith.constant 0 : i32
    %c0_i32_2 = arith.constant 0 : i32
    return %c0_i32, %c0_i32_0, %c0_i32_1 : i32, i32, i32
  }
  func.func @transform_16(%arg0: i32) -> (i32, i32, i32) {
    %c0_i32 = arith.constant 0 : i32
    %c0_i32_0 = arith.constant 0 : i32
    %c0_i32_1 = arith.constant 0 : i32
    %c0_i32_2 = arith.constant 0 : i32
    return %c0_i32, %c0_i32_0, %c0_i32_1 : i32, i32, i32
  }
  func.func @transform_17(%arg0: i32) -> (i32, i32, i32) {
    %c0_i32 = arith.constant 0 : i32
    %c0_i32_0 = arith.constant 0 : i32
    %c0_i32_1 = arith.constant 0 : i32
    %c0_i32_2 = arith.constant 0 : i32
    return %c0_i32, %c0_i32_0, %c0_i32_1 : i32, i32, i32
  }
  func.func @transform_18(%arg0: i32) -> (i32, i32, i32) {
    %c0_i32 = arith.constant 0 : i32
    %c0_i32_0 = arith.constant 0 : i32
    %c0_i32_1 = arith.constant 0 : i32
    return %arg0, %c0_i32, %c0_i32_0 : i32, i32, i32
  }
}

</mosaic_0001>

<bundles_post_ra>
// kernel: basic_layer_forward.1
= control target key start
LH: loop header
LB: loop body
LE: loop exit
PB: predicated region body
PF: predicated region fallthrough
CT: control target
= control target key end

     0   :  { %s7231_s0 = inlined_call_operand.vmem [shape: f32[2,64,32], index: 0, kind: input, shape index: {}]   ;;  %s7232_s1 = inlined_call_operand.vmem [shape: f32[2,2,64,64], index: 1, kind: input, shape index: {}]   ;;  %s7233_s2 = inlined_call_operand.vmem [shape: f32[2,1,32], index: 2, kind: input, shape index: {}]   ;;  %s7234_s3 = inlined_call_operand.vmem [shape: f32[2,1,32], index: 3, kind: input, shape index: {}]   ;;  %s7235_s4 = inlined_call_operand.vmem [shape: bf16[2,2,32,32], index: 4, kind: input, shape index: {}]   ;;  %s7236_s5 = inlined_call_operand.vmem [shape: f32[2,2,1,32], index: 5, kind: input, shape index: {}]   ;;  %s7237_s6 = inlined_call_operand.vmem [shape: bf16[2,32,32], index: 6, kind: input, shape index: {}]   ;;  %s7238_s7 = inlined_call_operand.vmem [shape: f32[2,1,32], index: 7, kind: input, shape index: {}]   ;;  %s7239_s8 = inlined_call_operand.hbm [shape: bf16[2,32,32], index: 8, kind: input, shape index: {}]   ;;  %s7240_s9 = inlined_call_operand.vmem [shape: f32[2,1,32], index: 9, kind: input, shape index: {}]   ;;  %s7241_s10 = inlined_call_operand.hbm [shape: bf16[2,32,32], index: 10, kind: input, shape index: {}]   ;;  %s7242_s11 = inlined_call_operand.vmem [shape: f32[2,1,32], index: 11, kind: input, shape index: {}]   ;;  %s7243_s12 = inlined_call_operand.vmem [shape: f32[2,1,32], index: 12, kind: input, shape index: {}]   ;;  %s7244_s13 = inlined_call_operand.vmem [shape: f32[2,1,32], index: 13, kind: input, shape index: {}]   ;;  %s7245_s14 = inlined_call_operand.hbm [shape: bf16[2,32,128], index: 14, kind: input, shape index: {}]   ;;  %s7246_s15 = inlined_call_operand.vmem [shape: f32[2,1,128], index: 15, kind: input, shape index: {}]   ;;  %s7247_s16 = inlined_call_operand.vmem [shape: bf16[2,128,32], index: 16, kind: input, shape index: {}]   ;;  %s7248_s17 = inlined_call_operand.vmem [shape: f32[2,1,32], index: 17, kind: input, shape index: {}]   ;;  %s7249_s18 = inlined_call_operand.vmem [shape: f32[2,64,32], index: 18, kind: output, shape index: {}]  }
   0x1   :  { %7252 = sst [smem:[#allocation9_spill]] %s7231_s0 }
   0x2   :  { %7253 = sst [smem:[#allocation10_spill]] %s7232_s1 }
   0x3   :  { %7254 = sst [smem:[#allocation11_spill]] %s7233_s2 }
   0x4   :  { %23 = vsyncpa [#allocation3], 0 }
   0x5   :  { %24 = vsyncpa [#allocation5], 0  ;;  %s5605_s27 = smov 0  }
   0x6 LB: > { %s5611_s28 = sadd.s32 4294967295, %s5502_s27   ;;  %p4339_p0 = scmp.ge.s32.totalorder %s5502_s27, 1  ;;  %s5502_s27 = sphi %s5605_s27, %s30_s27  }
   0x7   : > { %p444_p1 = scmp.lt.s32.totalorder %s5502_s27, 3  ;;  %p5086_p2 = scmp.eq.s32.totalorder %s5611_s28, 0 }
   0x8   : > { %s5504_s30 = smov [#allocation4]   ;;  %s5505_s19 = smov [#allocation2]  }
   0x9   : > { %p5616_p3 = pnand %p4339_p0, %p444_p1  ;;  %s493_s0 = sshll.u32 %s5504_s30, 4  ;;  %s494_s0 = int_to_ptr.vmem [resolvable:$true] %s493_s0 }
   0xa   : > { %s477_s1 = sshll.u32 %s5505_s19, 4  ;;  %s5506_s21 = smov [#allocation6]   ;;  %s478_s1 = int_to_ptr.vmem [resolvable:$true] %s477_s1 }
   0xb   : > { %p5076_p4 = pneg %p5616_p3  ;;  %s515_s22 = sshll.u32 %s5506_s21, 4  ;;  %s5628_s22 = int_to_ptr.vmem [resolvable:$true] %s515_s22 }
   0xc   : > { %s5421_s2 = scalar_lea.vmem %s494_s0, 512  ;;  %p5429_p10 = scmp.lt.s32.totalorder %s494_s0, %s494_s0 }
   0xd   : > { %p5624_p5 = pnand %p5086_p2, %p5076_p4  ;;  %p5422_p7 = scmp.ne.s32.totalorder %s494_s0, %s5421_s2 }
   0xe   : > { %p5430_p11 = scmp.lt.s32.totalorder %s5421_s2, %s5421_s2 }
   0xf   : > { %p5412_p6 = pneg %p5624_p5 }
  0x10   : > { %p5431_p12 = por %p5430_p11, %p5429_p10 }
  0x11   : > { %p5424_p8 = pnand %p5422_p7, %p5412_p6 }
  0x13   : > { %p5425_p9 = pneg %p5424_p8 }
  0x15   : > { %p5432_p13 = pnand %p5431_p12, %p5425_p9 }
  0x17   : > { %5435 = shalt.err (!%p5432_p13)
}
  0x18   : > { %s5507_s23 = smov 64   ;;  %s5508_s24 = smov 4  }
  0x19   : > { %5082 = dma.hbm_to_vmem [thread:$0]  (!%p5624_p5), %s7241_s10, 512, %s494_s0, [#allocation5], %s5507_s23, %s5507_s23, %s5508_s24  }
  0x1a   : > { %s5447_s30 = scalar_lea.vmem %s478_s1, 512  ;;  %p5455_p7 = scmp.lt.s32.totalorder %s478_s1, %s478_s1 }
  0x1b   : > { %p5448_p0 = scmp.ne.s32.totalorder %s478_s1, %s5447_s30  ;;  %p5456_p8 = scmp.lt.s32.totalorder %s5447_s30, %s5447_s30 }
  0x1d   : > { %p5450_p1 = pnand %p5448_p0, %p5412_p6  ;;  %p5457_p10 = por %p5456_p8, %p5455_p7 }
  0x1f   : > { %p5451_p4 = pneg %p5450_p1 }
  0x21   : > { %p5458_p9 = pnand %p5457_p10, %p5451_p4 }
  0x23   : > { %5461 = shalt.err (!%p5458_p9)
}
  0x24   : > { %5079 = dma.hbm_to_vmem [thread:$0]  (!%p5624_p5), %s7239_s8, 512, %s478_s1, [#allocation3], %s5507_s23, %s5507_s23, %s5508_s24  }
  0x25   : > { %s5473_s0 = scalar_lea.vmem %s5628_s22, 512  ;;  %p5481_p0 = scmp.lt.s32.totalorder %s5628_s22, %s5628_s22 }
  0x26   : > { %p5474_p11 = scmp.ne.s32.totalorder %s5628_s22, %s5473_s0  ;;  %p5482_p1 = scmp.lt.s32.totalorder %s5473_s0, %s5473_s0 }
  0x28   : > { %p5476_p12 = pnand %p5474_p11, %p5412_p6  ;;  %p5483_p4 = por %p5482_p1, %p5481_p0 }
  0x2a   : > { %p5477_p13 = pneg %p5476_p12 }
  0x2c   : > { %p5484_p7 = pnand %p5483_p4, %p5477_p13 }
  0x2e   : > { %5487 = shalt.err (!%p5484_p7)
}
  0x2f   : > { %5085 = dma.hbm_to_vmem [thread:$0]  (!%p5624_p5), %s7245_s14, 512, %s5628_s22, [#allocation5], %s5507_s23, %s5507_s23, %s5508_s24  }
  0x30   : > { %548 = sbr.rel (%p5616_p3) target bundleno = 4624 (0x1210), region = 92 }
  0x35   : > { %5493 = dma.done.wait (%p5086_p2), [#allocation3], 512  }
  0x36   : > { %5495 = vsyncadd (%p5086_p2), [#allocation3], 4294966784 }
  0x37   : > { %5497 = dma.done.wait (%p5086_p2), [#allocation5], 1024  }
  0x38   : > { %5499 = vsyncadd (%p5086_p2), [#allocation5], 4294966272  ;;  %p610_p6 = scmp.lt.s32.totalorder %s5611_s28, 1  ;;  %s7257_s22 = sld [smem:[#allocation9_spill]]  ;;  %vm643_vm0 = vcmask 261120   ;;  %v5106_v56 = vld [vmem:[%s7237_s6 + $0x8] sm:$0xff]  }
  0x39   : > { %v5107_v57 = vld [vmem:[%s7235_s4 + $0x8] sm:$0xff]   ;;  %v5108_v58 = vld [vmem:[%s7237_s6] sm:$0xff]   ;;  %4728 = vmatprep.subr.bf16.mxu1 %v5106_v56  ;;  %v5756_v61 = vld [vmem:[%s7235_s4 + $0x18] sm:$0xff]   ;;  %s7258_s26 = sld [smem:[#allocation11_spill]]  ;;  %vm1182_vm5 = vcmask 523264  }
  0x3a   : > { %s7261_s28 = smov (!%p610_p6, %s5611_s28), 1  ;;  %4752 = vmatprep.subr.bf16.mxu0 %v5107_v57  ;;  %4729 = vmatpush3.bf16.msra.mxu1 %v5106_v56  ;;  %v5109_v59 = vld [vmem:[%s7235_s4] sm:$0xff]   ;;  %v5751_v60 = vld [vmem:[#allocation2 + $0x8] sm:$0xff]   ;;  %s7259_s2 = sld [smem:[#allocation10_spill]] }
  0x3b   : > { %s4566_s29 = sshll.u32 %s7261_s28, 6  ;;  %4753 = vmatpush3.bf16.msra.mxu0 %v5107_v57  ;;  %4730 = vmatprep.subr.bf16.mxu1 %v5108_v58 }
  0x3c   : > { %4754 = vmatprep.subr.bf16.mxu0 %v5109_v59 }
  0x3e   : > { %s5681_s23 = scalar_lea.vmem %s7257_s22, %s4566_s29  ;;  %4731 = vmatpush3.bf16.msra.mxu1 %v5108_v58  ;;  %s619_s22 = scalar_lea.vmem %s7249_s18, %s4566_s29 }
  0x3f   : > { %v621_v0 = vld [vmem:[%s5681_s23] sm:$0xff]  ;;  %v623_v1 = vld [vmem:[%s5681_s23 + $0x10] sm:$0xff]  ;;  %v622_v2 = vld [vmem:[%s5681_s23 + $0x8] sm:$0xff]  ;;  %4755 = vmatpush3.bf16.msra.mxu0 %v5109_v59  ;;  %4740 = vmatprep.subr.bf16.mxu1 %v5751_v60 }
  0x40   : > { %v644_v3 = vsel %vm643_vm0, %v621_v0, 0.0  ;;  %v650_v4 = vsel %vm643_vm0, %v623_v1, 0.0  ;;  %v624_v5 = vld [vmem:[%s5681_s23 + $0x18] sm:$0xff]  ;;  %v625_v6 = vld [vmem:[%s5681_s23 + $0x20] sm:$0xff]  ;;  %v626_v7 = vld [vmem:[%s5681_s23 + $0x28] sm:$0xff]  ;;  %v647_v8 = vsel %vm643_vm0, %v622_v2, 0.0  ;;  %4780 = vmatprep.subr.bf16.mxu0 %v5756_v61 }
  0x41   : > { %645 = vadd.xlane.f32.xlu0 %v644_v3  ;;  %651 = vadd.xlane.f32.xlu1 %v650_v4  ;;  %v653_v9 = vsel %vm643_vm0, %v624_v5, 0.0  ;;  %v656_v10 = vsel %vm643_vm0, %v625_v6, 0.0  ;;  %v659_v11 = vsel %vm643_vm0, %v626_v7, 0.0  ;;  %v627_v12 = vld [vmem:[%s5681_s23 + $0x30] sm:$0xff]  ;;  %v628_v13 = vld [vmem:[%s5681_s23 + $0x38] sm:$0xff] }
  0x42   : > { %v662_v14 = vsel %vm643_vm0, %v627_v12, 0.0  ;;  %v665_v15 = vsel %vm643_vm0, %v628_v13, 0.0 }
  0x45   : > { %648 = vadd.xlane.f32.xlu0 %v647_v8  ;;  %654 = vadd.xlane.f32.xlu1 %v653_v9 }
  0x49   : > { %657 = vadd.xlane.f32.xlu0 %v656_v10  ;;  %660 = vadd.xlane.f32.xlu1 %v659_v11 }
  0x4d   : > { %663 = vadd.xlane.f32.xlu0 %v662_v14  ;;  %666 = vadd.xlane.f32.xlu1 %v665_v15 }
  0xca   : > { %v646_v16 = vpop.xlane.xlu0 %645  ;;  %v652_v17 = vpop.xlane.xlu1 %651 }
  0xcb   : > { %v669_v18 = vmul.f32 0.03125, %v646_v16  ;;  %v671_v19 = vmul.f32 0.03125, %v652_v17 }
  0xcd   : > { %v5699_v20 = vsub.f32 %v621_v0, %v669_v18  ;;  %v5701_v21 = vsub.f32 %v623_v1, %v671_v19 }
  0xce   : > { %v649_v22 = vpop.xlane.xlu0 %648  ;;  %v655_v23 = vpop.xlane.xlu1 %654 }
  0xcf   : > { %v670_v24 = vmul.f32 0.03125, %v649_v22  ;;  %v672_v25 = vmul.f32 0.03125, %v655_v23  ;;  %v685_v26 = vmul.f32 %v5699_v20, %v5699_v20  ;;  %v687_v27 = vmul.f32 %v5701_v21, %v5701_v21 }
  0xd1   : > { %v5707_v28 = vsub.f32 %v622_v2, %v670_v24  ;;  %v5709_v29 = vsub.f32 %v624_v5, %v672_v25  ;;  %v693_v30 = vsel %vm643_vm0, %v685_v26, 0.0  ;;  %v699_v33 = vsel %vm643_vm0, %v687_v27, 0.0  ;;  %v4354_v26 = vld [vmem:[%s7258_s26] ss:$0 sm:$0xff] }
  0xd2   : > { %694 = vadd.xlane.f32.xlu0 %v693_v30  ;;  %v658_v31 = vpop.xlane.xlu0 %657  ;;  %v661_v32 = vpop.xlane.xlu1 %660 }
  0xd3   : > { %v673_v34 = vmul.f32 0.03125, %v658_v31  ;;  %v674_v35 = vmul.f32 0.03125, %v661_v32  ;;  %v686_v36 = vmul.f32 %v5707_v28, %v5707_v28  ;;  %v688_v37 = vmul.f32 %v5709_v29, %v5709_v29 }
  0xd5   : > { %v5717_v38 = vsub.f32 %v625_v6, %v673_v34  ;;  %v5719_v39 = vsub.f32 %v626_v7, %v674_v35  ;;  %v696_v40 = vsel %vm643_vm0, %v686_v36, 0.0  ;;  %v702_v43 = vsel %vm643_vm0, %v688_v37, 0.0 }
  0xd6   : > { %700 = vadd.xlane.f32.xlu0 %v699_v33  ;;  %697 = vadd.xlane.f32.xlu1 %v696_v40  ;;  %v664_v41 = vpop.xlane.xlu0 %663  ;;  %v667_v42 = vpop.xlane.xlu1 %666  ;;  %v4355_v33 = vld [vmem:[%s7234_s3] ss:$0 sm:$0xff] }
  0xd7   : > { %v675_v44 = vmul.f32 0.03125, %v664_v41  ;;  %v676_v45 = vmul.f32 0.03125, %v667_v42  ;;  %v689_v46 = vmul.f32 %v5717_v38, %v5717_v38  ;;  %v690_v47 = vmul.f32 %v5719_v39, %v5719_v39 }
  0xd9   : > { %v5727_v48 = vsub.f32 %v627_v12, %v675_v44  ;;  %v5729_v49 = vsub.f32 %v628_v13, %v676_v45  ;;  %v705_v50 = vsel %vm643_vm0, %v689_v46, 0.0  ;;  %v708_v51 = vsel %vm643_vm0, %v690_v47, 0.0 }
  0xda   : > { %703 = vadd.xlane.f32.xlu1 %v702_v43  ;;  %706 = vadd.xlane.f32.xlu0 %v705_v50 }
  0xdb   : > { %v691_v52 = vmul.f32 %v5727_v48, %v5727_v48  ;;  %v692_v53 = vmul.f32 %v5729_v49, %v5729_v49 }
  0xdd   : > { %v711_v54 = vsel %vm643_vm0, %v691_v52, 0.0  ;;  %v714_v55 = vsel %vm643_vm0, %v692_v53, 0.0 }
  0xde   : > { %709 = vadd.xlane.f32.xlu1 %v708_v51  ;;  %712 = vadd.xlane.f32.xlu0 %v711_v54  ;;  %v5112_v54 = vld [vmem:[#allocation2] sm:$0xff]  }
  0xe2   : > { %715 = vadd.xlane.f32.xlu1 %v714_v55 }
 0x15b   : > { %v695_v62 = vpop.xlane.xlu0 %694 }
 0x15c   : > { %v717_v63 = vmul.f32 0.03125, %v695_v62 }
 0x15e   : > { %v725_v0 = vadd.f32 1e-05, %v717_v63 }
 0x15f   : > { %v698_v1 = vpop.xlane.xlu1 %697  ;;  %v701_v2 = vpop.xlane.xlu0 %700 }
 0x160   : > { %5146 = vrsqrt.f32 %v725_v0  ;;  %v718_v3 = vmul.f32 0.03125, %v698_v1  ;;  %v719_v4 = vmul.f32 0.03125, %v701_v2  ;;  %v5802_v2 = vld [vmem:[%s7236_s5] ss:$0 sm:$0xff] }
 0x162   : > { %v726_v5 = vadd.f32 1e-05, %v718_v3  ;;  %v727_v6 = vadd.f32 1e-05, %v719_v4 }
 0x163   : > { %v704_v7 = vpop.xlane.xlu1 %703  ;;  %v707_v8 = vpop.xlane.xlu0 %706 }
 0x164   : > { %5148 = vrsqrt.f32 %v726_v5  ;;  %v720_v9 = vmul.f32 0.03125, %v704_v7  ;;  %v721_v10 = vmul.f32 0.03125, %v707_v8 }
 0x165   : > { %5150 = vrsqrt.f32 %v727_v6 }
 0x166   : > { %v728_v11 = vadd.f32 1e-05, %v720_v9  ;;  %v729_v12 = vadd.f32 1e-05, %v721_v10 }
 0x167   : > { %v710_v13 = vpop.xlane.xlu1 %709  ;;  %v713_v14 = vpop.xlane.xlu0 %712 }
 0x168   : > { %5152 = vrsqrt.f32 %v728_v11  ;;  %v722_v15 = vmul.f32 0.03125, %v710_v13  ;;  %v723_v16 = vmul.f32 0.03125, %v713_v14 }
 0x169   : > { %5154 = vrsqrt.f32 %v729_v12 }
 0x16a   : > { %v730_v17 = vadd.f32 1e-05, %v722_v15  ;;  %v731_v18 = vadd.f32 1e-05, %v723_v16  ;;  %v629_v15 = vlaneseq }
 0x16b   : > { %v716_v19 = vpop.xlane.xlu1 %715 }
 0x16c   : > { %5156 = vrsqrt.f32 %v730_v17  ;;  %v724_v22 = vmul.f32 0.03125, %v716_v19  ;;  %v5817_v17 = vld [vmem:[%s7238_s7] ss:$0 sm:$0xff] }
 0x16d   : > { %v5147_v23 = vpop.eup %5146  ;;  %5158 = vrsqrt.f32 %v731_v18 }
 0x16e   : > { %v732_v24 = vadd.f32 1e-05, %v724_v22  ;;  %v741_v25 = vmul.f32 %v5147_v23, %v5699_v20 }
 0x170   : > { %5160 = vrsqrt.f32 %v732_v24  ;;  %v755_v32 = vmul.f32 %v4354_v26, %v741_v25 }
 0x171   : > { %v5149_v27 = vpop.eup %5148 }
 0x172   : > { %v5151_v30 = vpop.eup %5150  ;;  %v742_v31 = vmul.f32 %v5149_v27, %v5707_v28  ;;  %v769_v20 = vadd.f32 %v4355_v33, %v755_v32 }
 0x173   : > { %v743_v34 = vmul.f32 %v5151_v30, %v5701_v21 }
 0x174   : > { %v756_v35 = vmul.f32 %v4354_v26, %v742_v31 }
 0x175   : > { %v5153_v36 = vpop.eup %5152  ;;  %v757_v42 = vmul.f32 %v4354_v26, %v743_v34 }
 0x176   : > { %v5155_v37 = vpop.eup %5154  ;;  %v770_v40 = vadd.f32 %v4355_v33, %v756_v35  ;;  %v744_v41 = vmul.f32 %v5153_v36, %v5709_v29  ;;  %v5835_v35 = vld [vmem:[%s7240_s9] ss:$0 sm:$0xff] }
 0x177   : > { %v745_v43 = vmul.f32 %v5155_v37, %v5717_v38  ;;  %v771_v21 = vadd.f32 %v4355_v33, %v757_v42  ;;  %v5113_v38 = vld [vmem:[%s7235_s4 + $0x10] sm:$0xff]  }
 0x178   : > { %v777_v44 = vpack.c.bf16 %v770_v40, %v769_v20  ;;  %v758_v45 = vmul.f32 %v4354_v26, %v744_v41 }
 0x179   : > { %v5157_v28 = vpop.eup %5156  ;;  %v759_v46 = vmul.f32 %v4354_v26, %v745_v43 }
 0x17a   : > { %v5159_v47 = vpop.eup %5158  ;;  %4732 = vmatprep.mubr.msk.bf16.mxu1 %vm643_vm0, %v777_v44  ;;  %4756 = vmatprep.mubr.msk.bf16.mxu0 %vm643_vm0, %v777_v44  ;;  %v772_v50 = vadd.f32 %v4355_v33, %v758_v45  ;;  %v746_v51 = vmul.f32 %v5157_v28, %v5719_v39  ;;  %v5851_v28 = vld [vmem:[%s7236_s5 + $0x1] ss:$0 sm:$0xff] }
 0x17b   : > { %v747_v52 = vmul.f32 %v5159_v47, %v5727_v48  ;;  %v773_v56 = vadd.f32 %v4355_v33, %v759_v46 }
 0x17c   : > { %v778_v53 = vpack.c.bf16 %v772_v50, %v771_v21  ;;  %v760_v29 = vmul.f32 %v4354_v26, %v746_v51 }
 0x17d   : > { %v5161_v55 = vpop.eup %5160  ;;  %v761_v59 = vmul.f32 %v4354_v26, %v747_v52 }
 0x17e   : > { %4733 = vmatmul.mubr.msk.bf16.vlgmr.msra.gmra.mxu1 %vm643_vm0, %v778_v53  ;;  %4757 = vmatmul.mubr.msk.bf16.vlgmr.msra.gmra.mxu0 %vm643_vm0, %v778_v53  ;;  %v774_v57 = vadd.f32 %v4355_v33, %v760_v29  ;;  %v748_v58 = vmul.f32 %v5161_v55, %v5729_v49 }
 0x17f   : > { %4741 = vmatpush3.bf16.msra.mxu1 %v5751_v60  ;;  %4781 = vmatpush3.bf16.msra.mxu0 %v5756_v61  ;;  %v775_v62 = vadd.f32 %v4355_v33, %v761_v59 }
 0x180   : > { %v779_v39 = vpack.c.bf16 %v774_v57, %v773_v56  ;;  %v762_v48 = vmul.f32 %v4354_v26, %v748_v58  ;;  %4742 = vmatprep.subr.bf16.mxu1 %v5112_v54  ;;  %4782 = vmatprep.subr.bf16.mxu0 %v5113_v38  ;;  %v5826_v26 = vand.u32 127, %v629_v15 }
 0x182   : > { %4736 = vmatprep.mubr.msk.bf16.mxu1 %vm643_vm0, %v779_v39  ;;  %4760 = vmatprep.mubr.msk.bf16.mxu0 %vm643_vm0, %v779_v39  ;;  %v776_v63 = vadd.f32 %v4355_v33, %v762_v48  ;;  %vm632_vm1 = vcmp.lt.s32.totalorder %v5826_v26, 16  ;;  %vm636_vm2 = vcmp.ge.s32.totalorder %v5826_v26, 16  ;;  %vm637_vm3 = vcmp.lt.s32.totalorder %v5826_v26, 32 }
 0x183   : > { %4743 = vmatpush3.bf16.msra.mxu1 %v5112_v54  ;;  %4783 = vmatpush3.bf16.msra.mxu0 %v5113_v38  ;;  %vm638_vm4 = vmand %vm636_vm2, %vm637_vm3 }
 0x184   : > { %v780_v0 = vpack.c.bf16 %v776_v63, %v775_v62 }
 0x186   : > { %4737 = vmatmul.mubr.msk.bf16.gmra.mxu1 %vm643_vm0, %v780_v0  ;;  %4761 = vmatmul.mubr.msk.bf16.gmra.mxu0 %vm643_vm0, %v780_v0 }
 0x187   : > { %4744 = vmatprep.mubr.msk.bf16.mxu1 %vm643_vm0, %v777_v44  ;;  %4784 = vmatprep.mubr.msk.bf16.mxu0 %vm643_vm0, %v777_v44  ;;  %v5509_v44 = vmov 0.0  }
 0x188   : > { %v5846_v45 = vsel %vm632_vm1, 1.0, %v5509_v44 }
 0x18e   : > { %4745 = vmatmul.mubr.msk.bf16.vlgmr.msra.gmra.mxu1 %vm643_vm0, %v778_v53  ;;  %4785 = vmatmul.mubr.msk.bf16.vlgmr.msra.gmra.mxu0 %vm643_vm0, %v778_v53 }
 0x18f   : > { %4748 = vmatprep.mubr.msk.bf16.mxu1 %vm643_vm0, %v779_v39  ;;  %4788 = vmatprep.mubr.msk.bf16.mxu0 %vm643_vm0, %v779_v39 }
 0x196   : > { %4749 = vmatmul.mubr.msk.bf16.gmra.mxu1 %vm643_vm0, %v780_v0  ;;  %4789 = vmatmul.mubr.msk.bf16.gmra.mxu0 %vm643_vm0, %v780_v0 }
 0x23e   : > { %v4734_v49 = vpop.f32.mrf.mxu1  ;;  %v5795_v60 = vpop.f32.mrf.mxu0 }
 0x23f   : > { %v859_v52 = vadd.f32 %v4734_v49, %v5817_v17 }
 0x240   : > { %v5797_v61 = vpop.f32.mrf.mxu1  ;;  %v1030_v1 = vpop.f32.mrf.mxu0 }
 0x241   : > { %v1031_v5 = vadd.f32 %v5802_v2, %v1030_v1 }
 0x242   : > { %v4735_v3 = vpop.f32.mrf.mxu1  ;;  %v5804_v4 = vpop.f32.mrf.mxu0 }
 0x243   : > { %v1061_v11 = vmul.f32 0.25, %v1031_v5  ;;  %v862_v43 = vadd.f32 %v4735_v3, %v5817_v17 }
 0x244   : > { %v5807_v6 = vpop.f32.mrf.mxu1  ;;  %v1033_v7 = vpop.f32.mrf.mxu0 }
 0x245   : > { %v1034_v8 = vadd.f32 %v5802_v2, %v1033_v7  ;;  %v970_v56 = vpack.c.bf16 %v862_v43, %v859_v52  ;;  %v854_v7 = vadd.f32 %v5817_v17, %v5807_v6 }
 0x246   : > { %v4738_v9 = vpop.f32.mrf.mxu1  ;;  %v5810_v10 = vpop.f32.mrf.mxu0 }
 0x247   : > { %v1062_v12 = vmul.f32 0.25, %v1034_v8  ;;  %v875_v22 = vadd.f32 %v4738_v9, %v5817_v17 }
 0x248   : > { %v866_v13 = vpop.f32.mrf.mxu1  ;;  %v5812_v14 = vpop.f32.mrf.mxu0 }
 0x249   : > { %v1069_v16 = vpack.c.bf16 %v1062_v12, %v1061_v11  ;;  %v867_v27 = vadd.f32 %v5817_v17, %v866_v13  ;;  %v851_v12 = vadd.f32 %v5817_v17, %v5797_v61  ;;  %v5904_v61 = vsel %vm638_vm4, 1.0, %v5509_v44 }
 0x24a   : > { %v4739_v18 = vpop.f32.mrf.mxu1  ;;  %v5819_v19 = vpop.f32.mrf.mxu0 }
 0x24b   : > { %v878_v23 = vadd.f32 %v4739_v18, %v5817_v17  ;;  %4772 = vmatprep.mubr.msk.bf16.mxu1 %vm643_vm0, %v1069_v16  ;;  %v969_v16 = vpack.c.bf16 %v854_v7, %v851_v12  ;;  %v1109_v18 = vsel %vm643_vm0, %v970_v56, 0 }
 0x24c   : > { %v869_v24 = vpop.f32.mrf.mxu1  ;;  %v5824_v25 = vpop.f32.mrf.mxu0 }
 0x24d   : > { %v972_v30 = vpack.c.bf16 %v878_v23, %v875_v22  ;;  %v870_v31 = vadd.f32 %v5817_v17, %v869_v24 }
 0x24e   : > { %v4746_v32 = vpop.f32.mrf.mxu1  ;;  %v5830_v33 = vpop.f32.mrf.mxu0 }
 0x24f   : > { %v971_v34 = vpack.c.bf16 %v870_v31, %v867_v27  ;;  %5048 = vmatprep.subr.msk.bf16.mxu1 %vm643_vm0, %v972_v30  ;;  %5052 = vmatprep.subr.msk.bf16.mxu0 %vm643_vm0, %v972_v30  ;;  %v1115_v37 = vsel %vm643_vm0, %v972_v30, 0  ;;  %v5842_v40 = vadd.f32 %v4746_v32, %v5835_v35  ;;  %v1042_v27 = vadd.f32 %v5804_v4, %v5802_v2 }
 0x250   : > { %v938_v36 = vpop.f32.mrf.mxu1  ;;  %v1334_v20 = vpop.f32.mrf.mxu0  ;;  %4765 = vmatpush3.bf16.xpose.msra.mxu1 %v1115_v37  ;;  %4793 = vmatpush3.bf16.xpose.msra.mxu0 %v1115_v37  ;;  %v1050_v31 = vadd.f32 %v5802_v2, %v5824_v25  ;;  %v1343_v4 = vadd.f32 %v5830_v33, %v5851_v28 }
 0x251   : > { %5049 = vmatprep.subr.msk.bf16.mxu1 %vm643_vm0, %v971_v34  ;;  %5053 = vmatprep.subr.msk.bf16.mxu0 %vm643_vm0, %v971_v34  ;;  %v5858_v47 = vadd.f32 %v5835_v35, %v938_v36  ;;  %v1335_v21 = vadd.f32 %v5851_v28, %v1334_v20  ;;  %v1075_v54 = vmul.f32 %v5846_v45, %v5842_v40  ;;  %v1112_v58 = vsel %vm643_vm0, %v971_v34, 0 }
 0x252   : > { %v4747_v41 = vpop.f32.mrf.mxu1  ;;  %v4787_v42 = vpop.f32.mrf.mxu0  ;;  %v1039_v34 = vadd.f32 %v5795_v60, %v5802_v2  ;;  %v1106_v36 = vsel %vm643_vm0, %v969_v16, 0  ;;  %v1047_v20 = vadd.f32 %v5802_v2, %v5812_v14  ;;  %v1058_v14 = vadd.f32 %v5819_v19, %v5802_v2 }
 0x253   : > { %v5855_v46 = vadd.f32 %v4747_v41, %v5835_v35  ;;  %v1073_v59 = vmul.f32 %v5846_v45, %v5858_v47  ;;  %v1365_v39 = vmul.f32 0.25, %v1335_v21  ;;  %v1346_v32 = vadd.f32 %v4787_v42, %v5851_v28 }
 0x254   : > { %v941_v50 = vpop.f32.mrf.mxu1  ;;  %v1337_v51 = vpop.f32.mrf.mxu0  ;;  %v1064_v41 = vmul.f32 0.25, %v1042_v27  ;;  %v1066_v42 = vmul.f32 0.25, %v1050_v31  ;;  %v1063_v60 = vmul.f32 0.25, %v1039_v34  ;;  %v1065_v21 = vmul.f32 0.25, %v1047_v20  ;;  %v4397_v31 = vld [vmem:[%s7259_s2 + $0x60] sm:$0xff] }
 0x255   : > { %v1076_v53 = vmul.f32 %v5846_v45, %v5855_v46  ;;  %v5865_v29 = vadd.f32 %v5835_v35, %v941_v50  ;;  %v1338_v38 = vadd.f32 %v5851_v28, %v1337_v51  ;;  %v1368_v43 = vmul.f32 0.25, %v1346_v32 }
 0x256   : > { %v4750_v55 = vpop.f32.mrf.mxu1  ;;  %v5877_v0 = vpop.f32.mrf.mxu0  ;;  %v1367_v50 = vmul.f32 0.25, %v1343_v4  ;;  %v1070_v52 = vpack.c.bf16 %v1064_v41, %v1063_v60  ;;  %v1071_v33 = vpack.c.bf16 %v1066_v42, %v1065_v21 }
 0x257   : > { %v1074_v57 = vmul.f32 %v5846_v45, %v5865_v29  ;;  %v1366_v48 = vmul.f32 0.25, %v1338_v38  ;;  %v5875_v63 = vpack.c.bf16 %v1076_v53, %v1075_v54  ;;  %v5901_v24 = vadd.f32 %v4750_v55, %v5835_v35 }
 0x258   : > { %v954_v62 = vpop.f32.mrf.mxu1  ;;  %4767 = vmatpush3.bf16.xpose.msra.mxu1 %v1112_v58  ;;  %4795 = vmatpush3.bf16.xpose.msra.mxu0 %v1112_v58  ;;  %v1350_v9 = vpop.f32.mrf.mxu0  ;;  %v1374_v54 = vpack.c.bf16 %v1368_v43, %v1367_v50  ;;  %v1380_v58 = vmul.f32 %v5904_v61, %v5855_v46  ;;  %v1378_v46 = vmul.f32 %v5904_v61, %v5865_v29  ;;  %v4400_v50 = vld [vmem:[%s7259_s2 + $0x78] sm:$0xff] }
 0x259   : > { %v1373_v49 = vpack.c.bf16 %v1366_v48, %v1365_v39  ;;  %5050 = vmatprep.subr.msk.bf16.mxu1 %vm643_vm0, %v970_v56  ;;  %v5880_v3 = vpack.c.bf16 %v1074_v57, %v1073_v59  ;;  %v955_v5 = vadd.f32 %v5835_v35, %v954_v62  ;;  %5054 = vmatprep.subr.msk.bf16.mxu0 %vm643_vm0, %v970_v56  ;;  %v1068_v39 = vmul.f32 0.25, %v1058_v14 }
 0x25a   : > { %v4751_v1 = vpop.f32.mrf.mxu1  ;;  %v4791_v22 = vpop.f32.mrf.mxu0  ;;  %v1383_v30 = vmul.f32 %v5904_v61, %v5901_v24  ;;  %v1351_v25 = vadd.f32 %v5851_v28, %v1350_v9  ;;  %v1055_v56 = vadd.f32 %v5810_v10, %v5802_v2  ;;  %v1359_v59 = vadd.f32 %v5877_v0, %v5851_v28  ;;  %v4393_v9 = vld [vmem:[%s7259_s2 + $0x40] sm:$0xff] }
 0x25b   : > { %4800 = vmatprep.mubr.msk.bf16.mxu0 %vm643_vm0, %v1373_v49  ;;  %v1077_v13 = vmul.f32 %v5846_v45, %v955_v5  ;;  %v5895_v6 = vadd.f32 %v4751_v1, %v5835_v35  ;;  %v1381_v38 = vmul.f32 %v5904_v61, %v955_v5  ;;  %v1362_v55 = vadd.f32 %v4791_v22, %v5851_v28 }
 0x25c   : > { %v957_v8 = vpop.f32.mrf.mxu1  ;;  %v1353_v26 = vpop.f32.mrf.mxu0  ;;  %v1369_v53 = vmul.f32 0.25, %v1351_v25  ;;  %v1379_v2 = vmul.f32 %v5904_v61, %v5842_v40  ;;  %v1067_v48 = vmul.f32 0.25, %v1055_v56  ;;  %v1371_v62 = vmul.f32 0.25, %v1359_v59  ;;  %v4398_v25 = vld [vmem:[%s7259_s2 + $0x68] sm:$0xff] }
 0x25d   : > { %v958_v11 = vadd.f32 %v5835_v35, %v957_v8  ;;  %v1384_v17 = vmul.f32 %v5904_v61, %v5895_v6  ;;  %v1354_v35 = vadd.f32 %v5851_v28, %v1353_v26  ;;  %v1372_v10 = vmul.f32 0.25, %v1362_v55  ;;  %v1086_v55 = vld [vmem:[%s7259_s2 + $0x8] sm:$0xff] }
 0x25e   : > { %v1386_v28 = vpack.c.bf16 %v1380_v58, %v1379_v2  ;;  %v1072_v0 = vpack.c.bf16 %v1068_v39, %v1067_v48  ;;  %v1377_v49 = vmul.f32 %v5904_v61, %v5858_v47  ;;  %v1080_v40 = vmul.f32 %v5846_v45, %v5895_v6  ;;  %v4394_v6 = vld [vmem:[%s7259_s2 + $0x48] sm:$0xff]  ;;  %v1088_v39 = vld [vmem:[%s7259_s2 + $0x18] sm:$0xff]  ;;  %v1089_v2 = vld [vmem:[%s7259_s2 + $0x20] sm:$0xff] }
 0x25f   : > { %v1078_v15 = vmul.f32 %v5846_v45, %v958_v11  ;;  %v1388_v37 = vpack.c.bf16 %v1384_v17, %v1383_v30  ;;  %v1370_v44 = vmul.f32 0.25, %v1354_v35  ;;  %v1382_v51 = vmul.f32 %v5904_v61, %v958_v11  ;;  %v4395_v11 = vld [vmem:[%s7259_s2 + $0x50] sm:$0xff]  ;;  %v4396_v17 = vld [vmem:[%s7259_s2 + $0x58] sm:$0xff] }
 0x260   : > { %4769 = vmatpush3.bf16.xpose.msra.mxu1 %v1109_v18  ;;  %4797 = vmatpush3.bf16.xpose.msra.mxu0 %v1109_v18  ;;  %v1376_v1 = vpack.c.bf16 %v1372_v10, %v1371_v62  ;;  %v1385_v5 = vpack.c.bf16 %v1378_v46, %v1377_v49  ;;  %v1079_v29 = vmul.f32 %v5846_v45, %v5901_v24 }
 0x261   : > { %v5898_v23 = vpack.c.bf16 %v1078_v15, %v1077_v13  ;;  %5051 = vmatprep.subr.msk.bf16.mxu1 %vm643_vm0, %v969_v16  ;;  %5055 = vmatprep.subr.msk.bf16.mxu0 %vm643_vm0, %v969_v16  ;;  %v1375_v57 = vpack.c.bf16 %v1370_v44, %v1369_v53  ;;  %v1387_v19 = vpack.c.bf16 %v1382_v51, %v1381_v38  ;;  %v1085_v44 = vld [vmem:[%s7259_s2] sm:$0xff]  ;;  %v1087_v38 = vld [vmem:[%s7259_s2 + $0x10] sm:$0xff] }
 0x262   : > { %v5952_v7 = vpack.c.bf16 %v1080_v40, %v1079_v29 }
 0x268   : > { %4771 = vmatpush3.bf16.xpose.msra.mxu1 %v1106_v36  ;;  %4799 = vmatpush3.bf16.xpose.msra.mxu0 %v1106_v36 }
 0x269   : > { %4808 = vmatprep.subr.bf16.mxu1 %v1388_v37 }
 0x26f   : > { %4773 = vmatmul.mubr.msk.bf16.vlgmr.msra.gmra.mxu1 %vm643_vm0, %v1070_v52  ;;  %4801 = vmatmul.mubr.msk.bf16.vlgmr.msra.gmra.mxu0 %vm643_vm0, %v1374_v54 }
 0x270   : > { %4776 = vmatprep.mubr.msk.bf16.mxu1 %vm643_vm0, %v1071_v33  ;;  %4804 = vmatprep.mubr.msk.bf16.mxu0 %vm643_vm0, %v1375_v57 }
 0x271   : > { %4809 = vmatpush3.bf16.msra.mxu1 %v1388_v37  ;;  %v4399_v37 = vld [vmem:[%s7259_s2 + $0x70] sm:$0xff] }
 0x272   : > { %4810 = vmatprep.subr.bf16.mxu1 %v1387_v19 }
 0x275   : > { %4811 = vmatpush3.bf16.msra.mxu1 %v1387_v19 }
 0x276   : > { %4812 = vmatprep.subr.bf16.mxu1 %v1386_v28 }
 0x277   : > { %4777 = vmatmul.mubr.msk.bf16.gmra.mxu1 %vm643_vm0, %v1072_v0  ;;  %4805 = vmatmul.mubr.msk.bf16.gmra.mxu0 %vm643_vm0, %v1376_v1  ;;  %v1091_v0 = vld [vmem:[%s7259_s2 + $0x30] sm:$0xff]  ;;  %v1090_v1 = vld [vmem:[%s7259_s2 + $0x28] sm:$0xff] }
 0x279   : > { %4813 = vmatpush3.bf16.msra.mxu1 %v1386_v28 }
 0x27a   : > { %4814 = vmatprep.subr.bf16.mxu1 %v1385_v5 }
 0x27d   : > { %4815 = vmatpush3.bf16.msra.mxu1 %v1385_v5 }
 0x27e   : > { %4824 = vmatprep.subr.bf16.mxu1 %v5952_v7 }
 0x32f   : > { %v4774_v47 = vpop.f32.mrf.mxu1  ;;  %v4802_v8 = vpop.f32.mrf.mxu0 }
 0x330   : > { %v5966_v18 = vadd.f32 %v4802_v8, %v4395_v11  ;;  %v6020_v57 = vadd.f32 %v4774_v47, %v1087_v38  ;;  %v1092_v8 = vld [vmem:[%s7259_s2 + $0x38] sm:$0xff] }
 0x331   : > { %v1151_v12 = vpop.f32.mrf.mxu1  ;;  %v1444_v13 = vpop.f32.mrf.mxu0 }
 0x332   : > { %v5961_v15 = vadd.f32 %v4393_v9, %v1444_v13  ;;  %v1481_v35 = vsel %vm1182_vm5, %v5966_v18, -inf  ;;  %v6006_v14 = vadd.f32 %v1151_v12, %v1085_v44  ;;  %v1189_v28 = vsel %vm1182_vm5, %v6020_v57, -inf }
 0x333   : > { %v4803_v16 = vpop.f32.mrf.mxu0  ;;  %v4775_v24 = vpop.f32.mrf.mxu1 }
 0x334   : > { %v1475_v22 = vsel %vm1182_vm5, %v5961_v15, -inf  ;;  %v5978_v32 = vadd.f32 %v4803_v16, %v4396_v17  ;;  %v1183_v19 = vsel %vm1182_vm5, %v6006_v14, -inf  ;;  %v6034_v48 = vadd.f32 %v4775_v24, %v1088_v39 }
 0x335   : > { %v1447_v26 = vpop.f32.mrf.mxu0  ;;  %1476 = vmax.xlane.f32.xlu0 %v1475_v22  ;;  %v1154_v36 = vpop.f32.mrf.mxu1 }
 0x336   : > { %v5973_v27 = vadd.f32 %v4394_v6, %v1447_v26  ;;  %v1484_v43 = vsel %vm1182_vm5, %v5978_v32, -inf  ;;  %v6022_v58 = vadd.f32 %v1154_v36, %v1086_v55  ;;  %v1192_v29 = vsel %vm1182_vm5, %v6034_v48, -inf }
 0x337   : > { %v4806_v30 = vpop.f32.mrf.mxu0  ;;  %v4778_v21 = vpop.f32.mrf.mxu1 }
 0x338   : > { %v1478_v34 = vsel %vm1182_vm5, %v5973_v27, -inf  ;;  %v5992_v42 = vadd.f32 %v4806_v30, %v4399_v37  ;;  %v1186_v62 = vsel %vm1182_vm5, %v6022_v58, -inf  ;;  %v6048_v40 = vadd.f32 %v4778_v21, %v1091_v0 }
 0x339   : > { %v1460_v20 = vpop.f32.mrf.mxu0  ;;  %1479 = vmax.xlane.f32.xlu1 %v1478_v34  ;;  %1482 = vmax.xlane.f32.xlu0 %v1481_v35  ;;  %v1167_v56 = vpop.f32.mrf.mxu1 }
 0x33a   : > { %v5987_v4 = vadd.f32 %v4397_v31, %v1460_v20  ;;  %v1493_v54 = vsel %vm1182_vm5, %v5992_v42, -inf  ;;  %v6036_v46 = vadd.f32 %v1167_v56, %v1089_v2  ;;  %v1201_v12 = vsel %vm1182_vm5, %v6048_v40, -inf }
 0x33b   : > { %v4807_v41 = vpop.f32.mrf.mxu0  ;;  %v4779_v10 = vpop.f32.mrf.mxu1 }
 0x33c   : > { %v1487_v60 = vsel %vm1182_vm5, %v5987_v4, -inf  ;;  %v6008_v53 = vadd.f32 %v4807_v41, %v4400_v50  ;;  %v1195_v47 = vsel %vm1182_vm5, %v6036_v46, -inf  ;;  %v6059_v9 = vadd.f32 %v4779_v10, %v1092_v8 }
 0x33d   : > { %v1463_v51 = vpop.f32.mrf.mxu0  ;;  %1485 = vmax.xlane.f32.xlu1 %v1484_v43  ;;  %1488 = vmax.xlane.f32.xlu0 %v1487_v60  ;;  %v1170_v49 = vpop.f32.mrf.mxu1 }
 0x33e   : > { %v6004_v52 = vadd.f32 %v4398_v25, %v1463_v51  ;;  %v1496_v59 = vsel %vm1182_vm5, %v6008_v53, -inf  ;;  %v6050_v5 = vadd.f32 %v1170_v49, %v1090_v1  ;;  %v1204_v13 = vsel %vm1182_vm5, %v6059_v9, -inf }
 0x340   : > { %v1490_v33 = vsel %vm1182_vm5, %v6004_v52, -inf  ;;  %v1198_v11 = vsel %vm1182_vm5, %v6050_v5, -inf }
 0x341   : > { %1491 = vmax.xlane.f32.xlu1 %v1490_v33  ;;  %1494 = vmax.xlane.f32.xlu0 %v1493_v54 }
 0x345   : > { %1497 = vmax.xlane.f32.xlu1 %v1496_v59  ;;  %1184 = vmax.xlane.f32.xlu0 %v1183_v19 }
 0x349   : > { %1187 = vmax.xlane.f32.xlu1 %v1186_v62  ;;  %1190 = vmax.xlane.f32.xlu0 %v1189_v28 }
 0x34d   : > { %1193 = vmax.xlane.f32.xlu1 %v1192_v29  ;;  %1196 = vmax.xlane.f32.xlu0 %v1195_v47 }
 0x351   : > { %1199 = vmax.xlane.f32.xlu1 %v1198_v11  ;;  %1202 = vmax.xlane.f32.xlu0 %v1201_v12 }
 0x355   : > { %1205 = vmax.xlane.f32.xlu1 %v1204_v13 }
 0x3be   : > { %v1477_v16 = vpop.xlane.xlu0 %1476 }
 0x3bf   : > { %v1499_v6 = vsub.f32 %v5961_v15, %v1477_v16 }
 0x3c1   : > { %v1507_v22 = vmul.f32 1.442695, %v1499_v6 }
 0x3c2   : > { %v1480_v24 = vpop.xlane.xlu1 %1479  ;;  %v1483_v17 = vpop.xlane.xlu0 %1482 }
 0x3c3   : > { %5162 = vpow2.f32 %v1507_v22  ;;  %v1500_v26 = vsub.f32 %v5973_v27, %v1480_v24  ;;  %v1501_v30 = vsub.f32 %v5966_v18, %v1483_v17 }
 0x3c5   : > { %v1509_v31 = vmul.f32 1.442695, %v1500_v26  ;;  %v1511_v34 = vmul.f32 1.442695, %v1501_v30 }
 0x3c6   : > { %v1486_v35 = vpop.xlane.xlu1 %1485  ;;  %v1489_v36 = vpop.xlane.xlu0 %1488 }
 0x3c7   : > { %5164 = vpow2.f32 %v1509_v31  ;;  %v1502_v37 = vsub.f32 %v5978_v32, %v1486_v35  ;;  %v1503_v20 = vsub.f32 %v5987_v4, %v1489_v36 }
 0x3c8   : > { %5166 = vpow2.f32 %v1511_v34 }
 0x3c9   : > { %v1513_v41 = vmul.f32 1.442695, %v1502_v37  ;;  %v1515_v15 = vmul.f32 1.442695, %v1503_v20 }
 0x3ca   : > { %v1492_v25 = vpop.xlane.xlu1 %1491  ;;  %v1495_v43 = vpop.xlane.xlu0 %1494 }
 0x3cb   : > { %5168 = vpow2.f32 %v1513_v41  ;;  %v1504_v60 = vsub.f32 %v6004_v52, %v1492_v25  ;;  %v1505_v27 = vsub.f32 %v5992_v42, %v1495_v43 }
 0x3cc   : > { %5170 = vpow2.f32 %v1515_v15 }
 0x3cd   : > { %v1517_v18 = vmul.f32 1.442695, %v1504_v60  ;;  %v1519_v44 = vmul.f32 1.442695, %v1505_v27 }
 0x3ce   : > { %v1498_v21 = vpop.xlane.xlu1 %1497  ;;  %v1185_v50 = vpop.xlane.xlu0 %1184 }
 0x3cf   : > { %5172 = vpow2.f32 %v1517_v18  ;;  %v1506_v32 = vsub.f32 %v6008_v53, %v1498_v21  ;;  %v1207_v4 = vsub.f32 %v6006_v14, %v1185_v50 }
 0x3d0   : > { %v6076_v51 = vpop.eup %5162  ;;  %5174 = vpow2.f32 %v1519_v44 }
 0x3d1   : > { %v1521_v33 = vmul.f32 1.442695, %v1506_v32  ;;  %v1215_v54 = vmul.f32 1.442695, %v1207_v4  ;;  %v1523_v52 = vsel %vm1182_vm5, %v6076_v51, 0.0 }
 0x3d2   : > { %v1188_v38 = vpop.xlane.xlu1 %1187  ;;  %1524 = vadd.xlane.f32.xlu0 %v1523_v52  ;;  %v1191_v42 = vpop.xlane.xlu0 %1190 }
 0x3d3   : > { %5176 = vpow2.f32 %v1521_v33  ;;  %v1208_v55 = vsub.f32 %v6022_v58, %v1188_v38  ;;  %v1209_v56 = vsub.f32 %v6020_v57, %v1191_v42 }
 0x3d4   : > { %v6082_v59 = vpop.eup %5164  ;;  %5178 = vpow2.f32 %v1215_v54 }
 0x3d5   : > { %v6084_v14 = vpop.eup %5166  ;;  %v1217_v53 = vmul.f32 1.442695, %v1208_v55  ;;  %v1219_v19 = vmul.f32 1.442695, %v1209_v56  ;;  %v1526_v39 = vsel %vm1182_vm5, %v6082_v59, 0.0 }
 0x3d6   : > { %1527 = vadd.xlane.f32.xlu1 %v1526_v39  ;;  %v1194_v2 = vpop.xlane.xlu1 %1193  ;;  %v1529_v10 = vsel %vm1182_vm5, %v6084_v14, 0.0  ;;  %v1197_v62 = vpop.xlane.xlu0 %1196 }
 0x3d7   : > { %5180 = vpow2.f32 %v1217_v53  ;;  %v1210_v58 = vsub.f32 %v6034_v48, %v1194_v2  ;;  %1530 = vadd.xlane.f32.xlu0 %v1529_v10  ;;  %v1211_v57 = vsub.f32 %v6036_v46, %v1197_v62 }
 0x3d8   : > { %v6092_v28 = vpop.eup %5168  ;;  %5182 = vpow2.f32 %v1219_v19 }
 0x3d9   : > { %v6094_v0 = vpop.eup %5170  ;;  %v1221_v49 = vmul.f32 1.442695, %v1210_v58  ;;  %v1223_v1 = vmul.f32 1.442695, %v1211_v57  ;;  %v1532_v29 = vsel %vm1182_vm5, %v6092_v28, 0.0 }
 0x3da   : > { %1533 = vadd.xlane.f32.xlu1 %v1532_v29  ;;  %v1200_v47 = vpop.xlane.xlu1 %1199  ;;  %v1535_v8 = vsel %vm1182_vm5, %v6094_v0, 0.0  ;;  %v1203_v11 = vpop.xlane.xlu0 %1202 }
 0x3db   : > { %5184 = vpow2.f32 %v1221_v49  ;;  %v1212_v48 = vsub.f32 %v6050_v5, %v1200_v47  ;;  %1536 = vadd.xlane.f32.xlu0 %v1535_v8  ;;  %v1213_v46 = vsub.f32 %v6048_v40, %v1203_v11 }
 0x3dc   : > { %v6102_v12 = vpop.eup %5172  ;;  %5186 = vpow2.f32 %v1223_v1 }
 0x3dd   : > { %v6104_v13 = vpop.eup %5174  ;;  %v1225_v16 = vmul.f32 1.442695, %v1212_v48  ;;  %v1227_v6 = vmul.f32 1.442695, %v1213_v46  ;;  %v1538_v22 = vsel %vm1182_vm5, %v6102_v12, 0.0 }
 0x3de   : > { %1539 = vadd.xlane.f32.xlu1 %v1538_v22  ;;  %v1206_v24 = vpop.xlane.xlu1 %1205  ;;  %v1541_v17 = vsel %vm1182_vm5, %v6104_v13, 0.0 }
 0x3df   : > { %5188 = vpow2.f32 %v1225_v16  ;;  %v1214_v5 = vsub.f32 %v6059_v9, %v1206_v24  ;;  %1542 = vadd.xlane.f32.xlu0 %v1541_v17 }
 0x3e0   : > { %v6111_v40 = vpop.eup %5176  ;;  %5190 = vpow2.f32 %v1227_v6 }
 0x3e1   : > { %v6113_v26 = vpop.eup %5178  ;;  %v1229_v30 = vmul.f32 1.442695, %v1214_v5  ;;  %v1544_v31 = vsel %vm1182_vm5, %v6111_v40, 0.0 }
 0x3e2   : > { %1545 = vadd.xlane.f32.xlu1 %v1544_v31  ;;  %v1231_v34 = vsel %vm1182_vm5, %v6113_v26, 0.0 }
 0x3e3   : > { %5192 = vpow2.f32 %v1229_v30  ;;  %1232 = vadd.xlane.f32.xlu0 %v1231_v34 }
 0x3e4   : > { %v6119_v35 = vpop.eup %5180 }
 0x3e5   : > { %v6121_v36 = vpop.eup %5182  ;;  %v1234_v9 = vsel %vm1182_vm5, %v6119_v35, 0.0 }
 0x3e6   : > { %1235 = vadd.xlane.f32.xlu1 %v1234_v9  ;;  %v1237_v37 = vsel %vm1182_vm5, %v6121_v36, 0.0 }
 0x3e7   : > { %1238 = vadd.xlane.f32.xlu0 %v1237_v37 }
 0x3e8   : > { %v6127_v20 = vpop.eup %5184 }
 0x3e9   : > { %v6129_v41 = vpop.eup %5186  ;;  %v1240_v15 = vsel %vm1182_vm5, %v6127_v20, 0.0 }
 0x3ea   : > { %1241 = vadd.xlane.f32.xlu1 %v1240_v15  ;;  %v1243_v25 = vsel %vm1182_vm5, %v6129_v41, 0.0 }
 0x3eb   : > { %1244 = vadd.xlane.f32.xlu0 %v1243_v25 }
 0x3ec   : > { %v6135_v43 = vpop.eup %5188 }
 0x3ed   : > { %v6137_v60 = vpop.eup %5190  ;;  %v1246_v27 = vsel %vm1182_vm5, %v6135_v43, 0.0 }
 0x3ee   : > { %1247 = vadd.xlane.f32.xlu1 %v1246_v27  ;;  %v1249_v18 = vsel %vm1182_vm5, %v6137_v60, 0.0 }
 0x3ef   : > { %1250 = vadd.xlane.f32.xlu0 %v1249_v18 }
 0x3f0   : > { %v6143_v44 = vpop.eup %5192 }
 0x3f1   : > { %v1252_v21 = vsel %vm1182_vm5, %v6143_v44, 0.0 }
 0x3f2   : > { %1253 = vadd.xlane.f32.xlu1 %v1252_v21  ;;  %v5115_v21 = vld [vmem:[#allocation4] sm:$0xff]  }
 0x45b   : > { %v1525_v50 = vpop.xlane.xlu0 %1524 }
 0x45c   : > { %5194 = vrcp.f32 %v1525_v50 }
 0x45f   : > { %v1528_v32 = vpop.xlane.xlu1 %1527 }
 0x460   : > { %5196 = vrcp.f32 %v1528_v32  ;;  %v1531_v4 = vpop.xlane.xlu0 %1530 }
 0x461   : > { %5198 = vrcp.f32 %v1531_v4 }
 0x463   : > { %v1534_v33 = vpop.xlane.xlu1 %1533 }
 0x464   : > { %5200 = vrcp.f32 %v1534_v33  ;;  %v1537_v54 = vpop.xlane.xlu0 %1536 }
 0x465   : > { %5202 = vrcp.f32 %v1537_v54 }
 0x467   : > { %v1540_v52 = vpop.xlane.xlu1 %1539 }
 0x468   : > { %5204 = vrcp.f32 %v1540_v52  ;;  %v1543_v38 = vpop.xlane.xlu0 %1542 }
 0x469   : > { %5206 = vrcp.f32 %v1543_v38  ;;  %v5195_v42 = vpop.eup %5194 }
 0x46a   : > { %v1548_v19 = vmul.f32 %v5195_v42, %v6076_v51 }
 0x46b   : > { %v1546_v55 = vpop.xlane.xlu1 %1545 }
 0x46c   : > { %5208 = vrcp.f32 %v1546_v55  ;;  %v1233_v56 = vpop.xlane.xlu0 %1232 }
 0x46d   : > { %v5197_v53 = vpop.eup %5196  ;;  %5210 = vrcp.f32 %v1233_v56 }
 0x46e   : > { %v1550_v39 = vmul.f32 %v5197_v53, %v6082_v59  ;;  %v5199_v2 = vpop.eup %5198 }
 0x46f   : > { %v1236_v10 = vpop.xlane.xlu1 %1235  ;;  %v1552_v49 = vmul.f32 %v5199_v2, %v6084_v14 }
 0x470   : > { %5212 = vrcp.f32 %v1236_v10  ;;  %v1239_v62 = vpop.xlane.xlu0 %1238  ;;  %v1563_v58 = vpack.c.bf16 %v1550_v39, %v1548_v19 }
 0x471   : > { %v5201_v57 = vpop.eup %5200  ;;  %5214 = vrcp.f32 %v1239_v62 }
 0x472   : > { %v1554_v1 = vmul.f32 %v5201_v57, %v6092_v28  ;;  %4816 = vmatprep.mubr.msk.bf16.mxu1 %vm1182_vm5, %v1563_v58  ;;  %v5203_v29 = vpop.eup %5202 }
 0x473   : > { %v1242_v47 = vpop.xlane.xlu1 %1241  ;;  %v1556_v59 = vmul.f32 %v5203_v29, %v6094_v0 }
 0x474   : > { %v1564_v8 = vpack.c.bf16 %v1554_v1, %v1552_v49  ;;  %5216 = vrcp.f32 %v1242_v47  ;;  %v1245_v51 = vpop.xlane.xlu0 %1244 }
 0x475   : > { %v5205_v11 = vpop.eup %5204  ;;  %5218 = vrcp.f32 %v1245_v51 }
 0x476   : > { %4817 = vmatmul.mubr.msk.bf16.vlgmr.msra.gmra.mxu1 %vm1182_vm5, %v1564_v8  ;;  %v1558_v48 = vmul.f32 %v5205_v11, %v6102_v12  ;;  %v5207_v46 = vpop.eup %5206 }
 0x477   : > { %4825 = vmatpush3.bf16.msra.mxu1 %v5952_v7  ;;  %v1248_v14 = vpop.xlane.xlu1 %1247  ;;  %v1560_v22 = vmul.f32 %v5207_v46, %v6104_v13 }
 0x478   : > { %5220 = vrcp.f32 %v1248_v14  ;;  %4826 = vmatprep.subr.bf16.mxu1 %v5898_v23  ;;  %v1251_v28 = vpop.xlane.xlu0 %1250  ;;  %v1565_v16 = vpack.c.bf16 %v1558_v48, %v1556_v59  ;;  %v4413_v59 = vld [vmem:[%s7242_s11] ss:$0 sm:$0xff] }
 0x479   : > { %v5209_v6 = vpop.eup %5208  ;;  %5222 = vrcp.f32 %v1251_v28 }
 0x47a   : > { %4820 = vmatprep.mubr.msk.bf16.mxu1 %vm1182_vm5, %v1565_v16  ;;  %v1562_v24 = vmul.f32 %v5209_v6, %v6111_v40  ;;  %v5211_v0 = vpop.eup %5210  ;;  %v5402_v16 = vld [vmem:[%s5681_s23] sm:$0xff] }
 0x47b   : > { %4827 = vmatpush3.bf16.msra.mxu1 %v5898_v23  ;;  %v1254_v12 = vpop.xlane.xlu1 %1253  ;;  %v1256_v5 = vmul.f32 %v5211_v0, %v6113_v26  ;;  %v5403_v0 = vld [vmem:[%s5681_s23 + $0x10] sm:$0xff] }
 0x47c   : > { %5224 = vrcp.f32 %v1254_v12  ;;  %4828 = vmatprep.subr.bf16.mxu1 %v5875_v63  ;;  %v1566_v7 = vpack.c.bf16 %v1562_v24, %v1560_v22 }
 0x47d   : > { %v5213_v17 = vpop.eup %5212 }
 0x47e   : > { %4821 = vmatmul.mubr.msk.bf16.gmra.mxu1 %vm1182_vm5, %v1566_v7  ;;  %v1258_v30 = vmul.f32 %v5213_v17, %v6119_v35  ;;  %v5215_v31 = vpop.eup %5214 }
 0x47f   : > { %4829 = vmatpush3.bf16.msra.mxu1 %v5875_v63  ;;  %v1260_v23 = vmul.f32 %v5215_v31, %v6121_v36 }
 0x480   : > { %4830 = vmatprep.subr.bf16.mxu1 %v5880_v3  ;;  %v1271_v13 = vpack.c.bf16 %v1258_v30, %v1256_v5  ;;  %v5404_v30 = vld [vmem:[%s5681_s23 + $0x8] sm:$0xff] }
 0x481   : > { %v5217_v40 = vpop.eup %5216 }
 0x482   : > { %v1262_v34 = vmul.f32 %v5217_v40, %v6127_v20  ;;  %4832 = vmatprep.mubr.msk.bf16.mxu1 %vm1182_vm5, %v1271_v13  ;;  %v5219_v9 = vpop.eup %5218  ;;  %v5405_v13 = vld [vmem:[%s5681_s23 + $0x18] sm:$0xff] }
 0x483   : > { %4831 = vmatpush3.bf16.msra.mxu1 %v5880_v3  ;;  %v1264_v35 = vmul.f32 %v5219_v9, %v6129_v41  ;;  %v5114_v3 = vld [vmem:[#allocation4 + $0x8] sm:$0xff]  }
 0x484   : > { %v1272_v37 = vpack.c.bf16 %v1262_v34, %v1260_v23  ;;  %4840 = vmatprep.subr.bf16.mxu0 %v5114_v3 }
 0x485   : > { %v5221_v26 = vpop.eup %5220  ;;  %4841 = vmatpush3.bf16.msra.mxu0 %v5114_v3 }
 0x486   : > { %4833 = vmatmul.mubr.msk.bf16.vlgmr.msra.gmra.mxu1 %vm1182_vm5, %v1272_v37  ;;  %v1266_v63 = vmul.f32 %v5221_v26, %v6135_v43  ;;  %v5223_v15 = vpop.eup %5222  ;;  %4842 = vmatprep.subr.bf16.mxu0 %v5115_v21 }
 0x487   : > { %v1268_v36 = vmul.f32 %v5223_v15, %v6137_v60 }
 0x488   : > { %v1273_v25 = vpack.c.bf16 %v1266_v63, %v1264_v35  ;;  %v5406_v63 = vld [vmem:[%s5681_s23 + $0x20] sm:$0xff] }
 0x489   : > { %v5225_v27 = vpop.eup %5224  ;;  %4843 = vmatpush3.bf16.msra.mxu0 %v5115_v21 }
 0x48a   : > { %4836 = vmatprep.mubr.msk.bf16.mxu1 %vm1182_vm5, %v1273_v25  ;;  %v1270_v20 = vmul.f32 %v5225_v27, %v6143_v44 }
 0x48c   : > { %v1274_v18 = vpack.c.bf16 %v1270_v20, %v1268_v36  ;;  %v5407_v36 = vld [vmem:[%s5681_s23 + $0x30] sm:$0xff] }
 0x48e   : > { %4837 = vmatmul.mubr.msk.bf16.gmra.mxu1 %vm1182_vm5, %v1274_v18 }
 0x536   : > { %v4818_v41 = vpop.f32.mrf.mxu1 }
 0x538   : > { %v1613_v43 = vpop.f32.mrf.mxu1 }
 0x53a   : > { %v4819_v50 = vpop.f32.mrf.mxu1 }
 0x53c   : > { %v1616_v32 = vpop.f32.mrf.mxu1 }
 0x53e   : > { %v4822_v4 = vpop.f32.mrf.mxu1 }
 0x540   : > { %v1629_v33 = vpop.f32.mrf.mxu1 }
 0x542   : > { %v4823_v54 = vpop.f32.mrf.mxu1 }
 0x544   : > { %v1632_v52 = vpop.f32.mrf.mxu1 }
 0x546   : > { %v4834_v60 = vpop.f32.mrf.mxu1 }
 0x547   : > { %v1699_v19 = vadd.f32 %v4834_v60, %v4818_v41  ;;  %v5408_v41 = vld [vmem:[%s5681_s23 + $0x28] sm:$0xff] }
 0x548   : > { %v1690_v38 = vpop.f32.mrf.mxu1 }
 0x549   : > { %v1691_v56 = vadd.f32 %v1690_v38, %v1613_v43 }
 0x54a   : > { %v4835_v44 = vpop.f32.mrf.mxu1 }
 0x54b   : > { %v1702_v42 = vadd.f32 %v4835_v44, %v4819_v50  ;;  %v5409_v50 = vld [vmem:[%s5681_s23 + $0x38] sm:$0xff] }
 0x54c   : > { %v1693_v55 = vpop.f32.mrf.mxu1 }
 0x54d   : > { %v1694_v53 = vadd.f32 %v1693_v55, %v1616_v32  ;;  %v1722_v10 = vpack.c.bf16 %v1702_v42, %v1699_v19 }
 0x54e   : > { %v4838_v39 = vpop.f32.mrf.mxu1 }
 0x54f   : > { %v1721_v2 = vpack.c.bf16 %v1694_v53, %v1691_v56  ;;  %v1715_v47 = vadd.f32 %v4838_v39, %v4822_v4 }
 0x550   : > { %v1706_v62 = vpop.f32.mrf.mxu1 }
 0x551   : > { %4844 = vmatprep.mubr.msk.bf16.mxu0 %vm643_vm0, %v1721_v2  ;;  %v1707_v1 = vadd.f32 %v1706_v62, %v1629_v33 }
 0x552   : > { %v4839_v58 = vpop.f32.mrf.mxu1  ;;  %4845 = vmatmul.mubr.msk.bf16.vlgmr.msra.gmra.mxu0 %vm643_vm0, %v1722_v10 }
 0x553   : > { %v1718_v57 = vadd.f32 %v4839_v58, %v4823_v54 }
 0x554   : > { %v1709_v49 = vpop.f32.mrf.mxu1 }
 0x555   : > { %v1710_v29 = vadd.f32 %v1709_v49, %v1632_v52  ;;  %v1724_v51 = vpack.c.bf16 %v1718_v57, %v1715_v47 }
 0x557   : > { %v1723_v8 = vpack.c.bf16 %v1710_v29, %v1707_v1 }
 0x559   : > { %4848 = vmatprep.mubr.msk.bf16.mxu0 %vm643_vm0, %v1723_v8 }
 0x55a   : > { %4849 = vmatmul.mubr.msk.bf16.gmra.mxu0 %vm643_vm0, %v1724_v51 }
 0x612   : > { %v4846_v11 = vpop.f32.mrf.mxu0 }
 0x613   : > { %v1803_v46 = vadd.f32 %v4846_v11, %v4413_v59 }
 0x614   : > { %v1794_v48 = vpop.f32.mrf.mxu0 }
 0x615   : > { %v1795_v14 = vadd.f32 %v4413_v59, %v1794_v48  ;;  %v6189_v12 = vadd.f32 %v5403_v0, %v1803_v46 }
 0x616   : > { %v4847_v28 = vpop.f32.mrf.mxu0 }
 0x617   : > { %v6186_v6 = vadd.f32 %v5402_v16, %v1795_v14  ;;  %v1806_v22 = vadd.f32 %v4847_v28, %v4413_v59  ;;  %v1841_v26 = vsel %vm643_vm0, %v6189_v12, 0.0 }
 0x618   : > { %v1797_v24 = vpop.f32.mrf.mxu0 }
 0x619   : > { %v1798_v7 = vadd.f32 %v4413_v59, %v1797_v24  ;;  %v1835_v17 = vsel %vm643_vm0, %v6186_v6, 0.0  ;;  %v6197_v40 = vadd.f32 %v5405_v13, %v1806_v22 }
 0x61a   : > { %1836 = vadd.xlane.f32.xlu0 %v1835_v17  ;;  %v4850_v5 = vpop.f32.mrf.mxu0 }
 0x61b   : > { %v6194_v31 = vadd.f32 %v5404_v30, %v1798_v7  ;;  %v1819_v34 = vadd.f32 %v4850_v5, %v4413_v59  ;;  %v1844_v27 = vsel %vm643_vm0, %v6197_v40, 0.0 }
 0x61c   : > { %v1810_v23 = vpop.f32.mrf.mxu0 }
 0x61d   : > { %v1811_v9 = vadd.f32 %v4413_v59, %v1810_v23  ;;  %v1838_v37 = vsel %vm643_vm0, %v6194_v31, 0.0  ;;  %v6209_v20 = vadd.f32 %v5407_v36, %v1819_v34 }
 0x61e   : > { %1839 = vadd.xlane.f32.xlu1 %v1838_v37  ;;  %1842 = vadd.xlane.f32.xlu0 %v1841_v26  ;;  %v4851_v35 = vpop.f32.mrf.mxu0  ;;  %v5116_v26 = vld [vmem:[#allocation6 + $0x8] sm:$0xff]  }
 0x61f   : > { %v6204_v15 = vadd.f32 %v5406_v63, %v1811_v9  ;;  %v1822_v18 = vadd.f32 %v4851_v35, %v4413_v59  ;;  %v1853_v33 = vsel %vm643_vm0, %v6209_v20, 0.0  ;;  %4852 = vmatprep.subr.bf16.mxu1 %v5116_v26  ;;  %v5117_v35 = vld [vmem:[#allocation6] sm:$0xff]  }
 0x620   : > { %v1813_v25 = vpop.f32.mrf.mxu0  ;;  %4853 = vmatpush3.bf16.msra.mxu1 %v5116_v26 }
 0x621   : > { %v1814_v3 = vadd.f32 %v4413_v59, %v1813_v25  ;;  %v1847_v21 = vsel %vm643_vm0, %v6204_v15, 0.0  ;;  %v6217_v32 = vadd.f32 %v5409_v50, %v1822_v18  ;;  %4854 = vmatprep.subr.bf16.mxu1 %v5117_v35 }
 0x622   : > { %1845 = vadd.xlane.f32.xlu1 %v1844_v27  ;;  %1848 = vadd.xlane.f32.xlu0 %v1847_v21 }
 0x623   : > { %v6214_v43 = vadd.f32 %v5408_v41, %v1814_v3  ;;  %v1856_v54 = vsel %vm643_vm0, %v6217_v32, 0.0 }
 0x624   : > { %4855 = vmatpush3.bf16.msra.mxu1 %v5117_v35 }
 0x625   : > { %v1850_v4 = vsel %vm643_vm0, %v6214_v43, 0.0 }
 0x626   : > { %1851 = vadd.xlane.f32.xlu1 %v1850_v4  ;;  %1854 = vadd.xlane.f32.xlu0 %v1853_v33 }
 0x62a   : > { %1857 = vadd.xlane.f32.xlu1 %v1856_v54 }
 0x6a3   : > { %v1837_v52 = vpop.xlane.xlu0 %1836 }
 0x6a4   : > { %v1859_v60 = vmul.f32 0.03125, %v1837_v52 }
 0x6a6   : > { %v6226_v38 = vsub.f32 %v6186_v6, %v1859_v60 }
 0x6a7   : > { %v1840_v44 = vpop.xlane.xlu1 %1839  ;;  %v1843_v42 = vpop.xlane.xlu0 %1842 }
 0x6a8   : > { %v1860_v55 = vmul.f32 0.03125, %v1840_v44  ;;  %v1861_v56 = vmul.f32 0.03125, %v1843_v42  ;;  %v1875_v53 = vmul.f32 %v6226_v38, %v6226_v38 }
 0x6aa   : > { %v6231_v19 = vsub.f32 %v6194_v31, %v1860_v55  ;;  %v6234_v39 = vsub.f32 %v6189_v12, %v1861_v56  ;;  %v1883_v2 = vsel %vm643_vm0, %v1875_v53, 0.0 }
 0x6ab   : > { %v1846_v10 = vpop.xlane.xlu1 %1845  ;;  %1884 = vadd.xlane.f32.xlu0 %v1883_v2  ;;  %v1849_v62 = vpop.xlane.xlu0 %1848 }
 0x6ac   : > { %v1862_v58 = vmul.f32 0.03125, %v1846_v10  ;;  %v1863_v57 = vmul.f32 0.03125, %v1849_v62  ;;  %v1876_v49 = vmul.f32 %v6231_v19, %v6231_v19  ;;  %v1877_v1 = vmul.f32 %v6234_v39, %v6234_v39 }
 0x6ae   : > { %v6242_v29 = vsub.f32 %v6197_v40, %v1862_v58  ;;  %v6245_v47 = vsub.f32 %v6204_v15, %v1863_v57  ;;  %v1886_v8 = vsel %vm643_vm0, %v1876_v49, 0.0  ;;  %v1889_v51 = vsel %vm643_vm0, %v1877_v1, 0.0 }
 0x6af   : > { %1887 = vadd.xlane.f32.xlu1 %v1886_v8  ;;  %v1852_v11 = vpop.xlane.xlu1 %1851  ;;  %1890 = vadd.xlane.f32.xlu0 %v1889_v51  ;;  %v1855_v59 = vpop.xlane.xlu0 %1854  ;;  %v4420_v8 = vld [vmem:[%s7243_s12] ss:$0 sm:$0xff] }
 0x6b0   : > { %v1864_v48 = vmul.f32 0.03125, %v1852_v11  ;;  %v1865_v46 = vmul.f32 0.03125, %v1855_v59  ;;  %v1878_v14 = vmul.f32 %v6242_v29, %v6242_v29  ;;  %v1879_v28 = vmul.f32 %v6245_v47, %v6245_v47 }
 0x6b2   : > { %v6254_v16 = vsub.f32 %v6214_v43, %v1864_v48  ;;  %v6257_v22 = vsub.f32 %v6209_v20, %v1865_v46  ;;  %v1892_v24 = vsel %vm643_vm0, %v1878_v14, 0.0  ;;  %v1895_v0 = vsel %vm643_vm0, %v1879_v28, 0.0  ;;  %v4421_v14 = vld [vmem:[%s7244_s13] ss:$0 sm:$0xff] }
 0x6b3   : > { %1893 = vadd.xlane.f32.xlu1 %v1892_v24  ;;  %v1858_v7 = vpop.xlane.xlu1 %1857  ;;  %1896 = vadd.xlane.f32.xlu0 %v1895_v0 }
 0x6b4   : > { %v1866_v17 = vmul.f32 0.03125, %v1858_v7  ;;  %v1880_v5 = vmul.f32 %v6254_v16, %v6254_v16  ;;  %v1881_v30 = vmul.f32 %v6257_v22, %v6257_v22 }
 0x6b6   : > { %v6266_v13 = vsub.f32 %v6217_v32, %v1866_v17  ;;  %v1898_v23 = vsel %vm643_vm0, %v1880_v5, 0.0  ;;  %v1901_v34 = vsel %vm643_vm0, %v1881_v30, 0.0 }
 0x6b7   : > { %1899 = vadd.xlane.f32.xlu1 %v1898_v23  ;;  %1902 = vadd.xlane.f32.xlu0 %v1901_v34 }
 0x6b8   : > { %v1882_v9 = vmul.f32 %v6266_v13, %v6266_v13 }
 0x6ba   : > { %v1904_v37 = vsel %vm643_vm0, %v1882_v9, 0.0 }
 0x6bb   : > { %1905 = vadd.xlane.f32.xlu1 %v1904_v37 }
 0x734   : > { %v1885_v63 = vpop.xlane.xlu0 %1884 }
 0x735   : > { %v1907_v25 = vmul.f32 0.03125, %v1885_v63 }
 0x737   : > { %v1915_v27 = vadd.f32 1e-05, %v1907_v25 }
 0x738   : > { %v1888_v36 = vpop.xlane.xlu1 %1887  ;;  %v1891_v18 = vpop.xlane.xlu0 %1890 }
 0x739   : > { %5226 = vrsqrt.f32 %v1915_v27  ;;  %v1908_v3 = vmul.f32 0.03125, %v1888_v36  ;;  %v1909_v21 = vmul.f32 0.03125, %v1891_v18 }
 0x73b   : > { %v1916_v41 = vadd.f32 1e-05, %v1908_v3  ;;  %v1917_v50 = vadd.f32 1e-05, %v1909_v21 }
 0x73c   : > { %v1894_v4 = vpop.xlane.xlu1 %1893  ;;  %v1897_v33 = vpop.xlane.xlu0 %1896 }
 0x73d   : > { %5228 = vrsqrt.f32 %v1916_v41  ;;  %v1910_v54 = vmul.f32 0.03125, %v1894_v4  ;;  %v1911_v52 = vmul.f32 0.03125, %v1897_v33  ;;  %v5120_v33 = vld [vmem:[%s7247_s16 + $0x28] sm:$0xff]  }
 0x73e   : > { %5230 = vrsqrt.f32 %v1917_v50 }
 0x73f   : > { %v1918_v60 = vadd.f32 1e-05, %v1910_v54  ;;  %v1919_v44 = vadd.f32 1e-05, %v1911_v52  ;;  %v5121_v54 = vld [vmem:[%s7247_s16 + $0x20] sm:$0xff]   ;;  %v5122_v52 = vld [vmem:[%s7247_s16 + $0x18] sm:$0xff]  }
 0x740   : > { %v1900_v42 = vpop.xlane.xlu1 %1899  ;;  %v1903_v55 = vpop.xlane.xlu0 %1902 }
 0x741   : > { %5232 = vrsqrt.f32 %v1918_v60  ;;  %v1912_v56 = vmul.f32 0.03125, %v1900_v42  ;;  %v1913_v53 = vmul.f32 0.03125, %v1903_v55  ;;  %v5123_v60 = vld [vmem:[%s7247_s16 + $0x10] sm:$0xff]   ;;  %v5125_v42 = vld [vmem:[%s7247_s16] sm:$0xff]  }
 0x742   : > { %5234 = vrsqrt.f32 %v1919_v44  ;;  %v5124_v44 = vld [vmem:[%s7247_s16 + $0x8] sm:$0xff]   ;;  %v4422_v55 = vld [vmem:[%s7246_s15] ss:$0 sm:$0xff] }
 0x743   : > { %v1920_v2 = vadd.f32 1e-05, %v1912_v56  ;;  %v1921_v10 = vadd.f32 1e-05, %v1913_v53 }
 0x744   : > { %v1906_v62 = vpop.xlane.xlu1 %1905 }
 0x745   : > { %5236 = vrsqrt.f32 %v1920_v2  ;;  %v1914_v58 = vmul.f32 0.03125, %v1906_v62 }
 0x746   : > { %v5227_v57 = vpop.eup %5226  ;;  %5238 = vrsqrt.f32 %v1921_v10 }
 0x747   : > { %v1922_v49 = vadd.f32 1e-05, %v1914_v58  ;;  %v1931_v1 = vmul.f32 %v5227_v57, %v6226_v38 }
 0x749   : > { %5240 = vrsqrt.f32 %v1922_v49  ;;  %v1945_v48 = vmul.f32 %v4420_v8, %v1931_v1 }
 0x74a   : > { %v5229_v51 = vpop.eup %5228 }
 0x74b   : > { %v5231_v11 = vpop.eup %5230  ;;  %v1932_v59 = vmul.f32 %v5229_v51, %v6231_v19  ;;  %v1959_v17 = vadd.f32 %v4421_v14, %v1945_v48 }
 0x74c   : > { %v1933_v46 = vmul.f32 %v5231_v11, %v6234_v39 }
 0x74d   : > { %v1946_v28 = vmul.f32 %v4420_v8, %v1932_v59 }
 0x74e   : > { %v5233_v24 = vpop.eup %5232  ;;  %v1947_v38 = vmul.f32 %v4420_v8, %v1933_v46 }
 0x74f   : > { %v5235_v0 = vpop.eup %5234  ;;  %v1934_v7 = vmul.f32 %v5233_v24, %v6242_v29  ;;  %v1960_v5 = vadd.f32 %v4421_v14, %v1946_v28 }
 0x750   : > { %v1935_v30 = vmul.f32 %v5235_v0, %v6245_v47  ;;  %v1961_v39 = vadd.f32 %v4421_v14, %v1947_v38 }
 0x751   : > { %v1948_v23 = vmul.f32 %v4420_v8, %v1934_v7  ;;  %v1967_v34 = vpack.c.bf16 %v1960_v5, %v1959_v17 }
 0x752   : > { %v5237_v19 = vpop.eup %5236  ;;  %v1949_v35 = vmul.f32 %v4420_v8, %v1935_v30 }
 0x753   : > { %v5239_v9 = vpop.eup %5238  ;;  %4856 = vmatprep.mubr.msk.bf16.mxu1 %vm643_vm0, %v1967_v34  ;;  %v1962_v37 = vadd.f32 %v4421_v14, %v1948_v23  ;;  %v1936_v26 = vmul.f32 %v5237_v19, %v6254_v16 }
 0x754   : > { %v1937_v63 = vmul.f32 %v5239_v9, %v6257_v22  ;;  %v1963_v36 = vadd.f32 %v4421_v14, %v1949_v35  ;;  %v5118_v22 = vld [vmem:[%s7247_s16 + $0x38] sm:$0xff]  }
 0x755   : > { %v1968_v25 = vpack.c.bf16 %v1962_v37, %v1961_v39  ;;  %v1950_v27 = vmul.f32 %v4420_v8, %v1936_v26  ;;  %4864 = vmatprep.subr.bf16.mxu0 %v5118_v22 }
 0x756   : > { %v5241_v29 = vpop.eup %5240  ;;  %v1951_v3 = vmul.f32 %v4420_v8, %v1937_v63  ;;  %4865 = vmatpush3.bf16.msra.mxu0 %v5118_v22 }
 0x757   : > { %4857 = vmatmul.mubr.msk.bf16.vlgmr.msra.gmra.mxu1 %vm643_vm0, %v1968_v25  ;;  %v1964_v47 = vadd.f32 %v4421_v14, %v1950_v27  ;;  %v1938_v18 = vmul.f32 %v5241_v29, %v6266_v13  ;;  %v5119_v13 = vld [vmem:[%s7247_s16 + $0x30] sm:$0xff]  }
 0x758   : > { %v1965_v50 = vadd.f32 %v4421_v14, %v1951_v3  ;;  %4866 = vmatprep.subr.bf16.mxu0 %v5119_v13 }
 0x759   : > { %v1969_v21 = vpack.c.bf16 %v1964_v47, %v1963_v36  ;;  %v1952_v41 = vmul.f32 %v4420_v8, %v1938_v18 }
 0x75a   : > { %4867 = vmatpush3.bf16.msra.mxu0 %v5119_v13 }
 0x75b   : > { %4860 = vmatprep.mubr.msk.bf16.mxu1 %vm643_vm0, %v1969_v21  ;;  %v1966_v4 = vadd.f32 %v4421_v14, %v1952_v41  ;;  %4868 = vmatprep.subr.bf16.mxu0 %v5120_v33 }
 0x75d   : > { %v1970_v16 = vpack.c.bf16 %v1966_v4, %v1965_v50 }
 0x75e   : > { %4869 = vmatpush3.bf16.msra.mxu0 %v5120_v33 }
 0x75f   : > { %4861 = vmatmul.mubr.msk.bf16.gmra.mxu1 %vm643_vm0, %v1970_v16  ;;  %4870 = vmatprep.subr.bf16.mxu0 %v5121_v54 }
 0x762   : > { %4871 = vmatpush3.bf16.msra.mxu0 %v5121_v54 }
 0x763   : > { %4872 = vmatprep.subr.bf16.mxu0 %v5122_v52 }
 0x766   : > { %4873 = vmatpush3.bf16.msra.mxu0 %v5122_v52 }
 0x767   : > { %4874 = vmatprep.subr.bf16.mxu0 %v5123_v60 }
 0x76a   : > { %4875 = vmatpush3.bf16.msra.mxu0 %v5123_v60 }
 0x76b   : > { %4876 = vmatprep.subr.bf16.mxu0 %v5124_v44 }
 0x76e   : > { %4877 = vmatpush3.bf16.msra.mxu0 %v5124_v44 }
 0x76f   : > { %4878 = vmatprep.subr.bf16.mxu0 %v5125_v42 }
 0x772   : > { %4879 = vmatpush3.bf16.msra.mxu0 %v5125_v42 }
 0x817   : > { %v4858_v56 = vpop.f32.mrf.mxu1 }
 0x818   : > { %v6318_v53 = vadd.f32 %v4858_v56, %v4422_v55 }
 0x819   : > { %v2040_v2 = vpop.f32.mrf.mxu1 }
 0x81a   : > { %v6321_v10 = vmul.f32 0.70710677, %v6318_v53  ;;  %v6323_v62 = vadd.f32 %v4422_v55, %v2040_v2 }
 0x81b   : > { %v4859_v58 = vpop.f32.mrf.mxu1 }
 0x81c   : > { %v2089_v57 = vand.u32 2147483647, %v6321_v10  ;;  %v6327_v49 = vmul.f32 0.70710677, %v6323_v62  ;;  %v6329_v1 = vadd.f32 %v4859_v58, %v4422_v55  ;;  %vm2249_vm6 = vcmp.ge.f32.partialorder %v6321_v10, 0.0 }
 0x81d   : > { %v2043_v8 = vpop.f32.mrf.mxu1 }
 0x81e   : > { %v2097_v51 = vmul.f32 0.3275911, %v2089_v57  ;;  %v2087_v11 = vand.u32 2147483647, %v6327_v49  ;;  %v6333_v59 = vmul.f32 0.70710677, %v6329_v1  ;;  %v6335_v48 = vadd.f32 %v4422_v55, %v2043_v8 }
 0x81f   : > { %v4862_v46 = vpop.f32.mrf.mxu1  ;;  %v2201_v37 = vmul.f32 %v2089_v57, %v2089_v57  ;;  %vm2247_vm7 = vcmp.ge.f32.partialorder %v6327_v49, 0.0 }
 0x820   : > { %v2105_v14 = vadd.f32 1.0, %v2097_v51  ;;  %v2095_v28 = vmul.f32 0.3275911, %v2087_v11  ;;  %v2090_v24 = vand.u32 2147483647, %v6333_v59  ;;  %v6342_v23 = vadd.f32 %v4862_v46, %v4422_v55 }
 0x821   : > { %v6339_v0 = vmul.f32 0.70710677, %v6335_v48  ;;  %v2056_v38 = vpop.f32.mrf.mxu1  ;;  %v2199_v27 = vmul.f32 %v2087_v11, %v2087_v11  ;;  %v2209_v18 = vsub.f32 0.0, %v2201_v37  ;;  %vm2250_vm8 = vcmp.ge.f32.partialorder %v6333_v59, 0.0 }
 0x822   : > { %5242 = vrcp.f32 %v2105_v14  ;;  %v2103_v7 = vadd.f32 1.0, %v2095_v28  ;;  %v2098_v17 = vmul.f32 0.3275911, %v2090_v24  ;;  %v6344_v34 = vadd.f32 %v4422_v55, %v2056_v38 }
 0x823   : > { %v2088_v5 = vand.u32 2147483647, %v6339_v0  ;;  %v4863_v30 = vpop.f32.mrf.mxu1  ;;  %v6347_v39 = vmul.f32 0.70710677, %v6342_v23  ;;  %v2207_v50 = vsub.f32 0.0, %v2199_v27  ;;  %v2202_v4 = vmul.f32 %v2090_v24, %v2090_v24 }
 0x824   : > { %5244 = vrcp.f32 %v2103_v7  ;;  %v2106_v19 = vadd.f32 1.0, %v2098_v17  ;;  %v6351_v25 = vmul.f32 0.70710677, %v6344_v34  ;;  %v6353_v29 = vadd.f32 %v4863_v30, %v4422_v55 }
 0x825   : > { %v2096_v9 = vmul.f32 0.3275911, %v2088_v5  ;;  %v2059_v35 = vpop.f32.mrf.mxu1  ;;  %v2093_v63 = vand.u32 2147483647, %v6347_v39  ;;  %v2219_v54 = vmul.f32 1.442695, %v2209_v18  ;;  %v2200_v52 = vmul.f32 %v2088_v5, %v2088_v5 }
 0x826   : > { %5246 = vrcp.f32 %v2106_v19  ;;  %v6355_v47 = vadd.f32 %v4422_v55, %v2059_v35  ;;  %v2091_v3 = vand.u32 2147483647, %v6351_v25  ;;  %v6359_v21 = vmul.f32 0.70710677, %v6353_v29 }
 0x827   : > { %v2104_v26 = vadd.f32 1.0, %v2096_v9  ;;  %v2101_v36 = vmul.f32 0.3275911, %v2093_v63  ;;  %v2215_v56 = vmul.f32 1.442695, %v2207_v50  ;;  %v2210_v2 = vsub.f32 0.0, %v2202_v4 }
 0x828   : > { %v2099_v16 = vmul.f32 0.3275911, %v2091_v3  ;;  %v2094_v22 = vand.u32 2147483647, %v6359_v21  ;;  %v6363_v13 = vmul.f32 0.70710677, %v6355_v47  ;;  %v2205_v51 = vmul.f32 %v2093_v63, %v2093_v63 }
 0x829   : > { %5248 = vrcp.f32 %v2104_v26  ;;  %v2109_v41 = vadd.f32 1.0, %v2101_v36  ;;  %v2208_v14 = vsub.f32 0.0, %v2200_v52  ;;  %v2203_v38 = vmul.f32 %v2091_v3, %v2091_v3 }
 0x82a   : > { %v2107_v60 = vadd.f32 1.0, %v2099_v16  ;;  %v2102_v44 = vmul.f32 0.3275911, %v2094_v22  ;;  %v2092_v55 = vand.u32 2147483647, %v6363_v13  ;;  %v2213_v9 = vsub.f32 0.0, %v2205_v51 }
 0x82b   : > { %5250 = vrcp.f32 %v2109_v41  ;;  %v2221_v30 = vmul.f32 1.442695, %v2210_v2  ;;  %v2217_v63 = vmul.f32 1.442695, %v2208_v14  ;;  %v2206_v27 = vmul.f32 %v2094_v22, %v2094_v22 }
 0x82c   : > { %5252 = vrcp.f32 %v2107_v60  ;;  %v2110_v58 = vadd.f32 1.0, %v2102_v44  ;;  %v2100_v11 = vmul.f32 0.3275911, %v2092_v55  ;;  %v2211_v3 = vsub.f32 0.0, %v2203_v38 }
 0x82d   : > { %5254 = vpow2.f32 %v2219_v54  ;;  %v2227_v54 = vmul.f32 1.442695, %v2213_v9  ;;  %v2074_v59 = vmul.f32 0.5, %v6329_v1  ;;  %vm2248_vm9 = vcmp.ge.f32.partialorder %v6339_v0, 0.0 }
 0x82e   : > { %5256 = vrcp.f32 %v2110_v58  ;;  %v2108_v7 = vadd.f32 1.0, %v2100_v11  ;;  %v2223_v58 = vmul.f32 1.442695, %v2211_v3  ;;  %v2204_v11 = vmul.f32 %v2092_v55, %v2092_v55 }
 0x82f   : > { %v6365_v33 = vpop.eup %5242  ;;  %5258 = vpow2.f32 %v2215_v56  ;;  %vm2251_vm10 = vcmp.ge.f32.partialorder %v6351_v25, 0.0  ;;  %vm2254_vm11 = vcmp.ge.f32.partialorder %v6359_v21, 0.0  ;;  %vm2253_vm12 = vcmp.ge.f32.partialorder %v6347_v39, 0.0 }
 0x830   : > { %v2129_v42 = vmul.f32 1.0614054, %v6365_v33  ;;  %5260 = vrcp.f32 %v2108_v7  ;;  %vm2252_vm13 = vcmp.ge.f32.partialorder %v6363_v13, 0.0  ;;  %v2076_v25 = vmul.f32 0.5, %v6355_v47 }
 0x831   : > { %v6369_v57 = vpop.eup %5244  ;;  %5262 = vpow2.f32 %v2221_v30  ;;  %v2077_v39 = vmul.f32 0.5, %v6342_v23 }
 0x832   : > { %v2137_v8 = vadd.f32 -1.4531521, %v2129_v42  ;;  %v2127_v46 = vmul.f32 1.0614054, %v6369_v57  ;;  %5264 = vpow2.f32 %v2217_v63  ;;  %v2214_v42 = vsub.f32 0.0, %v2206_v27 }
 0x833   : > { %v6372_v28 = vpop.eup %5246  ;;  %5266 = vpow2.f32 %v2227_v54 }
 0x834   : > { %v2145_v24 = vmul.f32 %v6365_v33, %v2137_v8  ;;  %v2135_v17 = vadd.f32 -1.4531521, %v2127_v46  ;;  %v2130_v5 = vmul.f32 1.0614054, %v6372_v28  ;;  %v2229_v30 = vmul.f32 1.442695, %v2214_v42 }
 0x835   : > { %5268 = vpow2.f32 %v2223_v58 }
 0x836   : > { %v2153_v19 = vadd.f32 1.4214138, %v2145_v24  ;;  %v6376_v37 = vpop.eup %5248  ;;  %v2143_v26 = vmul.f32 %v6369_v57, %v2135_v17  ;;  %v2138_v35 = vadd.f32 -1.4531521, %v2130_v5  ;;  %5270 = vpow2.f32 %v2229_v30 }
 0x837   : > { %v2128_v18 = vmul.f32 1.0614054, %v6376_v37 }
 0x838   : > { %v2161_v36 = vmul.f32 %v6365_v33, %v2153_v19  ;;  %v2151_v41 = vadd.f32 1.4214138, %v2143_v26  ;;  %v2146_v50 = vmul.f32 %v6372_v28, %v2138_v35  ;;  %v6382_v52 = vpop.eup %5250 }
 0x839   : > { %v2136_v16 = vadd.f32 -1.4531521, %v2128_v18  ;;  %v2133_v2 = vmul.f32 1.0614054, %v6382_v52  ;;  %v6389_v46 = vpop.eup %5252  ;;  %v2212_v18 = vsub.f32 0.0, %v2204_v11 }
 0x83a   : > { %v2169_v4 = vadd.f32 -0.28449672, %v2161_v36  ;;  %v2159_v60 = vmul.f32 %v6369_v57, %v2151_v41  ;;  %v2154_v44 = vadd.f32 1.4214138, %v2146_v50  ;;  %v2131_v5 = vmul.f32 1.0614054, %v6389_v46  ;;  %v5255_v19 = vpop.eup %5254 }
 0x83b   : > { %v2144_v56 = vmul.f32 %v6376_v37, %v2136_v16  ;;  %v2141_v38 = vadd.f32 -1.4531521, %v2133_v2  ;;  %v6396_v55 = vpop.eup %5256 }
 0x83c   : > { %v2177_v22 = vmul.f32 %v6365_v33, %v2169_v4  ;;  %v2167_v8 = vadd.f32 -0.28449672, %v2159_v60  ;;  %v2162_v51 = vmul.f32 %v6372_v28, %v2154_v44  ;;  %v2139_v36 = vadd.f32 -1.4531521, %v2131_v5  ;;  %v5259_v3 = vpop.eup %5258 }
 0x83d   : > { %v2152_v24 = vadd.f32 1.4214138, %v2144_v56  ;;  %v2149_v35 = vmul.f32 %v6382_v52, %v2141_v38  ;;  %v2134_v16 = vmul.f32 1.0614054, %v6396_v55  ;;  %v6400_v54 = vpop.eup %5260 }
 0x83e   : > { %v2185_v14 = vadd.f32 0.2548296, %v2177_v22  ;;  %v2175_v7 = vmul.f32 %v6369_v57, %v2167_v8  ;;  %v2170_v17 = vadd.f32 -0.28449672, %v2162_v51  ;;  %v2147_v44 = vmul.f32 %v6389_v46, %v2139_v36 }
 0x83f   : > { %v2160_v26 = vmul.f32 %v6376_v37, %v2152_v24  ;;  %v2157_v4 = vadd.f32 1.4214138, %v2149_v35  ;;  %v2142_v2 = vadd.f32 -1.4531521, %v2134_v16  ;;  %v2132_v11 = vmul.f32 1.0614054, %v6400_v54 }
 0x840   : > { %v2193_v9 = vmul.f32 %v6365_v33, %v2185_v14  ;;  %v2183_v63 = vadd.f32 0.2548296, %v2175_v7  ;;  %v2178_v27 = vmul.f32 %v6372_v28, %v2170_v17  ;;  %v2155_v51 = vadd.f32 1.4214138, %v2147_v44  ;;  %v5263_v14 = vpop.eup %5262 }
 0x841   : > { %v2168_v50 = vadd.f32 -0.28449672, %v2160_v26  ;;  %v2165_v56 = vmul.f32 %v6382_v52, %v2157_v4  ;;  %v2225_v7 = vmul.f32 1.442695, %v2212_v18 }
 0x842   : > { %v2233_v41 = vmul.f32 %v5255_v19, %v2193_v9  ;;  %v2191_v33 = vmul.f32 %v6369_v57, %v2183_v63  ;;  %v2186_v60 = vadd.f32 0.2548296, %v2178_v27  ;;  %v2150_v57 = vmul.f32 %v6396_v55, %v2142_v2  ;;  %v5265_v9 = vpop.eup %5264 }
 0x843   : > { %v2176_v22 = vmul.f32 %v6376_v37, %v2168_v50  ;;  %v2173_v38 = vadd.f32 -0.28449672, %v2165_v56  ;;  %v2163_v30 = vmul.f32 %v6389_v46, %v2155_v51  ;;  %v2140_v19 = vadd.f32 -1.4531521, %v2132_v11  ;;  %v5267_v16 = vpop.eup %5266 }
 0x844   : > { %v2241_v42 = vsub.f32 1.0, %v2233_v41  ;;  %v2231_v58 = vmul.f32 %v5259_v3, %v2191_v33  ;;  %v2194_v8 = vmul.f32 %v6372_v28, %v2186_v60  ;;  %v2158_v63 = vadd.f32 1.4214138, %v2150_v57  ;;  %v5269_v2 = vpop.eup %5268 }
 0x845   : > { %v2184_v24 = vadd.f32 0.2548296, %v2176_v22  ;;  %v2181_v28 = vmul.f32 %v6382_v52, %v2173_v38  ;;  %v2171_v3 = vadd.f32 -0.28449672, %v2163_v30  ;;  %v2148_v4 = vmul.f32 %v6400_v54, %v2140_v19  ;;  %v5271_v57 = vpop.eup %5270 }
 0x846   : > { %v2239_v17 = vsub.f32 1.0, %v2231_v58  ;;  %v2234_v5 = vmul.f32 %v5263_v14, %v2194_v8  ;;  %v2257_v26 = vsub.f32 0.0, %v2241_v42  ;;  %v2166_v18 = vmul.f32 %v6396_v55, %v2158_v63 }
 0x847   : > { %v2192_v35 = vmul.f32 %v6376_v37, %v2184_v24  ;;  %v2189_v50 = vadd.f32 0.2548296, %v2181_v28  ;;  %v2179_v37 = vmul.f32 %v6389_v46, %v2171_v3  ;;  %5272 = vpow2.f32 %v2225_v7 }
 0x848   : > { %v2255_v27 = vsub.f32 0.0, %v2239_v17  ;;  %v2242_v36 = vsub.f32 1.0, %v2234_v5  ;;  %v2265_v60 = vsel %vm2249_vm6, %v2241_v42, %v2257_v26  ;;  %v2174_v56 = vadd.f32 -0.28449672, %v2166_v18 }
 0x849   : > { %v2232_v41 = vmul.f32 %v5265_v9, %v2192_v35  ;;  %v2197_v22 = vmul.f32 %v6382_v52, %v2189_v50  ;;  %v2187_v51 = vadd.f32 0.2548296, %v2179_v37  ;;  %v2156_v11 = vadd.f32 1.4214138, %v2148_v4 }
 0x84a   : > { %v2258_v33 = vsub.f32 0.0, %v2242_v36  ;;  %v2263_v58 = vsel %vm2247_vm7, %v2239_v17, %v2255_v27  ;;  %v2072_v24 = vmul.f32 0.5, %v6335_v48  ;;  %v2182_v52 = vmul.f32 %v6396_v55, %v2174_v56 }
 0x84b   : > { %v2240_v44 = vsub.f32 1.0, %v2232_v41  ;;  %v2195_v10 = vmul.f32 %v6389_v46, %v2187_v51  ;;  %v2164_v42 = vmul.f32 %v6400_v54, %v2156_v11  ;;  %v2273_v49 = vadd.f32 1.0, %v2265_v60 }
 0x84c   : > { %v2266_v8 = vsel %vm2250_vm8, %v2242_v36, %v2258_v33  ;;  %v2271_v7 = vadd.f32 1.0, %v2263_v58  ;;  %v2237_v5 = vmul.f32 %v5267_v16, %v2197_v22  ;;  %v2190_v1 = vadd.f32 0.2548296, %v2182_v52 }
 0x84d   : > { %v2274_v14 = vadd.f32 1.0, %v2266_v8  ;;  %v2256_v38 = vsub.f32 0.0, %v2240_v44  ;;  %v2235_v19 = vmul.f32 %v5269_v2, %v2195_v10  ;;  %v2172_v9 = vadd.f32 -0.28449672, %v2164_v42 }
 0x84e   : > { %v2073_v48 = vmul.f32 0.5, %v6318_v53  ;;  %v2071_v26 = vmul.f32 0.5, %v6323_v62  ;;  %v2198_v28 = vmul.f32 %v6396_v55, %v2190_v1  ;;  %v2245_v36 = vsub.f32 1.0, %v2237_v5 }
 0x84f   : > { %v2264_v17 = vsel %vm2248_vm9, %v2240_v44, %v2256_v38  ;;  %v2282_v0 = vmul.f32 %v2274_v14, %v2074_v59  ;;  %v2243_v46 = vsub.f32 1.0, %v2235_v19  ;;  %v2180_v63 = vmul.f32 %v6400_v54, %v2172_v9 }
 0x850   : > { %v2272_v30 = vadd.f32 1.0, %v2264_v17  ;;  %v2279_v27 = vmul.f32 %v2271_v7, %v2071_v26  ;;  %v2281_v3 = vmul.f32 %v2273_v49, %v2073_v48  ;;  %v2238_v41 = vmul.f32 %v5271_v57, %v2198_v28 }
 0x851   : > { %v2188_v50 = vadd.f32 0.2548296, %v2180_v63  ;;  %v2259_v16 = vsub.f32 0.0, %v2243_v46  ;;  %v2261_v62 = vsub.f32 0.0, %v2245_v36  ;;  %v2078_v11 = vmul.f32 0.5, %v6353_v29 }
 0x852   : > { %v2280_v35 = vmul.f32 %v2272_v30, %v2072_v24  ;;  %v2288_v4 = vpack.c.bf16 %v2282_v0, %v2281_v3  ;;  %v2246_v33 = vsub.f32 1.0, %v2238_v41  ;;  %v2075_v14 = vmul.f32 0.5, %v6344_v34  ;;  %v4429_v29 = vld [vmem:[%s7248_s17] ss:$0 sm:$0xff] }
 0x853   : > { %v2196_v53 = vmul.f32 %v6400_v54, %v2188_v50  ;;  %v2267_v55 = vsel %vm2251_vm10, %v2243_v46, %v2259_v16  ;;  %v2269_v2 = vsel %vm2253_vm12, %v2245_v36, %v2261_v62 }
 0x854   : > { %v2287_v18 = vpack.c.bf16 %v2280_v35, %v2279_v27  ;;  %v5273_v37 = vpop.eup %5272  ;;  %v2262_v60 = vsub.f32 0.0, %v2246_v33  ;;  %v2275_v51 = vadd.f32 1.0, %v2267_v55  ;;  %v2277_v54 = vadd.f32 1.0, %v2269_v2 }
 0x855   : > { %v2236_v44 = vmul.f32 %v5273_v37, %v2196_v53 }
 0x856   : > { %4880 = vmatprep.mubr.bf16.mxu0 %v2287_v18  ;;  %v2270_v22 = vsel %vm2254_vm11, %v2246_v33, %v2262_v60  ;;  %v2283_v38 = vmul.f32 %v2275_v51, %v2075_v14  ;;  %v2285_v52 = vmul.f32 %v2277_v54, %v2077_v39 }
 0x857   : > { %4881 = vmatmul.mubr.bf16.vlgmr.msra.gmra.mxu0 %v2288_v4  ;;  %v2244_v56 = vsub.f32 1.0, %v2236_v44  ;;  %v2278_v58 = vadd.f32 1.0, %v2270_v22 }
 0x859   : > { %v2260_v8 = vsub.f32 0.0, %v2244_v56  ;;  %v2286_v24 = vmul.f32 %v2278_v58, %v2078_v11 }
 0x85b   : > { %v2268_v59 = vsel %vm2252_vm13, %v2244_v56, %v2260_v8  ;;  %v2290_v57 = vpack.c.bf16 %v2286_v24, %v2285_v52 }
 0x85c   : > { %v2276_v21 = vadd.f32 1.0, %v2268_v59 }
 0x85e   : > { %v2284_v10 = vmul.f32 %v2276_v21, %v2076_v25 }
 0x860   : > { %v2289_v42 = vpack.c.bf16 %v2284_v10, %v2283_v38 }
 0x862   : > { %4884 = vmatprep.mubr.bf16.mxu0 %v2289_v42 }
 0x863   : > { %4885 = vmatmul.mubr.bf16.gmra.mxu0 %v2290_v57 }
 0x917   : > { %v4882_v13 = vpop.f32.mrf.mxu0 }
 0x918   : > { %v2405_v34 = vadd.f32 %v4882_v13, %v4429_v29 }
 0x919   : > { %v2396_v49 = vpop.f32.mrf.mxu0 }
 0x91a   : > { %v2397_v7 = vadd.f32 %v4429_v29, %v2396_v49  ;;  %v6449_v5 = vadd.f32 %v2405_v34, %v6189_v12 }
 0x91b   : > { %v4883_v47 = vpop.f32.mrf.mxu0 }
 0x91c   : > { %v6446_v17 = vadd.f32 %v2397_v7, %v6186_v6  ;;  %v2408_v30 = vadd.f32 %v4883_v47, %v4429_v29  ;;  %v2445_v26 = vsel %vm643_vm0, %v6449_v5, 0.0 }
 0x91d   : > { %v2399_v23 = vpop.f32.mrf.mxu0 }
 0x91e   : > { %v2400_v19 = vadd.f32 %v4429_v29, %v2399_v23  ;;  %v2439_v1 = vsel %vm643_vm0, %v6446_v17, 0.0  ;;  %v6457_v48 = vadd.f32 %v2408_v30, %v6197_v40 }
 0x91f   : > { %2440 = vadd.xlane.f32.xlu0 %v2439_v1 }
 0x920   : > { %v6454_v9 = vadd.f32 %v2400_v19, %v6194_v31  ;;  %v2448_v0 = vsel %vm643_vm0, %v6457_v48, 0.0 }
 0x922   : > { %v2442_v6 = vsel %vm643_vm0, %v6454_v9, 0.0 }
 0x923   : > { %2443 = vadd.xlane.f32.xlu1 %v2442_v6  ;;  %2446 = vadd.xlane.f32.xlu0 %v2445_v26  ;;  %v4886_v12 = vpop.f32.mrf.mxu0  ;;  %v5126_v26 = vld [vmem:[%s7237_s6 + $0x18] sm:$0xff]  }
 0x924   : > { %v2421_v46 = vadd.f32 %v4886_v12, %v4429_v29  ;;  %v5127_v12 = vld [vmem:[%s7237_s6 + $0x10] sm:$0xff]   ;;  %4888 = vmatprep.subr.bf16.mxu1 %v5126_v26 }
 0x925   : > { %v2412_v35 = vpop.f32.mrf.mxu0  ;;  %4889 = vmatpush3.bf16.msra.mxu1 %v5126_v26 }
 0x926   : > { %v2413_v31 = vadd.f32 %v4429_v29, %v2412_v35  ;;  %v6469_v27 = vadd.f32 %v2421_v46, %v6209_v20  ;;  %v5129_v35 = vld [vmem:[%s7235_s4 + $0x20] sm:$0xff]   ;;  %4890 = vmatprep.subr.bf16.mxu1 %v5127_v12  ;;  %v6545_v46 = vld [vmem:[#allocation2 + $0x18] sm:$0xff]  }
 0x927   : > { %2449 = vadd.xlane.f32.xlu1 %v2448_v0  ;;  %v4887_v28 = vpop.f32.mrf.mxu0  ;;  %v5128_v0 = vld [vmem:[%s7235_s4 + $0x28] sm:$0xff]  }
 0x928   : > { %v6466_v40 = vadd.f32 %v2413_v31, %v6204_v15  ;;  %v2424_v36 = vadd.f32 %v4887_v28, %v4429_v29  ;;  %v2457_v4 = vsel %vm643_vm0, %v6469_v27, 0.0  ;;  %4912 = vmatprep.subr.bf16.mxu0 %v5128_v0  ;;  %v6550_v31 = vld [vmem:[%s7235_s4 + $0x38] sm:$0xff]  }
 0x929   : > { %v2415_v63 = vpop.f32.mrf.mxu0  ;;  %4913 = vmatpush3.bf16.msra.mxu0 %v5128_v0  ;;  %4891 = vmatpush3.bf16.msra.mxu1 %v5127_v12 }
 0x92a   : > { %v2416_v3 = vadd.f32 %v4429_v29, %v2415_v63  ;;  %v2451_v41 = vsel %vm643_vm0, %v6466_v40, 0.0  ;;  %v6477_v18 = vadd.f32 %v2424_v36, %v6217_v32  ;;  %4914 = vmatprep.subr.bf16.mxu0 %v5129_v35  ;;  %4900 = vmatprep.subr.bf16.mxu1 %v6545_v46 }
 0x92b   : > { %2452 = vadd.xlane.f32.xlu0 %v2451_v41 }
 0x92c   : > { %v6474_v50 = vadd.f32 %v2416_v3, %v6214_v43  ;;  %v2460_v20 = vsel %vm643_vm0, %v6477_v18, 0.0 }
 0x92d   : > { %4915 = vmatpush3.bf16.msra.mxu0 %v5129_v35  ;;  %v5132_v35 = vld [vmem:[#allocation2 + $0x10] sm:$0xff]  }
 0x92e   : > { %v2454_v15 = vsel %vm643_vm0, %v6474_v50, 0.0  ;;  %4940 = vmatprep.subr.bf16.mxu0 %v6550_v31 }
 0x92f   : > { %2455 = vadd.xlane.f32.xlu1 %v2454_v15  ;;  %2458 = vadd.xlane.f32.xlu0 %v2457_v4 }
 0x933   : > { %2461 = vadd.xlane.f32.xlu1 %v2460_v20 }
 0x9a8   : > { %v2441_v16 = vpop.xlane.xlu0 %2440 }
 0x9a9   : > { %v2463_v33 = vmul.f32 0.03125, %v2441_v16 }
 0x9ab   : > { %v6486_v43 = vsub.f32 %v6446_v17, %v2463_v33 }
 0x9ac   : > { %v2444_v53 = vpop.xlane.xlu1 %2443  ;;  %v2447_v32 = vpop.xlane.xlu0 %2446 }
 0x9ad   : > { %v2464_v37 = vmul.f32 0.03125, %v2444_v53  ;;  %v2465_v62 = vmul.f32 0.03125, %v2447_v32  ;;  %v2479_v60 = vmul.f32 %v6486_v43, %v6486_v43 }
 0x9af   : > { %v6491_v44 = vsub.f32 %v6454_v9, %v2464_v37  ;;  %v6494_v55 = vsub.f32 %v6449_v5, %v2465_v62  ;;  %v2487_v22 = vsel %vm643_vm0, %v2479_v60, 0.0 }
 0x9b0   : > { %v2450_v56 = vpop.xlane.xlu1 %2449  ;;  %2488 = vadd.xlane.f32.xlu0 %v2487_v22 }
 0x9b1   : > { %v2466_v2 = vmul.f32 0.03125, %v2450_v56  ;;  %v2480_v58 = vmul.f32 %v6491_v44, %v6491_v44  ;;  %v2481_v8 = vmul.f32 %v6494_v55, %v6494_v55 }
 0x9b3   : > { %v6502_v51 = vsub.f32 %v6457_v48, %v2466_v2  ;;  %v2490_v54 = vsel %vm643_vm0, %v2480_v58, 0.0  ;;  %v2493_v11 = vsel %vm643_vm0, %v2481_v8, 0.0  ;;  %v4440_v58 = vld [vmem:[%s7258_s26 + $0x1] ss:$0 sm:$0xff] }
 0x9b4   : > { %2491 = vadd.xlane.f32.xlu1 %v2490_v54  ;;  %2494 = vadd.xlane.f32.xlu0 %v2493_v11  ;;  %v2453_v14 = vpop.xlane.xlu0 %2452 }
 0x9b5   : > { %v2482_v59 = vmul.f32 %v6502_v51, %v6502_v51  ;;  %v2467_v25 = vmul.f32 0.03125, %v2453_v14 }
 0x9b7   : > { %v2496_v21 = vsel %vm643_vm0, %v2482_v59, 0.0  ;;  %v6510_v39 = vsub.f32 %v6466_v40, %v2467_v25 }
 0x9b8   : > { %2497 = vadd.xlane.f32.xlu1 %v2496_v21  ;;  %v2456_v24 = vpop.xlane.xlu1 %2455  ;;  %v2459_v38 = vpop.xlane.xlu0 %2458 }
 0x9b9   : > { %v2468_v10 = vmul.f32 0.03125, %v2456_v24  ;;  %v2469_v52 = vmul.f32 0.03125, %v2459_v38  ;;  %v2483_v42 = vmul.f32 %v6510_v39, %v6510_v39 }
 0x9bb   : > { %v6515_v57 = vsub.f32 %v6474_v50, %v2468_v10  ;;  %v6518_v13 = vsub.f32 %v6469_v27, %v2469_v52  ;;  %v2499_v29 = vsel %vm643_vm0, %v2483_v42, 0.0  ;;  %v4441_v52 = vld [vmem:[%s7234_s3 + $0x1] ss:$0 sm:$0xff] }
 0x9bc   : > { %v2462_v49 = vpop.xlane.xlu1 %2461  ;;  %2500 = vadd.xlane.f32.xlu0 %v2499_v29 }
 0x9bd   : > { %v2470_v34 = vmul.f32 0.03125, %v2462_v49  ;;  %v2484_v7 = vmul.f32 %v6515_v57, %v6515_v57  ;;  %v2485_v47 = vmul.f32 %v6518_v13, %v6518_v13 }
 0x9bf   : > { %v6526_v23 = vsub.f32 %v6477_v18, %v2470_v34  ;;  %v2502_v30 = vsel %vm643_vm0, %v2484_v7, 0.0  ;;  %v2505_v19 = vsel %vm643_vm0, %v2485_v47, 0.0 }
 0x9c0   : > { %2503 = vadd.xlane.f32.xlu1 %v2502_v30  ;;  %2506 = vadd.xlane.f32.xlu0 %v2505_v19 }
 0x9c1   : > { %v2486_v1 = vmul.f32 %v6526_v23, %v6526_v23 }
 0x9c3   : > { %v2508_v6 = vsel %vm643_vm0, %v2486_v1, 0.0 }
 0x9c4   : > { %2509 = vadd.xlane.f32.xlu1 %v2508_v6 }
 0xa39   : > { %v2489_v28 = vpop.xlane.xlu0 %2488 }
 0xa3a   : > { %v2511_v63 = vmul.f32 0.03125, %v2489_v28  ;;  %v5133_v28 = vld [vmem:[%s7235_s4 + $0x30] sm:$0xff]  }
 0xa3c   : > { %v2519_v36 = vadd.f32 1e-05, %v2511_v63 }
 0xa3d   : > { %v2492_v3 = vpop.xlane.xlu1 %2491  ;;  %v2495_v41 = vpop.xlane.xlu0 %2494 }
 0xa3e   : > { %5274 = vrsqrt.f32 %v2519_v36  ;;  %v2512_v15 = vmul.f32 0.03125, %v2492_v3  ;;  %v2513_v4 = vmul.f32 0.03125, %v2495_v41 }
 0xa40   : > { %v2520_v20 = vadd.f32 1e-05, %v2512_v15  ;;  %v2521_v16 = vadd.f32 1e-05, %v2513_v4 }
 0xa41   : > { %v2498_v33 = vpop.xlane.xlu1 %2497 }
 0xa42   : > { %5276 = vrsqrt.f32 %v2520_v20  ;;  %v2514_v53 = vmul.f32 0.03125, %v2498_v33 }
 0xa43   : > { %5278 = vrsqrt.f32 %v2521_v16 }
 0xa44   : > { %v2522_v32 = vadd.f32 1e-05, %v2514_v53 }
 0xa45   : > { %v2501_v37 = vpop.xlane.xlu0 %2500 }
 0xa46   : > { %5280 = vrsqrt.f32 %v2522_v32  ;;  %v2515_v62 = vmul.f32 0.03125, %v2501_v37 }
 0xa48   : > { %v2523_v60 = vadd.f32 1e-05, %v2515_v62 }
 0xa49   : > { %v2504_v56 = vpop.xlane.xlu1 %2503  ;;  %v2507_v2 = vpop.xlane.xlu0 %2506 }
 0xa4a   : > { %5282 = vrsqrt.f32 %v2523_v60  ;;  %v2516_v8 = vmul.f32 0.03125, %v2504_v56  ;;  %v2517_v54 = vmul.f32 0.03125, %v2507_v2  ;;  %v6596_v60 = vld [vmem:[%s7236_s5 + $0x2] ss:$0 sm:$0xff] }
 0xa4b   : > { %v5275_v22 = vpop.eup %5274 }
 0xa4c   : > { %v2535_v11 = vmul.f32 %v5275_v22, %v6486_v43  ;;  %v2524_v59 = vadd.f32 1e-05, %v2516_v8  ;;  %v2525_v14 = vadd.f32 1e-05, %v2517_v54 }
 0xa4d   : > { %v2510_v21 = vpop.xlane.xlu1 %2509 }
 0xa4e   : > { %v2549_v24 = vmul.f32 %v4440_v58, %v2535_v11  ;;  %5284 = vrsqrt.f32 %v2524_v59  ;;  %v2518_v10 = vmul.f32 0.03125, %v2510_v21 }
 0xa4f   : > { %v5277_v25 = vpop.eup %5276  ;;  %5286 = vrsqrt.f32 %v2525_v14 }
 0xa50   : > { %v5279_v38 = vpop.eup %5278  ;;  %v2536_v42 = vmul.f32 %v5277_v25, %v6491_v44  ;;  %v2526_v49 = vadd.f32 1e-05, %v2518_v10  ;;  %v2563_v7 = vadd.f32 %v4441_v52, %v2549_v24  ;;  %v4447_v10 = vld [vmem:[%s7238_s7 + $0x1] ss:$0 sm:$0xff] }
 0xa51   : > { %v2537_v29 = vmul.f32 %v5279_v38, %v6494_v55 }
 0xa52   : > { %v2550_v34 = vmul.f32 %v4440_v58, %v2536_v42  ;;  %5288 = vrsqrt.f32 %v2526_v49 }
 0xa53   : > { %v5281_v43 = vpop.eup %5280  ;;  %v2551_v47 = vmul.f32 %v4440_v58, %v2537_v29 }
 0xa54   : > { %v2538_v30 = vmul.f32 %v5281_v43, %v6502_v51  ;;  %v2564_v19 = vadd.f32 %v4441_v52, %v2550_v34 }
 0xa55   : > { %v2565_v26 = vadd.f32 %v4441_v52, %v2551_v47 }
 0xa56   : > { %v2552_v1 = vmul.f32 %v4440_v58, %v2538_v30  ;;  %v2571_v6 = vpack.c.bf16 %v2564_v19, %v2563_v7 }
 0xa57   : > { %v5283_v12 = vpop.eup %5282 }
 0xa58   : > { %4892 = vmatprep.mubr.msk.bf16.mxu1 %vm643_vm0, %v2571_v6  ;;  %4916 = vmatprep.mubr.msk.bf16.mxu0 %vm643_vm0, %v2571_v6  ;;  %v2566_v44 = vadd.f32 %v4441_v52, %v2552_v1  ;;  %v2539_v0 = vmul.f32 %v5283_v12, %v6510_v39 }
 0xa5a   : > { %v2572_v55 = vpack.c.bf16 %v2566_v44, %v2565_v26  ;;  %v2553_v3 = vmul.f32 %v4440_v58, %v2539_v0  ;;  %v4455_v26 = vld [vmem:[%s7240_s9 + $0x1] ss:$0 sm:$0xff] }
 0xa5b   : > { %v5285_v51 = vpop.eup %5284 }
 0xa5c   : > { %4893 = vmatmul.mubr.msk.bf16.vlgmr.msra.gmra.mxu1 %vm643_vm0, %v2572_v55  ;;  %4917 = vmatmul.mubr.msk.bf16.vlgmr.msra.gmra.mxu0 %vm643_vm0, %v2572_v55  ;;  %v5287_v63 = vpop.eup %5286  ;;  %v2540_v36 = vmul.f32 %v5285_v51, %v6515_v57  ;;  %v2567_v4 = vadd.f32 %v4441_v52, %v2553_v3 }
 0xa5d   : > { %4901 = vmatpush3.bf16.msra.mxu1 %v6545_v46  ;;  %4941 = vmatpush3.bf16.msra.mxu0 %v6550_v31  ;;  %v2541_v39 = vmul.f32 %v5287_v63, %v6518_v13  ;;  %v6630_v63 = vld [vmem:[%s7236_s5 + $0x3] ss:$0 sm:$0xff] }
 0xa5e   : > { %4902 = vmatprep.subr.bf16.mxu1 %v5132_v35  ;;  %4942 = vmatprep.subr.bf16.mxu0 %v5133_v28  ;;  %v2554_v41 = vmul.f32 %v4440_v58, %v2540_v36 }
 0xa5f   : > { %v5289_v15 = vpop.eup %5288  ;;  %v2555_v33 = vmul.f32 %v4440_v58, %v2541_v39 }
 0xa60   : > { %v2568_v20 = vadd.f32 %v4441_v52, %v2554_v41  ;;  %v2542_v16 = vmul.f32 %v5289_v15, %v6526_v23 }
 0xa61   : > { %4903 = vmatpush3.bf16.msra.mxu1 %v5132_v35  ;;  %4943 = vmatpush3.bf16.msra.mxu0 %v5133_v28  ;;  %v2569_v57 = vadd.f32 %v4441_v52, %v2555_v33 }
 0xa62   : > { %v2573_v46 = vpack.c.bf16 %v2568_v20, %v2567_v4  ;;  %v2556_v53 = vmul.f32 %v4440_v58, %v2542_v16 }
 0xa64   : > { %4896 = vmatprep.mubr.msk.bf16.mxu1 %vm643_vm0, %v2573_v46  ;;  %4920 = vmatprep.mubr.msk.bf16.mxu0 %vm643_vm0, %v2573_v46  ;;  %v2570_v31 = vadd.f32 %v4441_v52, %v2556_v53 }
 0xa66   : > { %v2574_v32 = vpack.c.bf16 %v2570_v31, %v2569_v57 }
 0xa68   : > { %4897 = vmatmul.mubr.msk.bf16.gmra.mxu1 %vm643_vm0, %v2574_v32  ;;  %4921 = vmatmul.mubr.msk.bf16.gmra.mxu0 %vm643_vm0, %v2574_v32 }
 0xa69   : > { %4904 = vmatprep.mubr.msk.bf16.mxu1 %vm643_vm0, %v2571_v6  ;;  %4944 = vmatprep.mubr.msk.bf16.mxu0 %vm643_vm0, %v2571_v6 }
 0xa70   : > { %4905 = vmatmul.mubr.msk.bf16.vlgmr.msra.gmra.mxu1 %vm643_vm0, %v2572_v55  ;;  %4945 = vmatmul.mubr.msk.bf16.vlgmr.msra.gmra.mxu0 %vm643_vm0, %v2572_v55 }
 0xa71   : > { %4908 = vmatprep.mubr.msk.bf16.mxu1 %vm643_vm0, %v2573_v46  ;;  %4948 = vmatprep.mubr.msk.bf16.mxu0 %vm643_vm0, %v2573_v46 }
 0xa78   : > { %4909 = vmatmul.mubr.msk.bf16.gmra.mxu1 %vm643_vm0, %v2574_v32  ;;  %4949 = vmatmul.mubr.msk.bf16.gmra.mxu0 %vm643_vm0, %v2574_v32 }
 0xb1c   : > { %v4894_v13 = vpop.f32.mrf.mxu1  ;;  %v6589_v23 = vpop.f32.mrf.mxu0 }
 0xb1d   : > { %v2655_v4 = vadd.f32 %v4894_v13, %v4447_v10 }
 0xb1e   : > { %v6591_v37 = vpop.f32.mrf.mxu1  ;;  %v2830_v62 = vpop.f32.mrf.mxu0 }
 0xb1f   : > { %v2831_v56 = vadd.f32 %v6596_v60, %v2830_v62 }
 0xb20   : > { %v6598_v22 = vpop.f32.mrf.mxu0  ;;  %v4895_v2 = vpop.f32.mrf.mxu1 }
 0xb21   : > { %v2861_v54 = vmul.f32 0.25, %v2831_v56  ;;  %v2658_v51 = vadd.f32 %v4895_v2, %v4447_v10 }
 0xb22   : > { %v2833_v58 = vpop.f32.mrf.mxu0  ;;  %v6602_v59 = vpop.f32.mrf.mxu1 }
 0xb23   : > { %v2834_v8 = vadd.f32 %v6596_v60, %v2833_v58  ;;  %v2768_v57 = vpack.c.bf16 %v2658_v51, %v2655_v4 }
 0xb25   : > { %v2862_v11 = vmul.f32 0.25, %v2834_v8 }
 0xb27   : > { %v2869_v14 = vpack.c.bf16 %v2862_v11, %v2861_v54 }
 0xb28   : > { %v4898_v25 = vpop.f32.mrf.mxu1  ;;  %v6605_v21 = vpop.f32.mrf.mxu0 }
 0xb29   : > { %4932 = vmatprep.mubr.msk.bf16.mxu1 %vm643_vm0, %v2869_v14  ;;  %v2671_v29 = vadd.f32 %v4898_v25, %v4447_v10 }
 0xb2a   : > { %v2662_v24 = vpop.f32.mrf.mxu1  ;;  %v6607_v38 = vpop.f32.mrf.mxu0 }
 0xb2b   : > { %v2663_v7 = vadd.f32 %v4447_v10, %v2662_v24  ;;  %v2650_v24 = vadd.f32 %v4447_v10, %v6602_v59 }
 0xb2c   : > { %v4899_v52 = vpop.f32.mrf.mxu1  ;;  %v6612_v42 = vpop.f32.mrf.mxu0 }
 0xb2d   : > { %v2674_v49 = vadd.f32 %v4899_v52, %v4447_v10 }
 0xb2e   : > { %v2665_v34 = vpop.f32.mrf.mxu1  ;;  %v6614_v43 = vpop.f32.mrf.mxu0 }
 0xb2f   : > { %v2770_v47 = vpack.c.bf16 %v2674_v49, %v2671_v29  ;;  %v2666_v30 = vadd.f32 %v4447_v10, %v2665_v34  ;;  %v2647_v34 = vadd.f32 %v4447_v10, %v6591_v37  ;;  %v2850_v51 = vadd.f32 %v6596_v60, %v6614_v43 }
 0xb30   : > { %v4906_v19 = vpop.f32.mrf.mxu1  ;;  %v6616_v1 = vpop.f32.mrf.mxu0 }
 0xb31   : > { %v2769_v6 = vpack.c.bf16 %v2666_v30, %v2663_v7  ;;  %5056 = vmatprep.subr.msk.bf16.mxu1 %vm643_vm0, %v2770_v47  ;;  %5060 = vmatprep.subr.msk.bf16.mxu0 %vm643_vm0, %v2770_v47  ;;  %v2916_v12 = vsel %vm643_vm0, %v2770_v47, 0  ;;  %v6624_v0 = vadd.f32 %v4906_v19, %v4455_v26  ;;  %v2767_v30 = vpack.c.bf16 %v2650_v24, %v2647_v34 }
 0xb32   : > { %v2736_v44 = vpop.f32.mrf.mxu1  ;;  %v3134_v55 = vpop.f32.mrf.mxu0  ;;  %4925 = vmatpush3.bf16.xpose.msra.mxu1 %v2916_v12  ;;  %4953 = vmatpush3.bf16.xpose.msra.mxu0 %v2916_v12 }
 0xb33   : > { %5057 = vmatprep.subr.msk.bf16.mxu1 %vm643_vm0, %v2769_v6  ;;  %5061 = vmatprep.subr.msk.bf16.mxu0 %vm643_vm0, %v2769_v6  ;;  %v6635_v3 = vadd.f32 %v4455_v26, %v2736_v44  ;;  %v3135_v39 = vadd.f32 %v6630_v63, %v3134_v55  ;;  %v2875_v33 = vmul.f32 %v5846_v45, %v6624_v0  ;;  %v2913_v32 = vsel %vm643_vm0, %v2769_v6, 0 }
 0xb34   : > { %v4907_v35 = vpop.f32.mrf.mxu1  ;;  %v4947_v28 = vpop.f32.mrf.mxu0  ;;  %v2910_v6 = vsel %vm643_vm0, %v2768_v57, 0  ;;  %v2842_v55 = vadd.f32 %v6598_v22, %v6596_v60  ;;  %v3143_v22 = vadd.f32 %v6616_v1, %v6630_v63 }
 0xb35   : > { %v6633_v36 = vadd.f32 %v4907_v35, %v4455_v26  ;;  %v2873_v13 = vmul.f32 %v5846_v45, %v6635_v3  ;;  %v3165_v62 = vmul.f32 0.25, %v3135_v39  ;;  %v2839_v39 = vadd.f32 %v6589_v23, %v6596_v60 }
 0xb36   : > { %v2739_v41 = vpop.f32.mrf.mxu1  ;;  %v3137_v15 = vpop.f32.mrf.mxu0 }
 0xb37   : > { %v2876_v20 = vmul.f32 %v5846_v45, %v6633_v36  ;;  %v6640_v16 = vadd.f32 %v4455_v26, %v2739_v41  ;;  %v3138_v46 = vadd.f32 %v6630_v63, %v3137_v15  ;;  %v2907_v15 = vsel %vm643_vm0, %v2767_v30, 0 }
 0xb38   : > { %v4910_v53 = vpop.f32.mrf.mxu1  ;;  %v4950_v8 = vpop.f32.mrf.mxu0  ;;  %v2863_v23 = vmul.f32 0.25, %v2839_v39  ;;  %v4501_v39 = vld [vmem:[%s7259_s2 + $0xd8] sm:$0xff] }
 0xb39   : > { %v2874_v31 = vmul.f32 %v5846_v45, %v6640_v16  ;;  %v3166_v56 = vmul.f32 0.25, %v3138_v46  ;;  %v6650_v58 = vpack.c.bf16 %v2876_v20, %v2875_v33  ;;  %v6666_v59 = vadd.f32 %v4910_v53, %v4455_v26 }
 0xb3a   : > { %v2752_v2 = vpop.f32.mrf.mxu1  ;;  %4927 = vmatpush3.bf16.xpose.msra.mxu1 %v2913_v32  ;;  %4955 = vmatpush3.bf16.xpose.msra.mxu0 %v2913_v32  ;;  %v3150_v29 = vpop.f32.mrf.mxu0  ;;  %v2847_v20 = vadd.f32 %v6596_v60, %v6607_v38  ;;  %v2864_v33 = vmul.f32 0.25, %v2842_v55  ;;  %v2858_v38 = vadd.f32 %v6612_v42, %v6596_v60 }
 0xb3b   : > { %v3173_v54 = vpack.c.bf16 %v3166_v56, %v3165_v62  ;;  %5058 = vmatprep.subr.msk.bf16.mxu1 %vm643_vm0, %v2768_v57  ;;  %v6653_v14 = vpack.c.bf16 %v2874_v31, %v2873_v13  ;;  %v2753_v25 = vadd.f32 %v4455_v26, %v2752_v2  ;;  %5062 = vmatprep.subr.msk.bf16.mxu0 %vm643_vm0, %v2768_v57  ;;  %v3167_v31 = vmul.f32 0.25, %v3143_v22 }
 0xb3c   : > { %v4911_v11 = vpop.f32.mrf.mxu1  ;;  %v4951_v44 = vpop.f32.mrf.mxu0  ;;  %v3183_v35 = vmul.f32 %v5904_v61, %v6666_v59  ;;  %v3151_v43 = vadd.f32 %v6630_v63, %v3150_v29  ;;  %v2865_v57 = vmul.f32 0.25, %v2847_v20  ;;  %v2870_v13 = vpack.c.bf16 %v2864_v33, %v2863_v23  ;;  %v4502_v20 = vld [vmem:[%s7259_s2 + $0xe0] sm:$0xff] }
 0xb3d   : > { %4960 = vmatprep.mubr.msk.bf16.mxu0 %vm643_vm0, %v3173_v54  ;;  %v2877_v7 = vmul.f32 %v5846_v45, %v2753_v25  ;;  %v6661_v19 = vadd.f32 %v4911_v11, %v4455_v26  ;;  %v3181_v2 = vmul.f32 %v5904_v61, %v2753_v25  ;;  %v3162_v54 = vadd.f32 %v4951_v44, %v6630_v63  ;;  %v4498_v44 = vld [vmem:[%s7259_s2 + $0xc0] sm:$0xff] }
 0xb3e   : > { %v2755_v52 = vpop.f32.mrf.mxu1  ;;  %v3153_v10 = vpop.f32.mrf.mxu0  ;;  %v3169_v62 = vmul.f32 0.25, %v3151_v43  ;;  %v2855_v11 = vadd.f32 %v6605_v21, %v6596_v60  ;;  %v3159_v29 = vadd.f32 %v4950_v8, %v6630_v63  ;;  %v3179_v60 = vmul.f32 %v5904_v61, %v6624_v0 }
 0xb3f   : > { %v2756_v49 = vadd.f32 %v4455_v26, %v2755_v52  ;;  %v3184_v37 = vmul.f32 %v5904_v61, %v6661_v19  ;;  %v3146_v26 = vadd.f32 %v4947_v28, %v6630_v63  ;;  %v3154_v41 = vadd.f32 %v6630_v63, %v3153_v10 }
 0xb40   : > { %v2866_v28 = vmul.f32 0.25, %v2850_v51  ;;  %v3180_v52 = vmul.f32 %v5904_v61, %v6633_v36  ;;  %v3172_v21 = vmul.f32 0.25, %v3162_v54  ;;  %v2867_v25 = vmul.f32 0.25, %v2855_v11 }
 0xb41   : > { %v2878_v47 = vmul.f32 %v5846_v45, %v2756_v49  ;;  %v3188_v4 = vpack.c.bf16 %v3184_v37, %v3183_v35  ;;  %v3168_v46 = vmul.f32 0.25, %v3146_v26  ;;  %v3170_v53 = vmul.f32 0.25, %v3154_v41 }
 0xb42   : > { %4929 = vmatpush3.bf16.xpose.msra.mxu1 %v2910_v6  ;;  %4957 = vmatpush3.bf16.xpose.msra.mxu0 %v2910_v6  ;;  %v3182_v32 = vmul.f32 %v5904_v61, %v2756_v49  ;;  %v2871_v1 = vpack.c.bf16 %v2866_v28, %v2865_v57  ;;  %v2868_v49 = vmul.f32 0.25, %v2858_v38  ;;  %v3178_v36 = vmul.f32 %v5904_v61, %v6640_v16 }
 0xb43   : > { %v6664_v12 = vpack.c.bf16 %v2878_v47, %v2877_v7  ;;  %5059 = vmatprep.subr.msk.bf16.mxu1 %vm643_vm0, %v2767_v30  ;;  %5063 = vmatprep.subr.msk.bf16.mxu0 %vm643_vm0, %v2767_v30  ;;  %v3174_v56 = vpack.c.bf16 %v3168_v46, %v3167_v31  ;;  %v3175_v24 = vpack.c.bf16 %v3170_v53, %v3169_v62  ;;  %v3171_v34 = vmul.f32 0.25, %v3159_v29  ;;  %v4504_v46 = vld [vmem:[%s7259_s2 + $0xf0] sm:$0xff]  ;;  %v4503_v31 = vld [vmem:[%s7259_s2 + $0xe8] sm:$0xff]  ;;  %v4474_v62 = vld [vmem:[%s7259_s2 + $0x80] sm:$0xff] }
 0xb44   : > { %v3187_v42 = vpack.c.bf16 %v3182_v32, %v3181_v2  ;;  %v3186_v63 = vpack.c.bf16 %v3180_v52, %v3179_v60  ;;  %v2872_v8 = vpack.c.bf16 %v2868_v49, %v2867_v25  ;;  %v3177_v7 = vmul.f32 %v5904_v61, %v6635_v3  ;;  %v4475_v49 = vld [vmem:[%s7259_s2 + $0x88] sm:$0xff] }
 0xb45   : > { %v3176_v47 = vpack.c.bf16 %v3172_v21, %v3171_v34  ;;  %v2880_v0 = vmul.f32 %v5846_v45, %v6661_v19  ;;  %v2879_v16 = vmul.f32 %v5846_v45, %v6666_v59  ;;  %v4500_v19 = vld [vmem:[%s7259_s2 + $0xd0] sm:$0xff]  ;;  %v4499_v59 = vld [vmem:[%s7259_s2 + $0xc8] sm:$0xff] }
 0xb46   : > { %v3185_v30 = vpack.c.bf16 %v3178_v36, %v3177_v7 }
 0xb47   : > { %v6714_v6 = vpack.c.bf16 %v2880_v0, %v2879_v16 }
 0xb4a   : > { %4931 = vmatpush3.bf16.xpose.msra.mxu1 %v2907_v15  ;;  %4959 = vmatpush3.bf16.xpose.msra.mxu0 %v2907_v15 }
 0xb4b   : > { %4968 = vmatprep.subr.bf16.mxu1 %v3188_v4 }
 0xb51   : > { %4933 = vmatmul.mubr.msk.bf16.vlgmr.msra.gmra.mxu1 %vm643_vm0, %v2870_v13  ;;  %4961 = vmatmul.mubr.msk.bf16.vlgmr.msra.gmra.mxu0 %vm643_vm0, %v3174_v56  ;;  %v4505_v56 = vld [vmem:[%s7259_s2 + $0xf8] sm:$0xff] }
 0xb52   : > { %4936 = vmatprep.mubr.msk.bf16.mxu1 %vm643_vm0, %v2871_v1  ;;  %4964 = vmatprep.mubr.msk.bf16.mxu0 %vm643_vm0, %v3175_v24 }
 0xb53   : > { %4969 = vmatpush3.bf16.msra.mxu1 %v3188_v4 }
 0xb54   : > { %4970 = vmatprep.subr.bf16.mxu1 %v3187_v42 }
 0xb57   : > { %4971 = vmatpush3.bf16.msra.mxu1 %v3187_v42  ;;  %v4476_v42 = vld [vmem:[%s7259_s2 + $0x90] sm:$0xff] }
 0xb58   : > { %4972 = vmatprep.subr.bf16.mxu1 %v3186_v63 }
 0xb59   : > { %4937 = vmatmul.mubr.msk.bf16.gmra.mxu1 %vm643_vm0, %v2872_v8  ;;  %4965 = vmatmul.mubr.msk.bf16.gmra.mxu0 %vm643_vm0, %v3176_v47  ;;  %v4478_v8 = vld [vmem:[%s7259_s2 + $0xa0] sm:$0xff] }
 0xb5b   : > { %4973 = vmatpush3.bf16.msra.mxu1 %v3186_v63  ;;  %v4477_v63 = vld [vmem:[%s7259_s2 + $0x98] sm:$0xff] }
 0xb5c   : > { %4974 = vmatprep.subr.bf16.mxu1 %v3185_v30 }
 0xb5f   : > { %4975 = vmatpush3.bf16.msra.mxu1 %v3185_v30 }
 0xb60   : > { %4984 = vmatprep.subr.bf16.mxu1 %v6714_v6 }
 0xc11   : > { %v4934_v61 = vpop.f32.mrf.mxu1  ;;  %v4962_v3 = vpop.f32.mrf.mxu0 }
 0xc12   : > { %v6728_v35 = vadd.f32 %v4962_v3, %v4500_v19  ;;  %v6782_v21 = vadd.f32 %v4934_v61, %v4476_v42  ;;  %v4480_v61 = vld [vmem:[%s7259_s2 + $0xb0] sm:$0xff] }
 0xc13   : > { %v2952_v37 = vpop.f32.mrf.mxu1  ;;  %v3244_v10 = vpop.f32.mrf.mxu0 }
 0xc14   : > { %v6723_v55 = vadd.f32 %v4498_v44, %v3244_v10  ;;  %v3281_v43 = vsel %vm1182_vm5, %v6728_v35, -inf  ;;  %v6768_v11 = vadd.f32 %v4474_v62, %v2952_v37  ;;  %v2989_v16 = vsel %vm1182_vm5, %v6782_v21, -inf  ;;  %v4479_v44 = vld [vmem:[%s7259_s2 + $0xa8] sm:$0xff] }
 0xc15   : > { %v4963_v45 = vpop.f32.mrf.mxu0  ;;  %v4935_v26 = vpop.f32.mrf.mxu1 }
 0xc16   : > { %v3275_v51 = vsel %vm1182_vm5, %v6723_v55, -inf  ;;  %v6740_v22 = vadd.f32 %v4963_v45, %v4501_v39  ;;  %v2983_v34 = vsel %vm1182_vm5, %v6768_v11, -inf  ;;  %v6796_v47 = vadd.f32 %v4935_v26, %v4477_v63 }
 0xc17   : > { %v3247_v41 = vpop.f32.mrf.mxu0  ;;  %3276 = vmax.xlane.f32.xlu0 %v3275_v51  ;;  %v2955_v28 = vpop.f32.mrf.mxu1 }
 0xc18   : > { %v6735_v15 = vadd.f32 %v4499_v59, %v3247_v41  ;;  %v3284_v13 = vsel %vm1182_vm5, %v6740_v22, -inf  ;;  %v6784_v25 = vadd.f32 %v4475_v49, %v2955_v28  ;;  %v2992_v10 = vsel %vm1182_vm5, %v6796_v47, -inf  ;;  %v4481_v59 = vld [vmem:[%s7259_s2 + $0xb8] sm:$0xff] }
 0xc19   : > { %v4966_v4 = vpop.f32.mrf.mxu0  ;;  %v4938_v1 = vpop.f32.mrf.mxu1 }
 0xc1a   : > { %v3278_v33 = vsel %vm1182_vm5, %v6735_v15, -inf  ;;  %v6754_v32 = vadd.f32 %v4966_v4, %v4504_v46  ;;  %v2986_v30 = vsel %vm1182_vm5, %v6784_v25, -inf  ;;  %v6810_v19 = vadd.f32 %v4938_v1, %v4480_v61 }
 0xc1b   : > { %v3260_v23 = vpop.f32.mrf.mxu0  ;;  %3279 = vmax.xlane.f32.xlu1 %v3278_v33  ;;  %3282 = vmax.xlane.f32.xlu0 %v3281_v43  ;;  %v2968_v60 = vpop.f32.mrf.mxu1 }
 0xc1c   : > { %v6749_v53 = vadd.f32 %v4502_v20, %v3260_v23  ;;  %v3293_v29 = vsel %vm1182_vm5, %v6754_v32, -inf  ;;  %v6798_v0 = vadd.f32 %v4478_v8, %v2968_v60  ;;  %v3001_v39 = vsel %vm1182_vm5, %v6810_v19, -inf }
 0xc1d   : > { %v4967_v57 = vpop.f32.mrf.mxu0  ;;  %v4939_v7 = vpop.f32.mrf.mxu1 }
 0xc1e   : > { %v3287_v38 = vsel %vm1182_vm5, %v6749_v53, -inf  ;;  %v6770_v24 = vadd.f32 %v4967_v57, %v4505_v56  ;;  %v2995_v45 = vsel %vm1182_vm5, %v6798_v0, -inf  ;;  %v6821_v51 = vadd.f32 %v4939_v7, %v4481_v59 }
 0xc1f   : > { %v3263_v2 = vpop.f32.mrf.mxu0  ;;  %3285 = vmax.xlane.f32.xlu1 %v3284_v13  ;;  %3288 = vmax.xlane.f32.xlu0 %v3287_v38  ;;  %v2971_v3 = vpop.f32.mrf.mxu1 }
 0xc20   : > { %v6766_v54 = vadd.f32 %v4503_v31, %v3263_v2  ;;  %v3296_v36 = vsel %vm1182_vm5, %v6770_v24, -inf  ;;  %v6812_v37 = vadd.f32 %v4479_v44, %v2971_v3  ;;  %v3004_v41 = vsel %vm1182_vm5, %v6821_v51, -inf }
 0xc22   : > { %v3290_v52 = vsel %vm1182_vm5, %v6766_v54, -inf  ;;  %v2998_v26 = vsel %vm1182_vm5, %v6812_v37, -inf }
 0xc23   : > { %3291 = vmax.xlane.f32.xlu1 %v3290_v52  ;;  %3294 = vmax.xlane.f32.xlu0 %v3293_v29 }
 0xc27   : > { %3297 = vmax.xlane.f32.xlu1 %v3296_v36  ;;  %2984 = vmax.xlane.f32.xlu0 %v2983_v34 }
 0xc2b   : > { %2987 = vmax.xlane.f32.xlu1 %v2986_v30  ;;  %2990 = vmax.xlane.f32.xlu0 %v2989_v16 }
 0xc2f   : > { %2993 = vmax.xlane.f32.xlu1 %v2992_v10  ;;  %2996 = vmax.xlane.f32.xlu0 %v2995_v45 }
 0xc33   : > { %2999 = vmax.xlane.f32.xlu1 %v2998_v26  ;;  %3002 = vmax.xlane.f32.xlu0 %v3001_v39 }
 0xc37   : > { %3005 = vmax.xlane.f32.xlu1 %v3004_v41 }
 0xca0   : > { %v3277_v4 = vpop.xlane.xlu0 %3276 }
 0xca1   : > { %v3299_v20 = vsub.f32 %v6723_v55, %v3277_v4 }
 0xca3   : > { %v3307_v33 = vmul.f32 1.442695, %v3299_v20 }
 0xca4   : > { %v3280_v43 = vpop.xlane.xlu1 %3279  ;;  %v3283_v28 = vpop.xlane.xlu0 %3282 }
 0xca5   : > { %5290 = vpow2.f32 %v3307_v33  ;;  %v3300_v46 = vsub.f32 %v6735_v15, %v3280_v43  ;;  %v3301_v23 = vsub.f32 %v6728_v35, %v3283_v28 }
 0xca7   : > { %v3309_v57 = vmul.f32 1.442695, %v3300_v46  ;;  %v3311_v31 = vmul.f32 1.442695, %v3301_v23 }
 0xca8   : > { %v3286_v13 = vpop.xlane.xlu1 %3285  ;;  %v3289_v38 = vpop.xlane.xlu0 %3288 }
 0xca9   : > { %5292 = vpow2.f32 %v3309_v57  ;;  %v3302_v62 = vsub.f32 %v6740_v22, %v3286_v13  ;;  %v3303_v1 = vsub.f32 %v6749_v53, %v3289_v38 }
 0xcaa   : > { %5294 = vpow2.f32 %v3311_v31 }
 0xcab   : > { %v3313_v56 = vmul.f32 1.442695, %v3302_v62  ;;  %v3315_v55 = vmul.f32 1.442695, %v3303_v1 }
 0xcac   : > { %v3292_v2 = vpop.xlane.xlu1 %3291  ;;  %v3295_v52 = vpop.xlane.xlu0 %3294 }
 0xcad   : > { %5296 = vpow2.f32 %v3313_v56  ;;  %v3304_v29 = vsub.f32 %v6766_v54, %v3292_v2  ;;  %v3305_v15 = vsub.f32 %v6754_v32, %v3295_v52 }
 0xcae   : > { %5298 = vpow2.f32 %v3315_v55 }
 0xcaf   : > { %v3317_v35 = vmul.f32 1.442695, %v3304_v29  ;;  %v3319_v42 = vmul.f32 1.442695, %v3305_v15 }
 0xcb0   : > { %v3298_v49 = vpop.xlane.xlu1 %3297  ;;  %v2985_v60 = vpop.xlane.xlu0 %2984 }
 0xcb1   : > { %5300 = vpow2.f32 %v3317_v35  ;;  %v3306_v22 = vsub.f32 %v6770_v24, %v3298_v49  ;;  %v3007_v53 = vsub.f32 %v6768_v11, %v2985_v60 }
 0xcb2   : > { %v6838_v36 = vpop.eup %5290  ;;  %5302 = vpow2.f32 %v3319_v42 }
 0xcb3   : > { %v3321_v34 = vmul.f32 1.442695, %v3306_v22  ;;  %v3015_v63 = vmul.f32 1.442695, %v3007_v53  ;;  %v3323_v54 = vsel %vm1182_vm5, %v6838_v36, 0.0 }
 0xcb4   : > { %v2988_v8 = vpop.xlane.xlu1 %2987  ;;  %3324 = vadd.xlane.f32.xlu0 %v3323_v54  ;;  %v2991_v32 = vpop.xlane.xlu0 %2990 }
 0xcb5   : > { %5304 = vpow2.f32 %v3321_v34  ;;  %v3008_v7 = vsub.f32 %v6784_v25, %v2988_v8  ;;  %v3009_v30 = vsub.f32 %v6782_v21, %v2991_v32 }
 0xcb6   : > { %v6844_v16 = vpop.eup %5292  ;;  %5306 = vpow2.f32 %v3015_v63 }
 0xcb7   : > { %v6846_v11 = vpop.eup %5294  ;;  %v3017_v24 = vmul.f32 1.442695, %v3008_v7  ;;  %v3019_v61 = vmul.f32 1.442695, %v3009_v30  ;;  %v3326_v3 = vsel %vm1182_vm5, %v6844_v16, 0.0 }
 0xcb8   : > { %3327 = vadd.xlane.f32.xlu1 %v3326_v3  ;;  %v2994_v44 = vpop.xlane.xlu1 %2993  ;;  %v3329_v10 = vsel %vm1182_vm5, %v6846_v11, 0.0  ;;  %v2997_v45 = vpop.xlane.xlu0 %2996 }
 0xcb9   : > { %5308 = vpow2.f32 %v3017_v24  ;;  %v3010_v25 = vsub.f32 %v6796_v47, %v2994_v44  ;;  %3330 = vadd.xlane.f32.xlu0 %v3329_v10  ;;  %v3011_v21 = vsub.f32 %v6798_v0, %v2997_v45 }
 0xcba   : > { %v6854_v59 = vpop.eup %5296  ;;  %5310 = vpow2.f32 %v3019_v61 }
 0xcbb   : > { %v6856_v26 = vpop.eup %5298  ;;  %v3021_v39 = vmul.f32 1.442695, %v3010_v25  ;;  %v3023_v41 = vmul.f32 1.442695, %v3011_v21  ;;  %v3332_v4 = vsel %vm1182_vm5, %v6854_v59, 0.0 }
 0xcbc   : > { %3333 = vadd.xlane.f32.xlu1 %v3332_v4  ;;  %v3000_v20 = vpop.xlane.xlu1 %2999  ;;  %v3335_v33 = vsel %vm1182_vm5, %v6856_v26, 0.0  ;;  %v3003_v43 = vpop.xlane.xlu0 %3002 }
 0xcbd   : > { %5312 = vpow2.f32 %v3021_v39  ;;  %v3012_v47 = vsub.f32 %v6812_v37, %v3000_v20  ;;  %3336 = vadd.xlane.f32.xlu0 %v3335_v33  ;;  %v3013_v0 = vsub.f32 %v6810_v19, %v3003_v43 }
 0xcbe   : > { %v6864_v28 = vpop.eup %5300  ;;  %5314 = vpow2.f32 %v3023_v41 }
 0xcbf   : > { %v6866_v46 = vpop.eup %5302  ;;  %v3025_v23 = vmul.f32 1.442695, %v3012_v47  ;;  %v3027_v57 = vmul.f32 1.442695, %v3013_v0  ;;  %v3338_v31 = vsel %vm1182_vm5, %v6864_v28, 0.0 }
 0xcc0   : > { %3339 = vadd.xlane.f32.xlu1 %v3338_v31  ;;  %v3006_v13 = vpop.xlane.xlu1 %3005  ;;  %v3341_v38 = vsel %vm1182_vm5, %v6866_v46, 0.0 }
 0xcc1   : > { %5316 = vpow2.f32 %v3025_v23  ;;  %v3014_v37 = vsub.f32 %v6821_v51, %v3006_v13  ;;  %3342 = vadd.xlane.f32.xlu0 %v3341_v38 }
 0xcc2   : > { %v6873_v19 = vpop.eup %5304  ;;  %5318 = vpow2.f32 %v3027_v57 }
 0xcc3   : > { %v6875_v62 = vpop.eup %5306  ;;  %v3029_v1 = vmul.f32 1.442695, %v3014_v37  ;;  %v3344_v56 = vsel %vm1182_vm5, %v6873_v19, 0.0 }
 0xcc4   : > { %3345 = vadd.xlane.f32.xlu1 %v3344_v56  ;;  %v3031_v55 = vsel %vm1182_vm5, %v6875_v62, 0.0 }
 0xcc5   : > { %5320 = vpow2.f32 %v3029_v1  ;;  %3032 = vadd.xlane.f32.xlu0 %v3031_v55 }
 0xcc6   : > { %v6881_v2 = vpop.eup %5308 }
 0xcc7   : > { %v6883_v52 = vpop.eup %5310  ;;  %v3034_v51 = vsel %vm1182_vm5, %v6881_v2, 0.0 }
 0xcc8   : > { %3035 = vadd.xlane.f32.xlu1 %v3034_v51  ;;  %v3037_v29 = vsel %vm1182_vm5, %v6883_v52, 0.0 }
 0xcc9   : > { %3038 = vadd.xlane.f32.xlu0 %v3037_v29 }
 0xcca   : > { %v6889_v15 = vpop.eup %5312 }
 0xccb   : > { %v6891_v35 = vpop.eup %5314  ;;  %v3040_v42 = vsel %vm1182_vm5, %v6889_v15, 0.0 }
 0xccc   : > { %3041 = vadd.xlane.f32.xlu1 %v3040_v42  ;;  %v3043_v49 = vsel %vm1182_vm5, %v6891_v35, 0.0 }
 0xccd   : > { %3044 = vadd.xlane.f32.xlu0 %v3043_v49 }
 0xcce   : > { %v6897_v60 = vpop.eup %5316 }
 0xccf   : > { %v6899_v22 = vpop.eup %5318  ;;  %v3046_v53 = vsel %vm1182_vm5, %v6897_v60, 0.0 }
 0xcd0   : > { %3047 = vadd.xlane.f32.xlu1 %v3046_v53  ;;  %v3049_v34 = vsel %vm1182_vm5, %v6899_v22, 0.0 }
 0xcd1   : > { %3050 = vadd.xlane.f32.xlu0 %v3049_v34 }
 0xcd2   : > { %v6905_v63 = vpop.eup %5320 }
 0xcd3   : > { %v3052_v54 = vsel %vm1182_vm5, %v6905_v63, 0.0 }
 0xcd4   : > { %3053 = vadd.xlane.f32.xlu1 %v3052_v54 }
 0xd3d   : > { %v3325_v8 = vpop.xlane.xlu0 %3324 }
 0xd3e   : > { %5322 = vrcp.f32 %v3325_v8 }
 0xd41   : > { %v3328_v32 = vpop.xlane.xlu1 %3327 }
 0xd42   : > { %5324 = vrcp.f32 %v3328_v32  ;;  %v3331_v7 = vpop.xlane.xlu0 %3330 }
 0xd43   : > { %5326 = vrcp.f32 %v3331_v7 }
 0xd45   : > { %v3334_v30 = vpop.xlane.xlu1 %3333 }
 0xd46   : > { %5328 = vrcp.f32 %v3334_v30  ;;  %v3337_v24 = vpop.xlane.xlu0 %3336 }
 0xd47   : > { %5330 = vrcp.f32 %v3337_v24 }
 0xd49   : > { %v3340_v61 = vpop.xlane.xlu1 %3339 }
 0xd4a   : > { %5332 = vrcp.f32 %v3340_v61  ;;  %v3343_v3 = vpop.xlane.xlu0 %3342  ;;  %v5135_v61 = vld [vmem:[#allocation4 + $0x10] sm:$0xff]  }
 0xd4b   : > { %5334 = vrcp.f32 %v3343_v3  ;;  %v5323_v44 = vpop.eup %5322 }
 0xd4c   : > { %v3348_v21 = vmul.f32 %v5323_v44, %v6838_v36 }
 0xd4d   : > { %v3346_v10 = vpop.xlane.xlu1 %3345 }
 0xd4e   : > { %5336 = vrcp.f32 %v3346_v10  ;;  %v3033_v45 = vpop.xlane.xlu0 %3032 }
 0xd4f   : > { %v5325_v25 = vpop.eup %5324  ;;  %5338 = vrcp.f32 %v3033_v45 }
 0xd50   : > { %v3350_v39 = vmul.f32 %v5325_v25, %v6844_v16  ;;  %v5327_v41 = vpop.eup %5326 }
 0xd51   : > { %v3036_v4 = vpop.xlane.xlu1 %3035  ;;  %v3352_v47 = vmul.f32 %v5327_v41, %v6846_v11 }
 0xd52   : > { %5340 = vrcp.f32 %v3036_v4  ;;  %v3039_v20 = vpop.xlane.xlu0 %3038  ;;  %v3363_v33 = vpack.c.bf16 %v3350_v39, %v3348_v21 }
 0xd53   : > { %v5329_v43 = vpop.eup %5328  ;;  %5342 = vrcp.f32 %v3039_v20 }
 0xd54   : > { %v3354_v0 = vmul.f32 %v5329_v43, %v6854_v59  ;;  %4976 = vmatprep.mubr.msk.bf16.mxu1 %vm1182_vm5, %v3363_v33  ;;  %v5331_v23 = vpop.eup %5330 }
 0xd55   : > { %v3042_v57 = vpop.xlane.xlu1 %3041  ;;  %v3356_v16 = vmul.f32 %v5331_v23, %v6856_v26 }
 0xd56   : > { %v3364_v31 = vpack.c.bf16 %v3354_v0, %v3352_v47  ;;  %5344 = vrcp.f32 %v3042_v57  ;;  %v3045_v36 = vpop.xlane.xlu0 %3044 }
 0xd57   : > { %v5333_v13 = vpop.eup %5332  ;;  %5346 = vrcp.f32 %v3045_v36 }
 0xd58   : > { %4977 = vmatmul.mubr.msk.bf16.vlgmr.msra.gmra.mxu1 %vm1182_vm5, %v3364_v31  ;;  %v3358_v38 = vmul.f32 %v5333_v13, %v6864_v28  ;;  %v5335_v37 = vpop.eup %5334 }
 0xd59   : > { %4985 = vmatpush3.bf16.msra.mxu1 %v6714_v6  ;;  %v3048_v11 = vpop.xlane.xlu1 %3047  ;;  %v3360_v55 = vmul.f32 %v5335_v37, %v6866_v46 }
 0xd5a   : > { %5348 = vrcp.f32 %v3048_v11  ;;  %4986 = vmatprep.subr.bf16.mxu1 %v6664_v12  ;;  %v3051_v59 = vpop.xlane.xlu0 %3050  ;;  %v3365_v1 = vpack.c.bf16 %v3358_v38, %v3356_v16 }
 0xd5b   : > { %v5337_v56 = vpop.eup %5336  ;;  %5350 = vrcp.f32 %v3051_v59 }
 0xd5c   : > { %4980 = vmatprep.mubr.msk.bf16.mxu1 %vm1182_vm5, %v3365_v1  ;;  %v3362_v51 = vmul.f32 %v5337_v56, %v6873_v19  ;;  %v5339_v26 = vpop.eup %5338  ;;  %v4519_v56 = vld [vmem:[%s7242_s11 + $0x1] ss:$0 sm:$0xff] }
 0xd5d   : > { %4987 = vmatpush3.bf16.msra.mxu1 %v6664_v12  ;;  %v3054_v28 = vpop.xlane.xlu1 %3053  ;;  %v3056_v42 = vmul.f32 %v5339_v26, %v6875_v62 }
 0xd5e   : > { %5352 = vrcp.f32 %v3054_v28  ;;  %4988 = vmatprep.subr.bf16.mxu1 %v6650_v58  ;;  %v3366_v6 = vpack.c.bf16 %v3362_v51, %v3360_v55 }
 0xd5f   : > { %v5341_v29 = vpop.eup %5340 }
 0xd60   : > { %4981 = vmatmul.mubr.msk.bf16.gmra.mxu1 %vm1182_vm5, %v3366_v6  ;;  %v3058_v49 = vmul.f32 %v5341_v29, %v6881_v2  ;;  %v5343_v53 = vpop.eup %5342 }
 0xd61   : > { %4989 = vmatpush3.bf16.msra.mxu1 %v6650_v58  ;;  %v3060_v12 = vmul.f32 %v5343_v53, %v6883_v52 }
 0xd62   : > { %4990 = vmatprep.subr.bf16.mxu1 %v6653_v14  ;;  %v3071_v46 = vpack.c.bf16 %v3058_v49, %v3056_v42 }
 0xd63   : > { %v5345_v19 = vpop.eup %5344 }
 0xd64   : > { %v3062_v34 = vmul.f32 %v5345_v19, %v6889_v15  ;;  %4992 = vmatprep.mubr.msk.bf16.mxu1 %vm1182_vm5, %v3071_v46  ;;  %v5347_v54 = vpop.eup %5346 }
 0xd65   : > { %4991 = vmatpush3.bf16.msra.mxu1 %v6653_v14  ;;  %v3064_v2 = vmul.f32 %v5347_v54, %v6891_v35  ;;  %v5134_v14 = vld [vmem:[#allocation4 + $0x18] sm:$0xff]  }
 0xd66   : > { %v3072_v8 = vpack.c.bf16 %v3062_v34, %v3060_v12  ;;  %5000 = vmatprep.subr.bf16.mxu0 %v5134_v14 }
 0xd67   : > { %v5349_v62 = vpop.eup %5348  ;;  %5001 = vmatpush3.bf16.msra.mxu0 %v5134_v14 }
 0xd68   : > { %4993 = vmatmul.mubr.msk.bf16.vlgmr.msra.gmra.mxu1 %vm1182_vm5, %v3072_v8  ;;  %v3066_v58 = vmul.f32 %v5349_v62, %v6897_v60  ;;  %v5351_v32 = vpop.eup %5350  ;;  %5002 = vmatprep.subr.bf16.mxu0 %v5135_v61 }
 0xd69   : > { %v3068_v52 = vmul.f32 %v5351_v32, %v6899_v22 }
 0xd6a   : > { %v3073_v7 = vpack.c.bf16 %v3066_v58, %v3064_v2 }
 0xd6b   : > { %v5353_v30 = vpop.eup %5352  ;;  %5003 = vmatpush3.bf16.msra.mxu0 %v5135_v61 }
 0xd6c   : > { %4996 = vmatprep.mubr.msk.bf16.mxu1 %vm1182_vm5, %v3073_v7  ;;  %v3070_v15 = vmul.f32 %v5353_v30, %v6905_v63 }
 0xd6e   : > { %v3074_v24 = vpack.c.bf16 %v3070_v15, %v3068_v52 }
 0xd70   : > { %4997 = vmatmul.mubr.msk.bf16.gmra.mxu1 %vm1182_vm5, %v3074_v24 }
 0xe18   : > { %v4978_v35 = vpop.f32.mrf.mxu1 }
 0xe1a   : > { %v3413_v60 = vpop.f32.mrf.mxu1 }
 0xe1c   : > { %v4979_v3 = vpop.f32.mrf.mxu1 }
 0xe1e   : > { %v3416_v44 = vpop.f32.mrf.mxu1 }
 0xe20   : > { %v4982_v10 = vpop.f32.mrf.mxu1 }
 0xe22   : > { %v3429_v45 = vpop.f32.mrf.mxu1 }
 0xe24   : > { %v4983_v25 = vpop.f32.mrf.mxu1 }
 0xe26   : > { %v3432_v21 = vpop.f32.mrf.mxu1 }
 0xe28   : > { %v4994_v22 = vpop.f32.mrf.mxu1 }
 0xe29   : > { %v3499_v43 = vadd.f32 %v4994_v22, %v4978_v35 }
 0xe2a   : > { %v3490_v39 = vpop.f32.mrf.mxu1 }
 0xe2b   : > { %v3491_v20 = vadd.f32 %v3490_v39, %v3413_v60 }
 0xe2c   : > { %v4995_v63 = vpop.f32.mrf.mxu1 }
 0xe2d   : > { %v3502_v41 = vadd.f32 %v4995_v63, %v4979_v3 }
 0xe2e   : > { %v3493_v4 = vpop.f32.mrf.mxu1 }
 0xe2f   : > { %v3494_v33 = vadd.f32 %v3493_v4, %v3416_v44  ;;  %v3522_v23 = vpack.c.bf16 %v3502_v41, %v3499_v43 }
 0xe30   : > { %v4998_v47 = vpop.f32.mrf.mxu1 }
 0xe31   : > { %v3521_v0 = vpack.c.bf16 %v3494_v33, %v3491_v20  ;;  %v3515_v37 = vadd.f32 %v4998_v47, %v4982_v10 }
 0xe32   : > { %v3506_v57 = vpop.f32.mrf.mxu1 }
 0xe33   : > { %5004 = vmatprep.mubr.msk.bf16.mxu0 %vm643_vm0, %v3521_v0  ;;  %v3507_v16 = vadd.f32 %v3506_v57, %v3429_v45 }
 0xe34   : > { %v4999_v31 = vpop.f32.mrf.mxu1  ;;  %5005 = vmatmul.mubr.msk.bf16.vlgmr.msra.gmra.mxu0 %vm643_vm0, %v3522_v23 }
 0xe35   : > { %v3518_v36 = vadd.f32 %v4999_v31, %v4983_v25 }
 0xe36   : > { %v3509_v13 = vpop.f32.mrf.mxu1 }
 0xe37   : > { %v3510_v38 = vadd.f32 %v3509_v13, %v3432_v21  ;;  %v3524_v59 = vpack.c.bf16 %v3518_v36, %v3515_v37 }
 0xe39   : > { %v3523_v11 = vpack.c.bf16 %v3510_v38, %v3507_v16 }
 0xe3b   : > { %5008 = vmatprep.mubr.msk.bf16.mxu0 %vm643_vm0, %v3523_v11 }
 0xe3c   : > { %5009 = vmatmul.mubr.msk.bf16.gmra.mxu0 %vm643_vm0, %v3524_v59 }
 0xef4   : > { %v5006_v1 = vpop.f32.mrf.mxu0 }
 0xef5   : > { %v3605_v51 = vadd.f32 %v5006_v1, %v4519_v56 }
 0xef6   : > { %v3596_v55 = vpop.f32.mrf.mxu0 }
 0xef7   : > { %v3597_v26 = vadd.f32 %v4519_v56, %v3596_v55  ;;  %v6951_v49 = vadd.f32 %v3605_v51, %v6449_v5 }
 0xef8   : > { %v5007_v28 = vpop.f32.mrf.mxu0 }
 0xef9   : > { %v6948_v6 = vadd.f32 %v3597_v26, %v6446_v17  ;;  %v3608_v29 = vadd.f32 %v5007_v28, %v4519_v56  ;;  %v3645_v5 = vsel %vm643_vm0, %v6951_v49, 0.0 }
 0xefa   : > { %v3599_v42 = vpop.f32.mrf.mxu0 }
 0xefb   : > { %v3600_v53 = vadd.f32 %v4519_v56, %v3599_v42  ;;  %v3639_v46 = vsel %vm643_vm0, %v6948_v6, 0.0  ;;  %v6959_v34 = vadd.f32 %v3608_v29, %v6457_v48 }
 0xefc   : > { %3640 = vadd.xlane.f32.xlu0 %v3639_v46  ;;  %v5010_v19 = vpop.f32.mrf.mxu0  ;;  %v5136_v46 = vld [vmem:[#allocation6 + $0x18] sm:$0xff]  }
 0xefd   : > { %v6956_v12 = vadd.f32 %v3600_v53, %v6454_v9  ;;  %v3621_v17 = vadd.f32 %v5010_v19, %v4519_v56  ;;  %v3648_v48 = vsel %vm643_vm0, %v6959_v34, 0.0  ;;  %5012 = vmatprep.subr.bf16.mxu1 %v5136_v46  ;;  %v5137_v19 = vld [vmem:[#allocation6 + $0x10] sm:$0xff]  }
 0xefe   : > { %v3612_v54 = vpop.f32.mrf.mxu0  ;;  %5013 = vmatpush3.bf16.msra.mxu1 %v5136_v46 }
 0xeff   : > { %v3613_v8 = vadd.f32 %v4519_v56, %v3612_v54  ;;  %v3642_v62 = vsel %vm643_vm0, %v6956_v12, 0.0  ;;  %v6971_v32 = vadd.f32 %v3621_v17, %v6469_v27  ;;  %5014 = vmatprep.subr.bf16.mxu1 %v5137_v19 }
 0xf00   : > { %3643 = vadd.xlane.f32.xlu1 %v3642_v62  ;;  %3646 = vadd.xlane.f32.xlu0 %v3645_v5  ;;  %v5011_v2 = vpop.f32.mrf.mxu0 }
 0xf01   : > { %v6966_v58 = vadd.f32 %v3613_v8, %v6466_v40  ;;  %v3624_v7 = vadd.f32 %v5011_v2, %v4519_v56  ;;  %v3657_v27 = vsel %vm643_vm0, %v6971_v32, 0.0 }
 0xf02   : > { %v3615_v9 = vpop.f32.mrf.mxu0  ;;  %5015 = vmatpush3.bf16.msra.mxu1 %v5137_v19 }
 0xf03   : > { %v3616_v30 = vadd.f32 %v4519_v56, %v3615_v9  ;;  %v3651_v52 = vsel %vm643_vm0, %v6966_v58, 0.0  ;;  %v6979_v40 = vadd.f32 %v3624_v7, %v6477_v18 }
 0xf04   : > { %3649 = vadd.xlane.f32.xlu1 %v3648_v48  ;;  %3652 = vadd.xlane.f32.xlu0 %v3651_v52 }
 0xf05   : > { %v6976_v15 = vadd.f32 %v3616_v30, %v6474_v50  ;;  %v3660_v14 = vsel %vm643_vm0, %v6979_v40, 0.0 }
 0xf07   : > { %v3654_v24 = vsel %vm643_vm0, %v6976_v15, 0.0 }
 0xf08   : > { %3655 = vadd.xlane.f32.xlu1 %v3654_v24  ;;  %3658 = vadd.xlane.f32.xlu0 %v3657_v27 }
 0xf0c   : > { %3661 = vadd.xlane.f32.xlu1 %v3660_v14 }
 0xf85   : > { %v3641_v61 = vpop.xlane.xlu0 %3640 }
 0xf86   : > { %v3663_v35 = vmul.f32 0.03125, %v3641_v61 }
 0xf88   : > { %v6988_v50 = vsub.f32 %v6948_v6, %v3663_v35 }
 0xf89   : > { %v3644_v60 = vpop.xlane.xlu1 %3643  ;;  %v3647_v18 = vpop.xlane.xlu0 %3646 }
 0xf8a   : > { %v3664_v3 = vmul.f32 0.03125, %v3644_v60  ;;  %v3665_v44 = vmul.f32 0.03125, %v3647_v18  ;;  %v3679_v10 = vmul.f32 %v6988_v50, %v6988_v50 }
 0xf8c   : > { %v6993_v45 = vsub.f32 %v6956_v12, %v3664_v3  ;;  %v6996_v25 = vsub.f32 %v6951_v49, %v3665_v44  ;;  %v3687_v21 = vsel %vm643_vm0, %v3679_v10, 0.0 }
 0xf8d   : > { %v3650_v22 = vpop.xlane.xlu1 %3649  ;;  %3688 = vadd.xlane.f32.xlu0 %v3687_v21  ;;  %v3653_v39 = vpop.xlane.xlu0 %3652 }
 0xf8e   : > { %v3666_v63 = vmul.f32 0.03125, %v3650_v22  ;;  %v3667_v41 = vmul.f32 0.03125, %v3653_v39  ;;  %v3680_v4 = vmul.f32 %v6993_v45, %v6993_v45  ;;  %v3681_v20 = vmul.f32 %v6996_v25, %v6996_v25 }
 0xf90   : > { %v7004_v33 = vsub.f32 %v6959_v34, %v3666_v63  ;;  %v7007_v43 = vsub.f32 %v6966_v58, %v3667_v41  ;;  %v3690_v47 = vsel %vm643_vm0, %v3680_v4, 0.0  ;;  %v3693_v0 = vsel %vm643_vm0, %v3681_v20, 0.0  ;;  %v4528_v4 = vld [vmem:[%s7243_s12 + $0x1] ss:$0 sm:$0xff] }
 0xf91   : > { %3691 = vadd.xlane.f32.xlu1 %v3690_v47  ;;  %v3656_v23 = vpop.xlane.xlu1 %3655  ;;  %3694 = vadd.xlane.f32.xlu0 %v3693_v0  ;;  %v3659_v57 = vpop.xlane.xlu0 %3658 }
 0xf92   : > { %v3668_v31 = vmul.f32 0.03125, %v3656_v23  ;;  %v3669_v36 = vmul.f32 0.03125, %v3659_v57  ;;  %v3682_v13 = vmul.f32 %v7004_v33, %v7004_v33  ;;  %v3683_v16 = vmul.f32 %v7007_v43, %v7007_v43 }
 0xf94   : > { %v7016_v38 = vsub.f32 %v6976_v15, %v3668_v31  ;;  %v7019_v37 = vsub.f32 %v6971_v32, %v3669_v36  ;;  %v3696_v11 = vsel %vm643_vm0, %v3682_v13, 0.0  ;;  %v3699_v59 = vsel %vm643_vm0, %v3683_v16, 0.0  ;;  %v4529_v31 = vld [vmem:[%s7244_s13 + $0x1] ss:$0 sm:$0xff] }
 0xf95   : > { %3697 = vadd.xlane.f32.xlu1 %v3696_v11  ;;  %v3662_v1 = vpop.xlane.xlu1 %3661  ;;  %3700 = vadd.xlane.f32.xlu0 %v3699_v59 }
 0xf96   : > { %v3670_v56 = vmul.f32 0.03125, %v3662_v1  ;;  %v3684_v55 = vmul.f32 %v7016_v38, %v7016_v38  ;;  %v3685_v51 = vmul.f32 %v7019_v37, %v7019_v37 }
 0xf98   : > { %v7028_v26 = vsub.f32 %v6979_v40, %v3670_v56  ;;  %v3702_v28 = vsel %vm643_vm0, %v3684_v55, 0.0  ;;  %v3705_v29 = vsel %vm643_vm0, %v3685_v51, 0.0 }
 0xf99   : > { %3703 = vadd.xlane.f32.xlu1 %v3702_v28  ;;  %3706 = vadd.xlane.f32.xlu0 %v3705_v29 }
 0xf9a   : > { %v3686_v42 = vmul.f32 %v7028_v26, %v7028_v26 }
 0xf9c   : > { %v3708_v53 = vsel %vm643_vm0, %v3686_v42, 0.0 }
 0xf9d   : > { %3709 = vadd.xlane.f32.xlu1 %v3708_v53 }
0x1016   : > { %v3689_v54 = vpop.xlane.xlu0 %3688 }
0x1017   : > { %v3711_v17 = vmul.f32 0.03125, %v3689_v54 }
0x1019   : > { %v3719_v8 = vadd.f32 1e-05, %v3711_v17 }
0x101a   : > { %v3692_v62 = vpop.xlane.xlu1 %3691  ;;  %v3695_v5 = vpop.xlane.xlu0 %3694 }
0x101b   : > { %5354 = vrsqrt.f32 %v3719_v8  ;;  %v3712_v2 = vmul.f32 0.03125, %v3692_v62  ;;  %v3713_v9 = vmul.f32 0.03125, %v3695_v5 }
0x101d   : > { %v3720_v48 = vadd.f32 1e-05, %v3712_v2  ;;  %v3721_v7 = vadd.f32 1e-05, %v3713_v9 }
0x101e   : > { %v3698_v30 = vpop.xlane.xlu1 %3697  ;;  %v3701_v52 = vpop.xlane.xlu0 %3700 }
0x101f   : > { %5356 = vrsqrt.f32 %v3720_v48  ;;  %v3714_v24 = vmul.f32 0.03125, %v3698_v30  ;;  %v3715_v27 = vmul.f32 0.03125, %v3701_v52  ;;  %v5141_v30 = vld [vmem:[%s7247_s16 + $0x60] sm:$0xff]   ;;  %v5142_v52 = vld [vmem:[%s7247_s16 + $0x58] sm:$0xff]  }
0x1020   : > { %5358 = vrsqrt.f32 %v3721_v7  ;;  %v5140_v7 = vld [vmem:[%s7247_s16 + $0x68] sm:$0xff]  }
0x1021   : > { %v3722_v14 = vadd.f32 1e-05, %v3714_v24  ;;  %v3723_v61 = vadd.f32 1e-05, %v3715_v27  ;;  %v5143_v24 = vld [vmem:[%s7247_s16 + $0x50] sm:$0xff]   ;;  %v5144_v27 = vld [vmem:[%s7247_s16 + $0x48] sm:$0xff]  }
0x1022   : > { %v3704_v35 = vpop.xlane.xlu1 %3703  ;;  %v3707_v60 = vpop.xlane.xlu0 %3706 }
0x1023   : > { %5360 = vrsqrt.f32 %v3722_v14  ;;  %v3716_v18 = vmul.f32 0.03125, %v3704_v35  ;;  %v3717_v3 = vmul.f32 0.03125, %v3707_v60  ;;  %v5145_v14 = vld [vmem:[%s7247_s16 + $0x40] sm:$0xff]  }
0x1024   : > { %5362 = vrsqrt.f32 %v3723_v61  ;;  %v4531_v61 = vld [vmem:[%s7246_s15 + $0x1] ss:$0 sm:$0xff] }
0x1025   : > { %v3724_v44 = vadd.f32 1e-05, %v3716_v18  ;;  %v3725_v10 = vadd.f32 1e-05, %v3717_v3 }
0x1026   : > { %v3710_v21 = vpop.xlane.xlu1 %3709 }
0x1027   : > { %5364 = vrsqrt.f32 %v3724_v44  ;;  %v3718_v22 = vmul.f32 0.03125, %v3710_v21 }
0x1028   : > { %v5355_v39 = vpop.eup %5354  ;;  %5366 = vrsqrt.f32 %v3725_v10 }
0x1029   : > { %v3726_v63 = vadd.f32 1e-05, %v3718_v22  ;;  %v3735_v41 = vmul.f32 %v5355_v39, %v6988_v50 }
0x102b   : > { %5368 = vrsqrt.f32 %v3726_v63  ;;  %v3749_v23 = vmul.f32 %v4528_v4, %v3735_v41 }
0x102c   : > { %v5357_v20 = vpop.eup %5356 }
0x102d   : > { %v5359_v47 = vpop.eup %5358  ;;  %v3736_v0 = vmul.f32 %v5357_v20, %v6993_v45  ;;  %v3763_v59 = vadd.f32 %v4529_v31, %v3749_v23 }
0x102e   : > { %v3737_v57 = vmul.f32 %v5359_v47, %v6996_v25 }
0x102f   : > { %v3750_v36 = vmul.f32 %v4528_v4, %v3736_v0 }
0x1030   : > { %v5361_v13 = vpop.eup %5360  ;;  %v3751_v50 = vmul.f32 %v4528_v4, %v3737_v57 }
0x1031   : > { %v5363_v16 = vpop.eup %5362  ;;  %v3738_v11 = vmul.f32 %v5361_v13, %v7004_v33  ;;  %v3764_v1 = vadd.f32 %v4529_v31, %v3750_v36 }
0x1032   : > { %v3739_v56 = vmul.f32 %v5363_v16, %v7007_v43  ;;  %v3765_v25 = vadd.f32 %v4529_v31, %v3751_v50 }
0x1033   : > { %v3752_v55 = vmul.f32 %v4528_v4, %v3738_v11  ;;  %v3771_v51 = vpack.c.bf16 %v3764_v1, %v3763_v59 }
0x1034   : > { %v5365_v45 = vpop.eup %5364  ;;  %v3753_v53 = vmul.f32 %v4528_v4, %v3739_v56 }
0x1035   : > { %v5367_v28 = vpop.eup %5366  ;;  %5016 = vmatprep.mubr.msk.bf16.mxu1 %vm643_vm0, %v3771_v51  ;;  %v3766_v29 = vadd.f32 %v4529_v31, %v3752_v55  ;;  %v3740_v42 = vmul.f32 %v5365_v45, %v7016_v38 }
0x1036   : > { %v3741_v46 = vmul.f32 %v5367_v28, %v7019_v37  ;;  %v3767_v17 = vadd.f32 %v4529_v31, %v3753_v53  ;;  %v5138_v37 = vld [vmem:[%s7247_s16 + $0x78] sm:$0xff]  }
0x1037   : > { %v3772_v19 = vpack.c.bf16 %v3766_v29, %v3765_v25  ;;  %v3754_v54 = vmul.f32 %v4528_v4, %v3740_v42  ;;  %5024 = vmatprep.subr.bf16.mxu0 %v5138_v37 }
0x1038   : > { %v5369_v33 = vpop.eup %5368  ;;  %v3755_v62 = vmul.f32 %v4528_v4, %v3741_v46  ;;  %5025 = vmatpush3.bf16.msra.mxu0 %v5138_v37 }
0x1039   : > { %5017 = vmatmul.mubr.msk.bf16.vlgmr.msra.gmra.mxu1 %vm643_vm0, %v3772_v19  ;;  %v3768_v43 = vadd.f32 %v4529_v31, %v3754_v54  ;;  %v3742_v8 = vmul.f32 %v5369_v33, %v7028_v26  ;;  %v5139_v26 = vld [vmem:[%s7247_s16 + $0x70] sm:$0xff]  }
0x103a   : > { %v3769_v9 = vadd.f32 %v4529_v31, %v3755_v62  ;;  %5026 = vmatprep.subr.bf16.mxu0 %v5139_v26 }
0x103b   : > { %v3773_v5 = vpack.c.bf16 %v3768_v43, %v3767_v17  ;;  %v3756_v2 = vmul.f32 %v4528_v4, %v3742_v8 }
0x103c   : > { %5027 = vmatpush3.bf16.msra.mxu0 %v5139_v26 }
0x103d   : > { %5020 = vmatprep.mubr.msk.bf16.mxu1 %vm643_vm0, %v3773_v5  ;;  %v3770_v48 = vadd.f32 %v4529_v31, %v3756_v2  ;;  %5028 = vmatprep.subr.bf16.mxu0 %v5140_v7 }
0x103f   : > { %v3774_v38 = vpack.c.bf16 %v3770_v48, %v3769_v9 }
0x1040   : > { %5029 = vmatpush3.bf16.msra.mxu0 %v5140_v7 }
0x1041   : > { %5021 = vmatmul.mubr.msk.bf16.gmra.mxu1 %vm643_vm0, %v3774_v38  ;;  %5030 = vmatprep.subr.bf16.mxu0 %v5141_v30 }
0x1044   : > { %5031 = vmatpush3.bf16.msra.mxu0 %v5141_v30 }
0x1045   : > { %5032 = vmatprep.subr.bf16.mxu0 %v5142_v52 }
0x1048   : > { %5033 = vmatpush3.bf16.msra.mxu0 %v5142_v52 }
0x1049   : > { %5034 = vmatprep.subr.bf16.mxu0 %v5143_v24 }
0x104c   : > { %5035 = vmatpush3.bf16.msra.mxu0 %v5143_v24 }
0x104d   : > { %5036 = vmatprep.subr.bf16.mxu0 %v5144_v27 }
0x1050   : > { %5037 = vmatpush3.bf16.msra.mxu0 %v5144_v27 }
0x1051   : > { %5038 = vmatprep.subr.bf16.mxu0 %v5145_v14 }
0x1054   : > { %5039 = vmatpush3.bf16.msra.mxu0 %v5145_v14 }
0x10f9   : > { %v5018_v35 = vpop.f32.mrf.mxu1 }
0x10fa   : > { %v7080_v60 = vadd.f32 %v5018_v35, %v4531_v61 }
0x10fb   : > { %v3846_v18 = vpop.f32.mrf.mxu1 }
0x10fc   : > { %v7083_v3 = vmul.f32 0.70710677, %v7080_v60  ;;  %v7085_v44 = vadd.f32 %v4531_v61, %v3846_v18 }
0x10fd   : > { %v5019_v10 = vpop.f32.mrf.mxu1 }
0x10fe   : > { %v3895_v21 = vand.u32 2147483647, %v7083_v3  ;;  %v7089_v22 = vmul.f32 0.70710677, %v7085_v44  ;;  %v7091_v39 = vadd.f32 %v5019_v10, %v4531_v61  ;;  %vm4055_vm14 = vcmp.ge.f32.partialorder %v7083_v3, 0.0 }
0x10ff   : > { %v3849_v63 = vpop.f32.mrf.mxu1 }
0x1100   : > { %v3903_v41 = vmul.f32 0.3275911, %v3895_v21  ;;  %v3893_v4 = vand.u32 2147483647, %v7089_v22  ;;  %v7095_v20 = vmul.f32 0.70710677, %v7091_v39  ;;  %v7097_v47 = vadd.f32 %v4531_v61, %v3849_v63 }
0x1101   : > { %v5022_v0 = vpop.f32.mrf.mxu1  ;;  %v4007_v28 = vmul.f32 %v3895_v21, %v3895_v21  ;;  %vm4053_vm15 = vcmp.ge.f32.partialorder %v7089_v22, 0.0 }
0x1102   : > { %v3911_v23 = vadd.f32 1.0, %v3903_v41  ;;  %v3901_v57 = vmul.f32 0.3275911, %v3893_v4  ;;  %v3896_v31 = vand.u32 2147483647, %v7095_v20  ;;  %v7104_v1 = vadd.f32 %v5022_v0, %v4531_v61 }
0x1103   : > { %v7101_v36 = vmul.f32 0.70710677, %v7097_v47  ;;  %v3862_v13 = vpop.f32.mrf.mxu1  ;;  %v4005_v46 = vmul.f32 %v3893_v4, %v3893_v4  ;;  %v4015_v17 = vsub.f32 0.0, %v4007_v28  ;;  %vm4056_vm1 = vcmp.ge.f32.partialorder %v7095_v20, 0.0 }
0x1104   : > { %5370 = vrcp.f32 %v3911_v23  ;;  %v3909_v16 = vadd.f32 1.0, %v3901_v57  ;;  %v3904_v50 = vmul.f32 0.3275911, %v3896_v31  ;;  %v7106_v56 = vadd.f32 %v4531_v61, %v3862_v13 }
0x1105   : > { %v3894_v11 = vand.u32 2147483647, %v7101_v36  ;;  %v5023_v59 = vpop.f32.mrf.mxu1  ;;  %v7109_v45 = vmul.f32 0.70710677, %v7104_v1  ;;  %v4013_v5 = vsub.f32 0.0, %v4005_v46  ;;  %v4008_v2 = vmul.f32 %v3896_v31, %v3896_v31 }
0x1106   : > { %5372 = vrcp.f32 %v3909_v16  ;;  %v3912_v55 = vadd.f32 1.0, %v3904_v50  ;;  %v7113_v53 = vmul.f32 0.70710677, %v7106_v56  ;;  %v7115_v19 = vadd.f32 %v5023_v59, %v4531_v61 }
0x1107   : > { %v3902_v51 = vmul.f32 0.3275911, %v3894_v11  ;;  %v3865_v29 = vpop.f32.mrf.mxu1  ;;  %v3899_v42 = vand.u32 2147483647, %v7109_v45  ;;  %v4025_v26 = vmul.f32 1.442695, %v4015_v17  ;;  %v4006_v7 = vmul.f32 %v3894_v11, %v3894_v11 }
0x1108   : > { %5374 = vrcp.f32 %v3912_v55  ;;  %v7117_v33 = vadd.f32 %v4531_v61, %v3865_v29  ;;  %v3897_v43 = vand.u32 2147483647, %v7113_v53  ;;  %v7121_v8 = vmul.f32 0.70710677, %v7115_v19 }
0x1109   : > { %v3910_v25 = vadd.f32 1.0, %v3902_v51  ;;  %v3907_v54 = vmul.f32 0.3275911, %v3899_v42  ;;  %v4021_v14 = vmul.f32 1.442695, %v4013_v5  ;;  %v4016_v61 = vsub.f32 0.0, %v4008_v2 }
0x110a   : > { %v3905_v9 = vmul.f32 0.3275911, %v3897_v43  ;;  %v3900_v48 = vand.u32 2147483647, %v7121_v8  ;;  %v7125_v38 = vmul.f32 0.70710677, %v7117_v33  ;;  %v4011_v21 = vmul.f32 %v3899_v42, %v3899_v42 }
0x110b   : > { %5376 = vrcp.f32 %v3910_v25  ;;  %v3915_v62 = vadd.f32 1.0, %v3907_v54  ;;  %v4014_v4 = vsub.f32 0.0, %v4006_v7  ;;  %v4009_v57 = vmul.f32 %v3897_v43, %v3897_v43 }
0x110c   : > { %v3913_v30 = vadd.f32 1.0, %v3905_v9  ;;  %v3908_v52 = vmul.f32 0.3275911, %v3900_v48  ;;  %v3898_v27 = vand.u32 2147483647, %v7125_v38  ;;  %v4019_v59 = vsub.f32 0.0, %v4011_v21 }
0x110d   : > { %5378 = vrcp.f32 %v3915_v62  ;;  %v4027_v50 = vmul.f32 1.442695, %v4016_v61  ;;  %v4023_v25 = vmul.f32 1.442695, %v4014_v4  ;;  %v4012_v29 = vmul.f32 %v3900_v48, %v3900_v48 }
0x110e   : > { %5380 = vrcp.f32 %v3913_v30  ;;  %v3916_v35 = vadd.f32 1.0, %v3908_v52  ;;  %v3906_v63 = vmul.f32 0.3275911, %v3898_v27  ;;  %v4017_v54 = vsub.f32 0.0, %v4009_v57 }
0x110f   : > { %5382 = vpow2.f32 %v4025_v26  ;;  %v4033_v2 = vmul.f32 1.442695, %v4019_v59  ;;  %v4020_v30 = vsub.f32 0.0, %v4012_v29  ;;  %v3880_v20 = vmul.f32 0.5, %v7091_v39 }
0x1110   : > { %5384 = vrcp.f32 %v3916_v35  ;;  %v3914_v31 = vadd.f32 1.0, %v3906_v63  ;;  %vm4054_vm2 = vcmp.ge.f32.partialorder %v7101_v36, 0.0  ;;  %vm4057_vm3 = vcmp.ge.f32.partialorder %v7113_v53, 0.0 }
0x1111   : > { %v7127_v37 = vpop.eup %5370  ;;  %5386 = vpow2.f32 %v4021_v14  ;;  %v4029_v14 = vmul.f32 1.442695, %v4017_v54  ;;  %vm4060_vm4 = vcmp.ge.f32.partialorder %v7121_v8, 0.0  ;;  %vm4059_vm5 = vcmp.ge.f32.partialorder %v7109_v45, 0.0 }
0x1112   : > { %v3935_v24 = vmul.f32 1.0614054, %v7127_v37  ;;  %5388 = vrcp.f32 %v3914_v31  ;;  %vm4058_vm6 = vcmp.ge.f32.partialorder %v7125_v38, 0.0  ;;  %v3881_v53 = vmul.f32 0.5, %v7106_v56 }
0x1113   : > { %v7131_v18 = vpop.eup %5372  ;;  %5390 = vpow2.f32 %v4027_v50  ;;  %v3882_v8 = vmul.f32 0.5, %v7117_v33  ;;  %v3883_v45 = vmul.f32 0.5, %v7104_v1 }
0x1114   : > { %v3943_v10 = vadd.f32 -1.4531521, %v3935_v24  ;;  %v3933_v41 = vmul.f32 1.0614054, %v7131_v18  ;;  %5392 = vpow2.f32 %v4023_v25 }
0x1115   : > { %v7134_v0 = vpop.eup %5374  ;;  %5394 = vpow2.f32 %v4033_v2 }
0x1116   : > { %v3951_v23 = vmul.f32 %v7127_v37, %v3943_v10  ;;  %v3941_v13 = vadd.f32 -1.4531521, %v3933_v41  ;;  %v3936_v16 = vmul.f32 1.0614054, %v7134_v0  ;;  %v4010_v10 = vmul.f32 %v3898_v27, %v3898_v27 }
0x1117   : > { %5396 = vpow2.f32 %v4029_v14 }
0x1118   : > { %v3959_v11 = vadd.f32 1.4214138, %v3951_v23  ;;  %v7138_v55 = vpop.eup %5376  ;;  %v3949_v51 = vmul.f32 %v7131_v18, %v3941_v13  ;;  %v3944_v28 = vadd.f32 -1.4531521, %v3936_v16  ;;  %v4035_v13 = vmul.f32 1.442695, %v4020_v30 }
0x1119   : > { %v3934_v46 = vmul.f32 1.0614054, %v7138_v55  ;;  %v4018_v29 = vsub.f32 0.0, %v4010_v10 }
0x111a   : > { %v3967_v42 = vmul.f32 %v7127_v37, %v3959_v11  ;;  %v3957_v17 = vadd.f32 1.4214138, %v3949_v51  ;;  %v3952_v43 = vmul.f32 %v7134_v0, %v3944_v28  ;;  %v7144_v9 = vpop.eup %5378  ;;  %5398 = vpow2.f32 %v4035_v13 }
0x111b   : > { %v3942_v5 = vadd.f32 -1.4531521, %v3934_v46  ;;  %v3939_v24 = vmul.f32 1.0614054, %v7144_v9  ;;  %v7151_v21 = vpop.eup %5380 }
0x111c   : > { %v3975_v62 = vadd.f32 -0.28449672, %v3967_v42  ;;  %v3965_v26 = vmul.f32 %v7131_v18, %v3957_v17  ;;  %v3960_v7 = vadd.f32 1.4214138, %v3952_v43  ;;  %v3937_v31 = vmul.f32 1.0614054, %v7151_v21  ;;  %v5383_v16 = vpop.eup %5382 }
0x111d   : > { %v3950_v52 = vmul.f32 %v7138_v55, %v3942_v5  ;;  %v3947_v4 = vadd.f32 -1.4531521, %v3939_v24  ;;  %v7158_v27 = vpop.eup %5384 }
0x111e   : > { %v3983_v48 = vmul.f32 %v7127_v37, %v3975_v62  ;;  %v3973_v61 = vadd.f32 -0.28449672, %v3965_v26  ;;  %v3968_v35 = vmul.f32 %v7134_v0, %v3960_v7  ;;  %v3945_v25 = vadd.f32 -1.4531521, %v3937_v31  ;;  %v5387_v42 = vpop.eup %5386 }
0x111f   : > { %v3958_v41 = vadd.f32 1.4214138, %v3950_v52  ;;  %v3955_v59 = vmul.f32 %v7144_v9, %v3947_v4  ;;  %v3940_v43 = vmul.f32 1.0614054, %v7158_v27  ;;  %v7162_v62 = vpop.eup %5388 }
0x1120   : > { %v3991_v63 = vadd.f32 0.2548296, %v3983_v48  ;;  %v3981_v23 = vmul.f32 %v7131_v18, %v3973_v61  ;;  %v3976_v57 = vadd.f32 -0.28449672, %v3968_v35  ;;  %v3953_v2 = vmul.f32 %v7151_v21, %v3945_v25  ;;  %v5391_v35 = vpop.eup %5390 }
0x1121   : > { %v3966_v11 = vmul.f32 %v7138_v55, %v3958_v41  ;;  %v3963_v17 = vadd.f32 1.4214138, %v3955_v59  ;;  %v3948_v48 = vadd.f32 -1.4531521, %v3940_v43  ;;  %v3938_v61 = vmul.f32 1.0614054, %v7162_v62  ;;  %v5393_v13 = vpop.eup %5392 }
0x1122   : > { %v3999_v50 = vmul.f32 %v7127_v37, %v3991_v63  ;;  %v3989_v51 = vadd.f32 0.2548296, %v3981_v23  ;;  %v3984_v28 = vmul.f32 %v7134_v0, %v3976_v57  ;;  %v3961_v14 = vadd.f32 1.4214138, %v3953_v2 }
0x1123   : > { %v3974_v54 = vadd.f32 -0.28449672, %v3966_v11  ;;  %v3971_v30 = vmul.f32 %v7144_v9, %v3963_v17  ;;  %v4031_v41 = vmul.f32 1.442695, %v4018_v29  ;;  %v3946_v31 = vadd.f32 -1.4531521, %v3938_v61 }
0x1124   : > { %v4039_v46 = vmul.f32 %v5383_v16, %v3999_v50  ;;  %v3997_v37 = vmul.f32 %v7131_v18, %v3989_v51  ;;  %v3992_v5 = vadd.f32 0.2548296, %v3984_v28  ;;  %v3956_v18 = vmul.f32 %v7158_v27, %v3948_v48 }
0x1125   : > { %v3982_v7 = vmul.f32 %v7138_v55, %v3974_v54  ;;  %v3979_v63 = vadd.f32 -0.28449672, %v3971_v30  ;;  %v3969_v57 = vmul.f32 %v7151_v21, %v3961_v14  ;;  %v5395_v54 = vpop.eup %5394  ;;  %5400 = vpow2.f32 %v4031_v41 }
0x1126   : > { %v4047_v26 = vsub.f32 1.0, %v4039_v46  ;;  %v4037_v52 = vmul.f32 %v5387_v42, %v3997_v37  ;;  %v4000_v24 = vmul.f32 %v7134_v0, %v3992_v5  ;;  %v3964_v11 = vadd.f32 1.4214138, %v3956_v18 }
0x1127   : > { %v3990_v10 = vadd.f32 0.2548296, %v3982_v7  ;;  %v3987_v0 = vmul.f32 %v7144_v9, %v3979_v63  ;;  %v3977_v28 = vadd.f32 -0.28449672, %v3969_v57  ;;  %v3954_v46 = vmul.f32 %v7162_v62, %v3946_v31  ;;  %v5397_v7 = vpop.eup %5396 }
0x1128   : > { %v4045_v4 = vsub.f32 1.0, %v4037_v52  ;;  %v4040_v23 = vmul.f32 %v5391_v35, %v4000_v24  ;;  %v4063_v16 = vsub.f32 0.0, %v4047_v26  ;;  %v3972_v29 = vmul.f32 %v7158_v27, %v3964_v11 }
0x1129   : > { %v3998_v50 = vmul.f32 %v7138_v55, %v3990_v10  ;;  %v3995_v42 = vadd.f32 0.2548296, %v3987_v0  ;;  %v3985_v55 = vmul.f32 %v7151_v21, %v3977_v28  ;;  %v3962_v24 = vadd.f32 1.4214138, %v3954_v46  ;;  %v5399_v10 = vpop.eup %5398 }
0x112a   : > { %v4061_v59 = vsub.f32 0.0, %v4045_v4  ;;  %v4048_v51 = vsub.f32 1.0, %v4040_v23  ;;  %v4071_v43 = vsel %vm4055_vm14, %v4047_v26, %v4063_v16  ;;  %v3980_v2 = vadd.f32 -0.28449672, %v3972_v29 }
0x112b   : > { %v4038_v25 = vmul.f32 %v5393_v13, %v3998_v50  ;;  %v4003_v5 = vmul.f32 %v7144_v9, %v3995_v42  ;;  %v3993_v52 = vadd.f32 0.2548296, %v3985_v55  ;;  %v3878_v61 = vmul.f32 0.5, %v7097_v47 }
0x112c   : > { %v4064_v17 = vsub.f32 0.0, %v4048_v51  ;;  %v4069_v30 = vsel %vm4053_vm15, %v4045_v4, %v4061_v59  ;;  %v3988_v9 = vmul.f32 %v7158_v27, %v3980_v2  ;;  %v3970_v26 = vmul.f32 %v7162_v62, %v3962_v24 }
0x112d   : > { %v4046_v37 = vsub.f32 1.0, %v4038_v25  ;;  %v4001_v3 = vmul.f32 %v7151_v21, %v3993_v52  ;;  %v4079_v22 = vadd.f32 1.0, %v4071_v43  ;;  %v4077_v63 = vadd.f32 1.0, %v4069_v30 }
0x112e   : > { %v4072_v48 = vsel %vm4056_vm1, %v4048_v51, %v4064_v17  ;;  %v4043_v41 = vmul.f32 %v5395_v54, %v4003_v5  ;;  %v3996_v39 = vadd.f32 0.2548296, %v3988_v9  ;;  %v3978_v57 = vadd.f32 -0.28449672, %v3970_v26 }
0x112f   : > { %v4080_v14 = vadd.f32 1.0, %v4072_v48  ;;  %v4062_v35 = vsub.f32 0.0, %v4046_v37  ;;  %v4041_v23 = vmul.f32 %v5397_v7, %v4001_v3  ;;  %v3879_v47 = vmul.f32 0.5, %v7080_v60 }
0x1130   : > { %v3877_v31 = vmul.f32 0.5, %v7085_v44  ;;  %v4004_v16 = vmul.f32 %v7158_v27, %v3996_v39  ;;  %v3986_v50 = vmul.f32 %v7162_v62, %v3978_v57  ;;  %v4051_v11 = vsub.f32 1.0, %v4043_v41 }
0x1131   : > { %v4070_v18 = vsel %vm4054_vm2, %v4046_v37, %v4062_v35  ;;  %v4088_v36 = vmul.f32 %v4080_v14, %v3880_v20  ;;  %v4049_v21 = vsub.f32 1.0, %v4041_v23  ;;  %v4087_v59 = vmul.f32 %v4079_v22, %v3879_v47 }
0x1132   : > { %v4078_v4 = vadd.f32 1.0, %v4070_v18  ;;  %v4085_v0 = vmul.f32 %v4077_v63, %v3877_v31  ;;  %v4044_v51 = vmul.f32 %v5399_v10, %v4004_v16  ;;  %v3994_v28 = vadd.f32 0.2548296, %v3986_v50  ;;  %v5401_v54 = vpop.eup %5400 }
0x1133   : > { %v4094_v42 = vpack.c.bf16 %v4088_v36, %v4087_v59  ;;  %v4065_v29 = vsub.f32 0.0, %v4049_v21  ;;  %v4067_v44 = vsub.f32 0.0, %v4051_v11  ;;  %v3884_v48 = vmul.f32 0.5, %v7115_v19  ;;  %v4555_v19 = vld [vmem:[%s7248_s17 + $0x1] ss:$0 sm:$0xff] }
0x1134   : > { %v4086_v13 = vmul.f32 %v4078_v4, %v3878_v61  ;;  %v4052_v46 = vsub.f32 1.0, %v4044_v51  ;;  %v4002_v60 = vmul.f32 %v7162_v62, %v3994_v28 }
0x1135   : > { %v4073_v27 = vsel %vm4057_vm3, %v4049_v21, %v4065_v29  ;;  %v4075_v5 = vsel %vm4059_vm5, %v4051_v11, %v4067_v44 }
0x1136   : > { %v4093_v25 = vpack.c.bf16 %v4086_v13, %v4085_v0  ;;  %v4068_v17 = vsub.f32 0.0, %v4052_v46  ;;  %v4042_v55 = vmul.f32 %v5401_v54, %v4002_v60  ;;  %v4081_v30 = vadd.f32 1.0, %v4073_v27 }
0x1137   : > { %v4083_v62 = vadd.f32 1.0, %v4075_v5 }
0x1138   : > { %5040 = vmatprep.mubr.bf16.mxu0 %v4093_v25  ;;  %v4076_v43 = vsel %vm4060_vm4, %v4052_v46, %v4068_v17  ;;  %v4050_v37 = vsub.f32 1.0, %v4042_v55  ;;  %v4089_v14 = vmul.f32 %v4081_v30, %v3881_v53 }
0x1139   : > { %5041 = vmatmul.mubr.bf16.vlgmr.msra.gmra.mxu0 %v4094_v42  ;;  %v4084_v2 = vadd.f32 1.0, %v4076_v43  ;;  %v4091_v35 = vmul.f32 %v4083_v62, %v3883_v45 }
0x113a   : > { %v4066_v7 = vsub.f32 0.0, %v4050_v37 }
0x113b   : > { %v4092_v20 = vmul.f32 %v4084_v2, %v3884_v48 }
0x113c   : > { %v4074_v52 = vsel %vm4058_vm6, %v4050_v37, %v4066_v7 }
0x113d   : > { %v4082_v24 = vadd.f32 1.0, %v4074_v52  ;;  %v4096_v9 = vpack.c.bf16 %v4092_v20, %v4091_v35 }
0x113f   : > { %v4090_v61 = vmul.f32 %v4082_v24, %v3882_v8 }
0x1141   : > { %v4095_v3 = vpack.c.bf16 %v4090_v61, %v4089_v14 }
0x1143   : > { %5044 = vmatprep.mubr.bf16.mxu0 %v4095_v3 }
0x1144   : > { %5045 = vmatmul.mubr.bf16.gmra.mxu0 %v4096_v9 }
0x11f9   : > { %v5042_v38 = vpop.f32.mrf.mxu0 }
0x11fa   : > { %v4213_v26 = vadd.f32 %v5042_v38, %v4555_v19 }
0x11fb   : > { %v4204_v1 = vpop.f32.mrf.mxu0 }
0x11fc   : > { %v4237_v56 = vadd.f32 %v4213_v26, %v6951_v49  ;;  %v4205_v33 = vadd.f32 %v4555_v19, %v4204_v1 }
0x11fd   : > { %v5043_v10 = vpop.f32.mrf.mxu0 }
0x11fe   : > { %4245 = vst.msk [vmem:[%s619_s22 + $0x10] sm:$0xff] %vm643_vm0, %v4237_v56  ;;  %v4235_v22 = vadd.f32 %v4205_v33, %v6948_v6  ;;  %v4216_v63 = vadd.f32 %v5043_v10, %v4555_v19 }
0x11ff   : > { %v4207_v18 = vpop.f32.mrf.mxu0 }
0x1200   : > { %4243 = vst.msk [vmem:[%s619_s22] sm:$0xff] %vm643_vm0, %v4235_v22  ;;  %v4238_v41 = vadd.f32 %v4216_v63, %v6959_v34  ;;  %v4208_v4 = vadd.f32 %v4555_v19, %v4207_v18 }
0x1202   : > { %4246 = vst.msk [vmem:[%s619_s22 + $0x18] sm:$0xff] %vm643_vm0, %v4238_v41  ;;  %v4236_v23 = vadd.f32 %v4208_v4, %v6956_v12 }
0x1204   : > { %4244 = vst.msk [vmem:[%s619_s22 + $0x8] sm:$0xff] %vm643_vm0, %v4236_v23  ;;  %v5046_v49 = vpop.f32.mrf.mxu0 }
0x1205   : > { %v4229_v39 = vadd.f32 %v5046_v49, %v4555_v19 }
0x1206   : > { %v4220_v57 = vpop.f32.mrf.mxu0 }
0x1207   : > { %v4241_v47 = vadd.f32 %v4229_v39, %v6971_v32  ;;  %v4221_v31 = vadd.f32 %v4555_v19, %v4220_v57 }
0x1208   : > { %v5047_v6 = vpop.f32.mrf.mxu0 }
0x1209   : > { %4249 = vst.msk [vmem:[%s619_s22 + $0x30] sm:$0xff] %vm643_vm0, %v4241_v47  ;;  %v4239_v36 = vadd.f32 %v4221_v31, %v6966_v58  ;;  %v4232_v13 = vadd.f32 %v5047_v6, %v4555_v19 }
0x120a   : > { %v4223_v34 = vpop.f32.mrf.mxu0 }
0x120b   : > { %4247 = vst.msk [vmem:[%s619_s22 + $0x20] sm:$0xff] %vm643_vm0, %v4239_v36  ;;  %v4242_v21 = vadd.f32 %v4232_v13, %v6979_v40  ;;  %v4224_v12 = vadd.f32 %v4555_v19, %v4223_v34 }
0x120d   : > { %4250 = vst.msk [vmem:[%s619_s22 + $0x38] sm:$0xff] %vm643_vm0, %v4242_v21  ;;  %v4240_v16 = vadd.f32 %v4224_v12, %v6976_v15 }
0x120f   : > { %4248 = vst.msk [vmem:[%s619_s22 + $0x28] sm:$0xff] %vm643_vm0, %v4240_v16 }
0x1210 PF: > { %s30_s27 = sadd.s32 1, %s5502_s27  }
0x1211   : > { %p27_p2 = scmp.ge.s32.totalorder %s30_s27, 4  }
0x1213   :  { %29 = sbr.rel (!%p27_p2) target bundleno = 6 (0x6), region = 158 }
0x1218   :  { %4272 = vsyncpa [#allocation3], 1 }
0x1219   :  { %4274 = vsyncpa [#allocation3 + $0x1], 1 }
0x121a   :  { %4275 = vsyncpa [#allocation5], 1 }

</bundles_post_ra>
